<compile_context>
chip_gen: v5e
topology: v5e:2x2
jax: 0.10.0
libtpu: 0.0.40
codegen_flags: <defaults>
</compile_context>

<pallas_src>
import functools

import jax
import jax.numpy as jnp
from jax.experimental import pallas as pl
from jax.experimental.pallas import tpu as pltpu


def _rcab_kernel(x_ref, w1_ref, b1_ref, w2_ref, b2_ref,
                 cw1_ref, cb1_ref, cw2_ref, cb2_ref,
                 o_ref, pad_ref, *, H, W, C, LP):
    """One grid step = one batch image (full H, W, C tile in VMEM)."""
    Wp = W + LP + 1                                             # scratch width
    C3 = 3 * C

    # ---- zero only the border cells the 3x3 taps read --------------------
    # Re-done every step (2 full rows + 2 thin columns, cheap) so correctness
    # does not depend on program_id==0 running on every core when the batch
    # axis is sharded across TensorCores.
    zrow = jnp.zeros((Wp, C), jnp.bfloat16)
    pad_ref[0] = zrow
    pad_ref[H + 1] = zrow
    zcol = jnp.zeros((H, 1, C), jnp.bfloat16)
    pad_ref[1:H + 1, LP - 1:LP, :] = zcol
    pad_ref[1:H + 1, LP + W:LP + W + 1, :] = zcol

    def conv3x3(w_ref, bias):
        # One kw-im2col over all H+2 padded rows, ONE MXU dot with K=3C and
        # N=3C (the 3 kh weight blocks stacked along the MXU column axis),
        # then 3 row-shifted adds recombine the kh contributions.
        win = pad_ref[:, LP - 1:LP + W + 1, :]                   # (H+2, W+2, C) bf16
        lhs = jnp.concatenate(
            [win[:, 0:W], win[:, 1:W + 1], win[:, 2:W + 2]],
            axis=-1)                                             # (H+2, W, 3C) bf16
        p = jnp.dot(lhs.reshape((H + 2) * W, C3), w_ref[...],
                    preferred_element_type=jnp.float32)          # ((H+2)*W, 3C) f32
        p = p.reshape(H + 2, W, C3)
        out = (p[0:H, :, 0:C]
               + p[1:H + 1, :, C:2 * C]
               + p[2:H + 2, :, 2 * C:3 * C])                     # (H, W, C) f32
        return out + bias                                        # bias (1, C) bcast

    x = x_ref[0]                                                 # (H, W, C) f32

    # ---- conv1 (3x3, pad=1, bias) + ReLU ---------------------------------
    # Stage x (as bf16) into the sublane-offset interior of the pad buffer.
    pad_ref[1:H + 1, LP:LP + W, :] = x.astype(jnp.bfloat16)
    h1 = jnp.maximum(conv3x3(w1_ref, b1_ref[...]), 0.0)          # (H, W, C) f32

    # ---- conv2 (3x3, pad=1, bias) ----------------------------------------
    # Reuse the same pad buffer: interior fully overwritten, border stays 0.
    pad_ref[1:H + 1, LP:LP + W, :] = h1.astype(jnp.bfloat16)
    h2 = conv3x3(w2_ref, b2_ref[...])                            # (H, W, C) f32

    # ---- CALayer: GAP -> 1x1 conv -> ReLU -> 1x1 conv -> sigmoid (f32) ----
    y = jnp.mean(h2.reshape(H * W, C), axis=0, keepdims=True)    # (1, C)
    y = jnp.maximum(
        jnp.dot(y, cw1_ref[...], preferred_element_type=jnp.float32)
        + cb1_ref[...], 0.0)                                     # (1, C//r)
    y = jax.nn.sigmoid(
        jnp.dot(y, cw2_ref[...], preferred_element_type=jnp.float32)
        + cb2_ref[...])                                          # (1, C)

    # ---- channel scaling + residual add (residual from the input block) --
    out = h2 * y.reshape(1, 1, C) + x
    o_ref[0] = out.astype(o_ref.dtype)


def _vmem_capacity_bytes():
    """Physical per-core VMEM (falls back to 128 MiB if the query fails)."""
    try:
        info = pltpu.get_tpu_info()
        cap = getattr(info, "vmem_capacity_bytes", None)
        if cap:
            return int(cap)
    except Exception:
        pass
    return 128 * 1024 * 1024


def rcab_forward(x_nchw, params):
    """x_nchw: (N, C, H, W) float32. Returns (N, C, H, W)."""
    w1, b1, w2, b2, cw1, cb1, cw2, cb2 = params
    N, C, H, W = x_nchw.shape
    Cr = cw1.shape[1]
    C3 = 3 * C

    x = jnp.transpose(x_nchw, (0, 2, 3, 1))                      # NHWC

    def pack(w):
        # (9, Cin, Cout) -> (3C, 3C): K axis kw-major (matches the im2col
        # concat order), N axis kh-major (3 kh weight blocks stacked along
        # the MXU column axis). bf16 for the MXU fast path.
        w4 = w.reshape(3, 3, C, C)                               # (kh, kw, cin, cout)
        return (jnp.transpose(w4, (1, 2, 0, 3))                  # (kw, cin, kh, cout)
                .reshape(C3, C3).astype(jnp.bfloat16))

    w1p, w2p = pack(w1), pack(w2)

    LP = 8                                                       # aligned left pad
    Wp = W + LP + 1

    # Per-step VMEM working set: double-buffered IO blocks, packed weights,
    # bf16 pad scratch, bf16 im2col lhs + f32 dot output, f32 h1/h2/out temps.
    blk = H * W * C * 4
    est = (4 * blk                                               # x / o, 2 buffers each
           + (H + 2) * Wp * C * 2                                # bf16 pad scratch
           + (H + 2) * W * C3 * (2 + 4)                          # im2col lhs + dot out
           + 6 * blk                                             # h1/h2/out temporaries
           + 2 * 2 * C3 * C3 * 2)                                # packed conv weights
    cap = _vmem_capacity_bytes()
    vmem_bytes = int(min(int(0.85 * cap),                        # headroom vs physical
                         max(32 * 1024 * 1024, 2 * est)))

    kernel = functools.partial(_rcab_kernel, H=H, W=W, C=C, LP=LP)
    out = pl.pallas_call(
        kernel,
        out_shape=jax.ShapeDtypeStruct((N, H, W, C), x.dtype),
        grid_spec=pltpu.PrefetchScalarGridSpec(
            num_scalar_prefetch=0,
            grid=(N,),
            in_specs=[
                pl.BlockSpec((1, H, W, C), lambda b: (b, 0, 0, 0)),  # x
                pl.BlockSpec((C3, C3), lambda b: (0, 0)),            # conv1 w (packed)
                pl.BlockSpec((1, C), lambda b: (0, 0)),              # conv1 bias
                pl.BlockSpec((C3, C3), lambda b: (0, 0)),            # conv2 w (packed)
                pl.BlockSpec((1, C), lambda b: (0, 0)),              # conv2 bias
                pl.BlockSpec((C, Cr), lambda b: (0, 0)),             # CA down weight
                pl.BlockSpec((1, Cr), lambda b: (0, 0)),             # CA down bias
                pl.BlockSpec((Cr, C), lambda b: (0, 0)),             # CA up weight
                pl.BlockSpec((1, C), lambda b: (0, 0)),              # CA up bias
            ],
            out_specs=pl.BlockSpec((1, H, W, C), lambda b: (b, 0, 0, 0)),
            scratch_shapes=[pltpu.VMEM((H + 2, Wp, C), jnp.bfloat16)],
        ),
        compiler_params=pltpu.CompilerParams(
            dimension_semantics=("parallel",),
            vmem_limit_bytes=vmem_bytes),
    )(x, w1p, b1, w2p, b2, cw1, cb1, cw2, cb2)

    return jnp.transpose(out, (0, 3, 1, 2))                      # back to NCHW


def rcab_reference(x_nchw, params):
    """Pure-JAX f32 reference, same math (shift-and-matmul), NHWC internally."""
    w1, b1, w2, b2, cw1, cb1, cw2, cb2 = params
    N, C, H, W = x_nchw.shape
    x = jnp.transpose(x_nchw, (0, 2, 3, 1))

    def conv3x3(inp, w, b):
        p = jnp.pad(inp, ((0, 0), (1, 1), (1, 1), (0, 0)))
        acc = jnp.zeros((N, H, W, C), jnp.float32)
        for kh in range(3):
            for kw in range(3):
                acc += jnp.einsum('nhwc,cd->nhwd',
                                  p[:, kh:kh + H, kw:kw + W, :], w[kh * 3 + kw])
        return acc + b[0]

    h1 = jnp.maximum(conv3x3(x, w1, b1), 0.0)
    h2 = conv3x3(h1, w2, b2)
    y = jnp.mean(h2, axis=(1, 2), keepdims=True)                 # (N,1,1,C)
    y = jnp.maximum(jnp.einsum('nhwc,cd->nhwd', y, cw1) + cb1[0], 0.0)
    y = jax.nn.sigmoid(jnp.einsum('nhwc,cd->nhwd', y, cw2) + cb2[0])
    out = h2 * y + x
    return jnp.transpose(out, (0, 3, 1, 2))


def make_params(key, n_feat, reduction):
    """Deterministic synthetic parameters (weights stored as
    (kh*kw, Cin, Cout) for the convs and (Cin, Cout) for the 1x1s)."""
    cr = n_feat // reduction
    ks = jax.random.split(key, 8)
    s = 0.05
    w1 = s * jax.random.normal(ks[0], (9, n_feat, n_feat), jnp.float32)
    b1 = s * jax.random.normal(ks[1], (1, n_feat), jnp.float32)
    w2 = s * jax.random.normal(ks[2], (9, n_feat, n_feat), jnp.float32)
    b2 = s * jax.random.normal(ks[3], (1, n_feat), jnp.float32)
    cw1 = s * jax.random.normal(ks[4], (n_feat, cr), jnp.float32)
    cb1 = s * jax.random.normal(ks[5], (1, cr), jnp.float32)
    cw2 = s * jax.random.normal(ks[6], (cr, n_feat), jnp.float32)
    cb2 = s * jax.random.normal(ks[7], (1, n_feat), jnp.float32)
    return (w1, b1, w2, b2, cw1, cb1, cw2, cb2)


if __name__ == "__main__":
    N, C, H, W = 2, 16, 16, 16
    reduction = 4

    key = jax.random.PRNGKey(0)
    kx, kp = jax.random.split(key)
    x = jax.random.normal(kx, (N, C, H, W), jnp.float32)
    params = make_params(kp, C, reduction)

    out = jax.block_until_ready(rcab_forward(x, params))
    ref = jax.block_until_ready(rcab_reference(x, params))

    assert out.shape == (N, C, H, W)
    # bf16 MXU operands with f32 accumulation -> loosen tolerance vs f32 ref.
    assert jnp.allclose(out, ref, atol=2e-2, rtol=2e-2)
    print("KERNEL_OK")
</pallas_src>

<mosaic_0001>
module attributes {stable_mosaic.version = 11 : i64} {
  func.func @_rcab_kernel(%arg0: i32, %arg1: memref<1x16x16x16xf32, #tpu.memory_space<vmem>>, %arg2: memref<48x48xbf16, #tpu.memory_space<vmem>>, %arg3: memref<1x16xf32, #tpu.memory_space<vmem>>, %arg4: memref<48x48xbf16, #tpu.memory_space<vmem>>, %arg5: memref<1x16xf32, #tpu.memory_space<vmem>>, %arg6: memref<16x4xf32, #tpu.memory_space<vmem>>, %arg7: memref<1x4xf32, #tpu.memory_space<vmem>>, %arg8: memref<4x16xf32, #tpu.memory_space<vmem>>, %arg9: memref<1x16xf32, #tpu.memory_space<vmem>>, %arg10: memref<1x16x16x16xf32, #tpu.memory_space<vmem>>, %arg11: memref<18x25x16xbf16, #tpu.memory_space<vmem>>) attributes {dimension_semantics = [#tpu.dimension_semantics<parallel>], iteration_bounds = array<i64: 2>, scalar_prefetch = 0 : i64, scratch_operands = 1 : i64, tpu.core_type = #tpu.core_type<tc>, window_params = [{transform_indices = @transform_0, window_bounds = array<i64: 1, 16, 16, 16>}, {pipeline_mode = #tpu.pipeline_mode<synchronous>, transform_indices = @transform_1, window_bounds = array<i64: 48, 48>}, {pipeline_mode = #tpu.pipeline_mode<synchronous>, transform_indices = @transform_2, window_bounds = array<i64: 1, 16>}, {pipeline_mode = #tpu.pipeline_mode<synchronous>, transform_indices = @transform_3, window_bounds = array<i64: 48, 48>}, {pipeline_mode = #tpu.pipeline_mode<synchronous>, transform_indices = @transform_4, window_bounds = array<i64: 1, 16>}, {pipeline_mode = #tpu.pipeline_mode<synchronous>, transform_indices = @transform_5, window_bounds = array<i64: 16, 4>}, {pipeline_mode = #tpu.pipeline_mode<synchronous>, transform_indices = @transform_6, window_bounds = array<i64: 1, 4>}, {pipeline_mode = #tpu.pipeline_mode<synchronous>, transform_indices = @transform_7, window_bounds = array<i64: 4, 16>}, {pipeline_mode = #tpu.pipeline_mode<synchronous>, transform_indices = @transform_8, window_bounds = array<i64: 1, 16>}, {transform_indices = @transform_9, window_bounds = array<i64: 1, 16, 16, 16>}]} {
    %cst = arith.constant 0.000000e+00 : bf16
    %0 = vector.broadcast %cst : bf16 to vector<25x16xbf16>
    %c0 = arith.constant 0 : index
    %c0_0 = arith.constant 0 : index
    %c0_1 = arith.constant 0 : index
    %1 = vector.load %arg11[%c0, %c0_0, %c0_1] : memref<18x25x16xbf16, #tpu.memory_space<vmem>>, vector<1x25x16xbf16>
    %2 = vector.shape_cast %1 : vector<1x25x16xbf16> to vector<25x16xbf16>
    %3 = vector.shape_cast %0 : vector<25x16xbf16> to vector<1x25x16xbf16>
    tpu.vector_store %arg11[%c0, %c0_0, %c0_1], %3 {strides = array<i32>} : memref<18x25x16xbf16, #tpu.memory_space<vmem>>, vector<1x25x16xbf16>,
    %c17 = arith.constant 17 : index
    %c0_2 = arith.constant 0 : index
    %c0_3 = arith.constant 0 : index
    %4 = vector.load %arg11[%c17, %c0_2, %c0_3] : memref<18x25x16xbf16, #tpu.memory_space<vmem>>, vector<1x25x16xbf16>
    %5 = vector.shape_cast %4 : vector<1x25x16xbf16> to vector<25x16xbf16>
    %6 = vector.shape_cast %0 : vector<25x16xbf16> to vector<1x25x16xbf16>
    tpu.vector_store %arg11[%c17, %c0_2, %c0_3], %6 {strides = array<i32>} : memref<18x25x16xbf16, #tpu.memory_space<vmem>>, vector<1x25x16xbf16>,
    %cst_4 = arith.constant 0.000000e+00 : bf16
    %7 = vector.broadcast %cst_4 : bf16 to vector<16x1x16xbf16>
    %c1 = arith.constant 1 : index
    %c7 = arith.constant 7 : index
    %c0_5 = arith.constant 0 : index
    %8 = vector.load %arg11[%c1, %c7, %c0_5] : memref<18x25x16xbf16, #tpu.memory_space<vmem>>, vector<16x1x16xbf16>
    tpu.vector_store %arg11[%c1, %c7, %c0_5], %7 {strides = array<i32>} : memref<18x25x16xbf16, #tpu.memory_space<vmem>>, vector<16x1x16xbf16>,
    %c1_6 = arith.constant 1 : index
    %c24 = arith.constant 24 : index
    %c0_7 = arith.constant 0 : index
    %9 = vector.load %arg11[%c1_6, %c24, %c0_7] : memref<18x25x16xbf16, #tpu.memory_space<vmem>>, vector<16x1x16xbf16>
    tpu.vector_store %arg11[%c1_6, %c24, %c0_7], %7 {strides = array<i32>} : memref<18x25x16xbf16, #tpu.memory_space<vmem>>, vector<16x1x16xbf16>,
    %c0_8 = arith.constant 0 : index
    %c0_9 = arith.constant 0 : index
    %c0_10 = arith.constant 0 : index
    %c0_11 = arith.constant 0 : index
    %10 = vector.load %arg1[%c0_8, %c0_9, %c0_10, %c0_11] : memref<1x16x16x16xf32, #tpu.memory_space<vmem>>, vector<1x16x16x16xf32>
    %11 = vector.shape_cast %10 : vector<1x16x16x16xf32> to vector<16x16x16xf32>
    %12 = arith.truncf %11 : vector<16x16x16xf32> to vector<16x16x16xbf16>
    %c1_12 = arith.constant 1 : index
    %c8 = arith.constant 8 : index
    %c0_13 = arith.constant 0 : index
    %13 = vector.load %arg11[%c1_12, %c8, %c0_13] : memref<18x25x16xbf16, #tpu.memory_space<vmem>>, vector<16x16x16xbf16>
    tpu.vector_store %arg11[%c1_12, %c8, %c0_13], %12 {strides = array<i32>} : memref<18x25x16xbf16, #tpu.memory_space<vmem>>, vector<16x16x16xbf16>,
    %c0_14 = arith.constant 0 : index
    %c0_15 = arith.constant 0 : index
    %14 = vector.load %arg3[%c0_14, %c0_15] : memref<1x16xf32, #tpu.memory_space<vmem>>, vector<1x16xf32>
    %c0_16 = arith.constant 0 : index
    %c7_17 = arith.constant 7 : index
    %c0_18 = arith.constant 0 : index
    %15 = vector.load %arg11[%c0_16, %c7_17, %c0_18] : memref<18x25x16xbf16, #tpu.memory_space<vmem>>, vector<18x18x16xbf16>
    %16 = vector.extract_strided_slice %15 {offsets = [0, 0, 0], sizes = [18, 16, 16], strides = [1, 1, 1]} : vector<18x18x16xbf16> to vector<18x16x16xbf16>
    %17 = vector.extract_strided_slice %15 {offsets = [0, 1, 0], sizes = [18, 16, 16], strides = [1, 1, 1]} : vector<18x18x16xbf16> to vector<18x16x16xbf16>
    %18 = vector.extract_strided_slice %15 {offsets = [0, 2, 0], sizes = [18, 16, 16], strides = [1, 1, 1]} : vector<18x18x16xbf16> to vector<18x16x16xbf16>
    %19 = tpu.concatenate %16, %17, %18 in 2 : vector<18x16x16xbf16>, vector<18x16x16xbf16>, vector<18x16x16xbf16> -> vector<18x16x48xbf16>
    %20 = vector.shape_cast %19 : vector<18x16x48xbf16> to vector<288x48xbf16>
    %c0_19 = arith.constant 0 : index
    %c0_20 = arith.constant 0 : index
    %21 = vector.load %arg2[%c0_19, %c0_20] : memref<48x48xbf16, #tpu.memory_space<vmem>>, vector<48x48xbf16>
    %cst_21 = arith.constant dense<0.000000e+00> : vector<288x48xf32>
    %22 = tpu.matmul %20, %21, %cst_21 {dimension_numbers = #tpu.dot_dimension_numbers<[1], [0], [0], [1], [0, 0, 1, 1], [], []>} : vector<288x48xbf16>, vector<48x48xbf16>, vector<288x48xf32> -> vector<288x48xf32>
    %23 = vector.shape_cast %22 : vector<288x48xf32> to vector<18x16x48xf32>
    %24 = vector.extract_strided_slice %23 {offsets = [0, 0, 0], sizes = [16, 16, 16], strides = [1, 1, 1]} : vector<18x16x48xf32> to vector<16x16x16xf32>
    %25 = vector.extract_strided_slice %23 {offsets = [1, 0, 16], sizes = [16, 16, 16], strides = [1, 1, 1]} : vector<18x16x48xf32> to vector<16x16x16xf32>
    %26 = arith.addf %24, %25 : vector<16x16x16xf32>
    %27 = vector.extract_strided_slice %23 {offsets = [2, 0, 32], sizes = [16, 16, 16], strides = [1, 1, 1]} : vector<18x16x48xf32> to vector<16x16x16xf32>
    %28 = arith.addf %26, %27 : vector<16x16x16xf32>
    %29 = vector.shape_cast %14 : vector<1x16xf32> to vector<1x1x16xf32>
    %30 = vector.broadcast %29 : vector<1x1x16xf32> to vector<16x16x16xf32>
    %31 = arith.addf %28, %30 : vector<16x16x16xf32>
    %cst_22 = arith.constant 0.000000e+00 : f32
    %32 = vector.broadcast %cst_22 : f32 to vector<16x16x16xf32>
    %33 = arith.maximumf %31, %32 : vector<16x16x16xf32>
    %34 = arith.truncf %33 : vector<16x16x16xf32> to vector<16x16x16xbf16>
    %c1_23 = arith.constant 1 : index
    %c8_24 = arith.constant 8 : index
    %c0_25 = arith.constant 0 : index
    %35 = vector.load %arg11[%c1_23, %c8_24, %c0_25] : memref<18x25x16xbf16, #tpu.memory_space<vmem>>, vector<16x16x16xbf16>
    tpu.vector_store %arg11[%c1_23, %c8_24, %c0_25], %34 {strides = array<i32>} : memref<18x25x16xbf16, #tpu.memory_space<vmem>>, vector<16x16x16xbf16>,
    %c0_26 = arith.constant 0 : index
    %c0_27 = arith.constant 0 : index
    %36 = vector.load %arg5[%c0_26, %c0_27] : memref<1x16xf32, #tpu.memory_space<vmem>>, vector<1x16xf32>
    %c0_28 = arith.constant 0 : index
    %c7_29 = arith.constant 7 : index
    %c0_30 = arith.constant 0 : index
    %37 = vector.load %arg11[%c0_28, %c7_29, %c0_30] : memref<18x25x16xbf16, #tpu.memory_space<vmem>>, vector<18x18x16xbf16>
    %38 = vector.extract_strided_slice %37 {offsets = [0, 0, 0], sizes = [18, 16, 16], strides = [1, 1, 1]} : vector<18x18x16xbf16> to vector<18x16x16xbf16>
    %39 = vector.extract_strided_slice %37 {offsets = [0, 1, 0], sizes = [18, 16, 16], strides = [1, 1, 1]} : vector<18x18x16xbf16> to vector<18x16x16xbf16>
    %40 = vector.extract_strided_slice %37 {offsets = [0, 2, 0], sizes = [18, 16, 16], strides = [1, 1, 1]} : vector<18x18x16xbf16> to vector<18x16x16xbf16>
    %41 = tpu.concatenate %38, %39, %40 in 2 : vector<18x16x16xbf16>, vector<18x16x16xbf16>, vector<18x16x16xbf16> -> vector<18x16x48xbf16>
    %42 = vector.shape_cast %41 : vector<18x16x48xbf16> to vector<288x48xbf16>
    %c0_31 = arith.constant 0 : index
    %c0_32 = arith.constant 0 : index
    %43 = vector.load %arg4[%c0_31, %c0_32] : memref<48x48xbf16, #tpu.memory_space<vmem>>, vector<48x48xbf16>
    %cst_33 = arith.constant dense<0.000000e+00> : vector<288x48xf32>
    %44 = tpu.matmul %42, %43, %cst_33 {dimension_numbers = #tpu.dot_dimension_numbers<[1], [0], [0], [1], [0, 0, 1, 1], [], []>} : vector<288x48xbf16>, vector<48x48xbf16>, vector<288x48xf32> -> vector<288x48xf32>
    %45 = vector.shape_cast %44 : vector<288x48xf32> to vector<18x16x48xf32>
    %46 = vector.extract_strided_slice %45 {offsets = [0, 0, 0], sizes = [16, 16, 16], strides = [1, 1, 1]} : vector<18x16x48xf32> to vector<16x16x16xf32>
    %47 = vector.extract_strided_slice %45 {offsets = [1, 0, 16], sizes = [16, 16, 16], strides = [1, 1, 1]} : vector<18x16x48xf32> to vector<16x16x16xf32>
    %48 = arith.addf %46, %47 : vector<16x16x16xf32>
    %49 = vector.extract_strided_slice %45 {offsets = [2, 0, 32], sizes = [16, 16, 16], strides = [1, 1, 1]} : vector<18x16x48xf32> to vector<16x16x16xf32>
    %50 = arith.addf %48, %49 : vector<16x16x16xf32>
    %51 = vector.shape_cast %36 : vector<1x16xf32> to vector<1x1x16xf32>
    %52 = vector.broadcast %51 : vector<1x1x16xf32> to vector<16x16x16xf32>
    %53 = arith.addf %50, %52 : vector<16x16x16xf32>
    %54 = vector.shape_cast %53 : vector<16x16x16xf32> to vector<256x16xf32>
    %cst_34 = arith.constant dense<0.000000e+00> : vector<16xf32>
    %55 = vector.multi_reduction <add>, %54, %cst_34 [0] : vector<256x16xf32> to vector<16xf32>
    %56 = vector.shape_cast %55 : vector<16xf32> to vector<1x16xf32>
    %cst_35 = arith.constant 2.560000e+02 : f32
    %57 = vector.broadcast %cst_35 : f32 to vector<1x16xf32>
    %58 = arith.divf %56, %57 : vector<1x16xf32>
    %c0_36 = arith.constant 0 : index
    %c0_37 = arith.constant 0 : index
    %59 = vector.load %arg6[%c0_36, %c0_37] : memref<16x4xf32, #tpu.memory_space<vmem>>, vector<16x4xf32>
    %cst_38 = arith.constant dense<0.000000e+00> : vector<1x4xf32>
    %60 = tpu.matmul %58, %59, %cst_38 {dimension_numbers = #tpu.dot_dimension_numbers<[1], [0], [0], [1], [0, 0, 1, 1], [], []>} : vector<1x16xf32>, vector<16x4xf32>, vector<1x4xf32> -> vector<1x4xf32>
    %c0_39 = arith.constant 0 : index
    %c0_40 = arith.constant 0 : index
    %61 = vector.load %arg7[%c0_39, %c0_40] : memref<1x4xf32, #tpu.memory_space<vmem>>, vector<1x4xf32>
    %62 = arith.addf %60, %61 : vector<1x4xf32>
    %cst_41 = arith.constant 0.000000e+00 : f32
    %63 = vector.broadcast %cst_41 : f32 to vector<1x4xf32>
    %64 = arith.maximumf %62, %63 : vector<1x4xf32>
    %c0_42 = arith.constant 0 : index
    %c0_43 = arith.constant 0 : index
    %65 = vector.load %arg8[%c0_42, %c0_43] : memref<4x16xf32, #tpu.memory_space<vmem>>, vector<4x16xf32>
    %cst_44 = arith.constant dense<0.000000e+00> : vector<1x16xf32>
    %66 = tpu.matmul %64, %65, %cst_44 {dimension_numbers = #tpu.dot_dimension_numbers<[1], [0], [0], [1], [0, 0, 1, 1], [], []>} : vector<1x4xf32>, vector<4x16xf32>, vector<1x16xf32> -> vector<1x16xf32>
    %c0_45 = arith.constant 0 : index
    %c0_46 = arith.constant 0 : index
    %67 = vector.load %arg9[%c0_45, %c0_46] : memref<1x16xf32, #tpu.memory_space<vmem>>, vector<1x16xf32>
    %68 = arith.addf %66, %67 : vector<1x16xf32>
    %69 = arith.negf %68 : vector<1x16xf32>
    %70 = math.exp %69 : vector<1x16xf32>
    %cst_47 = arith.constant 1.000000e+00 : f32
    %71 = vector.broadcast %cst_47 : f32 to vector<1x16xf32>
    %72 = arith.addf %71, %70 : vector<1x16xf32>
    %73 = arith.divf %71, %72 : vector<1x16xf32>
    %74 = vector.shape_cast %73 : vector<1x16xf32> to vector<1x1x16xf32>
    %75 = vector.broadcast %74 : vector<1x1x16xf32> to vector<16x16x16xf32>
    %76 = arith.mulf %53, %75 : vector<16x16x16xf32>
    %77 = arith.addf %76, %11 : vector<16x16x16xf32>
    %c0_48 = arith.constant 0 : index
    %c0_49 = arith.constant 0 : index
    %c0_50 = arith.constant 0 : index
    %c0_51 = arith.constant 0 : index
    %78 = vector.load %arg10[%c0_48, %c0_49, %c0_50, %c0_51] : memref<1x16x16x16xf32, #tpu.memory_space<vmem>>, vector<1x16x16x16xf32>
    %79 = vector.shape_cast %78 : vector<1x16x16x16xf32> to vector<16x16x16xf32>
    %80 = vector.shape_cast %77 : vector<16x16x16xf32> to vector<1x16x16x16xf32>
    tpu.vector_store %arg10[%c0_48, %c0_49, %c0_50, %c0_51], %80 {strides = array<i32>} : memref<1x16x16x16xf32, #tpu.memory_space<vmem>>, vector<1x16x16x16xf32>,
    return
  }
  func.func @transform_0(%arg0: i32) -> (i32, i32, i32, i32) {
    %c0_i32 = arith.constant 0 : i32
    %c0_i32_0 = arith.constant 0 : i32
    %c0_i32_1 = arith.constant 0 : i32
    %c0_i32_2 = arith.constant 0 : i32
    return %arg0, %c0_i32, %c0_i32_0, %c0_i32_1 : i32, i32, i32, i32
  }
  func.func @transform_1(%arg0: i32) -> (i32, i32) {
    %c0_i32 = arith.constant 0 : i32
    %c0_i32_0 = arith.constant 0 : i32
    %c0_i32_1 = arith.constant 0 : i32
    return %c0_i32, %c0_i32_0 : i32, i32
  }
  func.func @transform_2(%arg0: i32) -> (i32, i32) {
    %c0_i32 = arith.constant 0 : i32
    %c0_i32_0 = arith.constant 0 : i32
    %c0_i32_1 = arith.constant 0 : i32
    return %c0_i32, %c0_i32_0 : i32, i32
  }
  func.func @transform_3(%arg0: i32) -> (i32, i32) {
    %c0_i32 = arith.constant 0 : i32
    %c0_i32_0 = arith.constant 0 : i32
    %c0_i32_1 = arith.constant 0 : i32
    return %c0_i32, %c0_i32_0 : i32, i32
  }
  func.func @transform_4(%arg0: i32) -> (i32, i32) {
    %c0_i32 = arith.constant 0 : i32
    %c0_i32_0 = arith.constant 0 : i32
    %c0_i32_1 = arith.constant 0 : i32
    return %c0_i32, %c0_i32_0 : i32, i32
  }
  func.func @transform_5(%arg0: i32) -> (i32, i32) {
    %c0_i32 = arith.constant 0 : i32
    %c0_i32_0 = arith.constant 0 : i32
    %c0_i32_1 = arith.constant 0 : i32
    return %c0_i32, %c0_i32_0 : i32, i32
  }
  func.func @transform_6(%arg0: i32) -> (i32, i32) {
    %c0_i32 = arith.constant 0 : i32
    %c0_i32_0 = arith.constant 0 : i32
    %c0_i32_1 = arith.constant 0 : i32
    return %c0_i32, %c0_i32_0 : i32, i32
  }
  func.func @transform_7(%arg0: i32) -> (i32, i32) {
    %c0_i32 = arith.constant 0 : i32
    %c0_i32_0 = arith.constant 0 : i32
    %c0_i32_1 = arith.constant 0 : i32
    return %c0_i32, %c0_i32_0 : i32, i32
  }
  func.func @transform_8(%arg0: i32) -> (i32, i32) {
    %c0_i32 = arith.constant 0 : i32
    %c0_i32_0 = arith.constant 0 : i32
    %c0_i32_1 = arith.constant 0 : i32
    return %c0_i32, %c0_i32_0 : i32, i32
  }
  func.func @transform_9(%arg0: i32) -> (i32, i32, i32, i32) {
    %c0_i32 = arith.constant 0 : i32
    %c0_i32_0 = arith.constant 0 : i32
    %c0_i32_1 = arith.constant 0 : i32
    %c0_i32_2 = arith.constant 0 : i32
    return %arg0, %c0_i32, %c0_i32_0, %c0_i32_1 : i32, i32, i32, i32
  }
}

</mosaic_0001>

<bundles_post_ra>
// kernel: tpu_custom_call.1
= control target key start
LH: loop header
LB: loop body
LE: loop exit
PB: predicated region body
PF: predicated region fallthrough
CT: control target
= control target key end

     0   :  { %s6852_s0 = inlined_call_operand.hbm [shape: f32[2,16,16,16], index: 0, kind: input, shape index: {}]   ;;  %s6853_s1 = inlined_call_operand.hbm [shape: bf16[48,48], index: 1, kind: input, shape index: {}]   ;;  %s6854_s2 = inlined_call_operand.vmem [shape: f32[1,16], index: 2, kind: input, shape index: {}]   ;;  %s6855_s3 = inlined_call_operand.hbm [shape: bf16[48,48], index: 3, kind: input, shape index: {}]   ;;  %s6856_s4 = inlined_call_operand.vmem [shape: f32[1,16], index: 4, kind: input, shape index: {}]   ;;  %s6857_s5 = inlined_call_operand.vmem [shape: f32[16,4], index: 5, kind: input, shape index: {}]   ;;  %s6858_s6 = inlined_call_operand.vmem [shape: f32[1,4], index: 6, kind: input, shape index: {}]   ;;  %s6859_s7 = inlined_call_operand.vmem [shape: f32[4,16], index: 7, kind: input, shape index: {}]   ;;  %s6860_s8 = inlined_call_operand.vmem [shape: f32[1,16], index: 8, kind: input, shape index: {}]   ;;  %s6861_s9 = inlined_call_operand.hbm [shape: f32[2,16,16,16], index: 9, kind: output, shape index: {}]  }
   0x1   :  { %6862 = sst [smem:[#allocation14_spill]] %s6853_s1 }
   0x2   :  { %6863 = sst [smem:[#allocation15_spill]] %s6855_s3 }
   0x3   :  { %14 = vsyncpa [#allocation4], 0 }
   0x4   :  { %16 = vsyncpa [#allocation4 + $0x1], 0 }
   0x5   :  { %17 = vsyncpa [#allocation7], 0 }
   0x6   :  { %18 = vsyncpa [#allocation5], 0 }
   0x7   :  { %20 = vsyncpa [#allocation5 + $0x1], 0  ;;  %s4739_s30 = smov 0   ;;  %s4741_s10 = smov 0  }
   0x8   :  { %s4743_s11 = smov 0   ;;  %s4745_s12 = smov 0  }
   0x9 LB: > { %s4760_s13 = sadd.s32 4294967295, %s4673_s12   ;;  %s4117_s14 = sadd.s32 4294967294, %s4673_s12   ;;  %s4673_s12 = sphi %s4745_s12, %s6895_s12   ;;  %s4669_s11 = sphi %s4743_s11, %s6894_s11   ;;  %s4665_s10 = sphi %s4741_s10, %s6893_s10   ;;  %s4661_s30 = sphi %s4739_s30, %s6892_s30  }
   0xa   : > { %p46_p0 = scmp.ne.s32.totalorder %s4665_s10, %s4661_s30  ;;  %p47_p1 = scmp.eq.s32.totalorder %s4760_s13, 0 }
   0xb   : > { %p238_p2 = scmp.eq.s32.totalorder %s4760_s13, 1  ;;  %p244_p3 = scmp.eq.s32.totalorder %s4117_s14, 1 }
   0xc   : > { %p4769_p4 = por %p47_p1, %p46_p0  ;;  %p4118_p5 = scmp.ge.s32.totalorder %s4673_s12, 1 }
   0xd   : > { %p4774_p6 = por %p244_p3, %p46_p0  ;;  %p251_p7 = scmp.lt.s32.totalorder %s4673_s12, 3 }
   0xe   : > { %s6866_s1 = sld [smem:[#allocation14_spill]]  ;;  %s4675_s21 = smov [#allocation6]  }
   0xf   : > { %p4782_p8 = pnand %p4118_p5, %p251_p7  ;;  %s264_s22 = sshll.u32 %s4675_s21, 4  ;;  %s265_s22 = int_to_ptr.vmem [resolvable:$true] %s264_s22 }
  0x10   : > { %s6868_s3 = sld [smem:[#allocation15_spill]]  ;;  %s4676_s26 = smov 64  }
  0x11   : > { %p4225_p9 = pneg %p4782_p8  ;;  %s4677_s27 = smov 4  }
  0x12   : > { %s4678_s28 = smov [#allocation8]   ;;  %s4795_s14 = sadd.s32 1, %s4673_s12  }
  0x13   : > { %p4226_p10 = pnand %p4225_p9, %p47_p1  ;;  %s281_s29 = sshll.u32 %s4678_s28, 4  ;;  %s282_s29 = int_to_ptr.vmem [resolvable:$true] %s281_s29 }
  0x14   : > { %s262_s19 = sshll.u32 %s6866_s1, 4  ;;  %s33_s17 = sadd.s32 1, %s4669_s11  ;;  %s263_s19 = int_to_ptr.hbm [resolvable:$true] %s262_s19 }
  0x15   : > { %4228 = dma.hbm_to_vmem [thread:$0]  (!%p4226_p10), %s263_s19, 384, %s265_s22, [#allocation7], %s4676_s26, %s4676_s26, %s4677_s27  }
  0x16   : > { %s279_s25 = sshll.u32 %s6868_s3, 4  ;;  %s30_s18 = ssub.s32 %s4673_s12, %s4795_s14  ;;  %s280_s25 = int_to_ptr.hbm [resolvable:$true] %s279_s25 }
  0x17   : > { %4231 = dma.hbm_to_vmem [thread:$0]  (!%p4226_p10), %s280_s25, 384, %s282_s29, [#allocation7], %s4676_s26, %s4676_s26, %s4677_s27  }
  0x18   : > { %p40_p12 = scmp.ne.s32.totalorder %s4669_s11, %s4665_s10  ;;  %p31_p13 = scmp.eq.s32.totalorder %s30_s18, 0 }
  0x19   : > { %p41_p0 = scmp.eq.s32.totalorder %s4673_s12, 0  ;;  %p4242_p5 = scmp.lt.s32.totalorder %s4673_s12, 2 }
  0x1a   : > { %p4805_p3 = por %p238_p2, %p40_p12  ;;  %s310_s22 = sand.u32 1, %s4669_s11  }
  0x1b   : > { %s4811_s19 = scalar_select %p31_p13, %s4669_s11, %s33_s17  }
  0x1c   : > { %p42_p7 = por %p41_p0, %p40_p12  ;;  %s4122_s23 = sshll.u32 %s310_s22, 8 }
  0x1d   : > { %6870 = sst [smem:[#allocation13_spill]] %s4811_s19  ;;  %s4199_s24 = sshll.u32 %s4673_s12, 8 }
  0x1e   : > { %s319_s27 = scalar_lea.hbm %s6852_s0, %s4199_s24  ;;  %s314_s28 = scalar_lea.vmem [#allocation3], %s4122_s23 }
  0x1f   : > { %s322_s29 = sshll.u32 %s314_s28, 4  ;;  %s320_s18 = sshll.u32 %s319_s27, 4  ;;  %s323_s29 = int_to_ptr.vmem [resolvable:$true] %s322_s29  ;;  %s321_s18 = int_to_ptr.hbm [resolvable:$true] %s320_s18 }
  0x20   : > { %p4818_p2 = pnand %p4242_p5, %p42_p7  ;;  %s311_s17 = scalar_lea.sflag [#allocation4], %s310_s22 }
  0x21   : > { %s4537_s3 = sshra.s32 %s321_s18, 4  ;;  %s4544_s25 = scalar_lea.hbm %s6852_s0, 512  ;;  %s4538_s3 = int_to_ptr.hbm [resolvable:$true] %s4537_s3 }
  0x22   : > { %s4539_s19 = scalar_lea.hbm %s4538_s3, 256  ;;  %p4541_p10 = pneg %p4818_p2 }
  0x23   : > { %p4540_p9 = scmp.ne.s32.totalorder %s4538_s3, %s4539_s19  ;;  %p4545_p0 = scmp.lt.s32.totalorder %s4538_s3, %s6852_s0 }
  0x24   : > { %p4546_p5 = scmp.lt.s32.totalorder %s4544_s25, %s4539_s19 }
  0x25   : > { %p4542_p12 = pnand %p4541_p10, %p4540_p9 }
  0x26   : > { %p4547_p7 = por %p4546_p5, %p4545_p0 }
  0x27   : > { %p4543_p13 = pneg %p4542_p12 }
  0x29   : > { %p4548_p11 = pnand %p4547_p7, %p4543_p13 }
  0x2b   : > { %4551 = shalt.err (!%p4548_p11)
}
  0x2c   : > { %s4679_s22 = smov 128   ;;  %s4680_s28 = smov 8  }
  0x2d   : > { %4235 = dma.hbm_to_vmem [thread:$0]  (!%p4818_p2), %s321_s18, 4096, %s323_s29, %s311_s17, %s4679_s22, %s4679_s22, %s4680_s28  }
  0x2e   : > { %334 = sbr.rel (%p4782_p8) target bundleno = 1530 (0x5fa), region = 56  ;;  %s4835_s24 = sand.u32 (!%p4782_p8), 1, %s4665_s10  }
  0x2f   : > { %s4126_s3 = sshll.u32 (!%p4782_p8), %s4835_s24, 8  ;;  %s337_s19 = scalar_lea.sflag (!%p4782_p8), [#allocation4], %s4835_s24 }
  0x30   : > { %s4841_s23 = scalar_lea.vmem (!%p4782_p8), [#allocation3], %s4126_s3 }
  0x33   : > { %4612 = dma.done.wait (%p4769_p4), %s337_s19, 4096  }
  0x34   : > { %4614 = vsyncadd (%p4769_p4), %s337_s19, 4294963200 }
  0x35   : > { %4616 = dma.done.wait (%p47_p1), [#allocation7], 768  }
  0x36   : > { %4618 = vsyncadd (%p47_p1), [#allocation7], 4294966528  ;;  %vm387_vm0 = vcmask 125952   ;;  %v4681_v0 = vmov 0   ;;  %vm391_vm1 = vcmask 122880   ;;  %v504_v3 = vld [vmem:[%s4841_s23] sm:$0xff] }
  0x37   : > { %389 = vst.msk [vmem:[#allocation2 + $0x4] sm:$0xf] %vm387_vm0, %v4681_v0  ;;  %vm392_vm2 = vsmask.f32 256  ;;  %v394_v2 = vld [vmem:[#allocation2 + $0xc] sm:$0x1]  ;;  %v536_v6 = vpack.c.bf16 %v504_v3, %v504_v3 }
  0x38   : > { %390 = vst.msk [vmem:[#allocation2 + $0x8] sm:$0xf] %vm387_vm0, %v4681_v0  ;;  %vm4856_vm3 = vmand %vm391_vm1, %vm392_vm2  ;;  %v505_v4 = vld [vmem:[%s4841_s23 + $0x8] sm:$0xff]  ;;  %v506_v8 = vld [vmem:[%s4841_s23 + $0x10] sm:$0xff]  ;;  %s4682_s1 = smov 16   ;;  %vm1069_vm4 = vcmask 1042432  }
  0x39   : > { %388 = vst.msk [vmem:[#allocation2] sm:$0xf] %vm387_vm0, %v4681_v0  ;;  %v395_v5 = vsel %vm4856_vm3, 0, %v394_v2  ;;  %v537_v7 = vpack.c.bf16 %v505_v4, %v505_v4  ;;  %v507_v9 = vld [vmem:[%s4841_s23 + $0x18] sm:$0xff]  ;;  %v508_v10 = vld [vmem:[%s4841_s23 + $0x20] sm:$0xff]  ;;  %v538_v13 = vpack.c.bf16 %v506_v8, %v506_v8  ;;  %v509_v15 = vld [vmem:[%s4841_s23 + $0x28] sm:$0xff] }
  0x3a   : > { %398 = vst.msk [vmem:[#allocation2 + $0x110] sm:$0xf] %vm387_vm0, %v4681_v0  ;;  %v539_v14 = vpack.c.bf16 %v507_v9, %v507_v9  ;;  %v510_v16 = vld [vmem:[%s4841_s23 + $0x30] sm:$0xff]  ;;  %v540_v18 = vpack.c.bf16 %v508_v10, %v508_v10  ;;  %v511_v19 = vld [vmem:[%s4841_s23 + $0x38] sm:$0xff]  ;;  %v541_v20 = vpack.c.bf16 %v509_v15, %v509_v15  ;;  %v512_v22 = vld [vmem:[%s4841_s23 + $0x40] sm:$0xff]  ;;  %s4683_s15 = smov 32  }
  0x3b   : > { %399 = vst.msk [vmem:[#allocation2 + $0x114] sm:$0xf] %vm387_vm0, %v4681_v0  ;;  %v456_v21 = vld [vmem:[#allocation2 + $0x1c] sm:$0x1]  ;;  %v542_v23 = vpack.c.bf16 %v510_v16, %v510_v16  ;;  %v543_v24 = vpack.c.bf16 %v511_v19, %v511_v19  ;;  %v513_v25 = vld [vmem:[%s4841_s23 + $0x48] sm:$0xff]  ;;  %v544_v29 = vpack.c.bf16 %v512_v22, %v512_v22  ;;  %v522_v43 = vld [vmem:[%s4841_s23 + $0x90] sm:$0xff] }
  0x3c   : > { %400 = vst.msk [vmem:[#allocation2 + $0x118] sm:$0xf] %vm387_vm0, %v4681_v0  ;;  %v457_v28 = vsel %vm4856_vm3, 0, %v456_v21  ;;  %v545_v33 = vpack.c.bf16 %v513_v25, %v513_v25  ;;  %v459_v35 = vld [vmem:[#allocation2 + $0x2c] sm:$0x1]  ;;  %v523_v44 = vld [vmem:[%s4841_s23 + $0x98] sm:$0xff]  ;;  %v554_v47 = vpack.c.bf16 %v522_v43, %v522_v43 }
  0x3d   : > { %396 = vst [vmem:[#allocation2 + $0xc] sm:$0x1] %v395_v5  ;;  %v460_v39 = vsel %vm4856_vm3, 0, %v459_v35  ;;  %v555_v48 = vpack.c.bf16 %v523_v44, %v523_v44  ;;  %v515_v21 = vld [vmem:[%s4841_s23 + $0x58] sm:$0xff]  ;;  %v465_v22 = vld [vmem:[#allocation2 + $0x4c] sm:$0x1] }
  0x3e   : > { %v4870_v12 = vld [vmem:[#allocation2] sm:$0xf0]   ;;  %568 = vst.msk [vmem:[#allocation2 + $0x14] sm:$0xf] %vm387_vm0, %v536_v6  ;;  %vm405_vm5 = vcmask 125955   ;;  %vm1196_vm8 = vcmask 130048  }
  0x3f   : > { %v4868_v11 = vld [vmem:[#allocation2 + $0x4] sm:$0xff]   ;;  %569 = vst.msk [vmem:[#allocation2 + $0x18] sm:$0xf] %vm387_vm0, %v537_v7  ;;  %vm406_vm6 = vsmask.f32 7950  ;;  %vm1287_vm9 = vcmask 261120  }
  0x40   : > { %v729_v17 = vunpack.c.h.b16 %v4868_v11  ;;  %570 = vst.msk [vmem:[#allocation2 + $0x24] sm:$0xf] %vm387_vm0, %v538_v13  ;;  %v836_v26 = vshrl.u32 %v4868_v11, 16  ;;  %v839_v27 = vshll.u32 %v4868_v11, 16  ;;  %v1070_v41 = vrot.slane %v4868_v11, 5  ;;  %vm5085_vm7 = vmand %vm405_vm5, %vm406_vm6  ;;  %s4684_s20 = smov 112  }
  0x41   : > { %571 = vst.msk [vmem:[#allocation2 + $0x28] sm:$0xf] %vm387_vm0, %v539_v14  ;;  %v462_v14 = vld [vmem:[#allocation2 + $0x3c] sm:$0x1]  ;;  %vm1360_vm10 = vsmask.f32 4352 }
  0x42   : > { %572 = vst.msk [vmem:[#allocation2 + $0x34] sm:$0xf] %vm387_vm0, %v540_v18  ;;  %v838_v30 = vrot.slane %v836_v26, 4  ;;  %v841_v31 = vrot.slane %v839_v27, 5  ;;  %v514_v18 = vld [vmem:[%s4841_s23 + $0x50] sm:$0xff]  ;;  %vm1655_vm11 = vcmask 392192  }
  0x43   : > { %573 = vst.msk [vmem:[#allocation2 + $0x38] sm:$0xf] %vm387_vm0, %v541_v20  ;;  %s4685_s29 = smov 96   ;;  %vm3869_vm12 = vcmask 1043456   ;;  %vm3865_vm14 = vcmask 31744   ;;  %s6679_s27 = scalar_lea.vmem [#allocation9], %s4126_s3 }
  0x44   : > { %v604_v32 = vld [vmem:[#allocation2 + $0xc] sm:$0x1]  ;;  %574 = vst.msk [vmem:[#allocation2 + $0x44] sm:$0xf] %vm387_vm0, %v542_v23  ;;  %v842_v36 = vor.u32 %v841_v31, %v838_v30  ;;  %v524_v30 = vld [vmem:[%s4841_s23 + $0xa0] sm:$0xff]  ;;  %s4206_s3 = sshll.u32 %s4760_s13, 8 }
  0x45   : > { %v1033_v34 = vunpack.c.l.b16 %v604_v32  ;;  %575 = vst.msk [vmem:[#allocation2 + $0x48] sm:$0xf] %vm387_vm0, %v543_v24  ;;  %v4892_v38 = vld [vmem:[#allocation2 + $0x10] sm:$0xf0]   ;;  %v463_v24 = vsel %vm4856_vm3, 0, %v462_v14  ;;  %v547_v32 = vpack.c.bf16 %v515_v21, %v515_v21  ;;  %v556_v35 = vpack.c.bf16 %v524_v30, %v524_v30  ;;  %s4021_s28 = scalar_lea.hbm %s6861_s9, %s4206_s3  ;;  %s4022_s19 = sshll.u32 %s6679_s27, 4  ;;  %s4023_s19 = int_to_ptr.vmem [resolvable:$true] %s4022_s19 }
  0x46   : > { %v4890_v37 = vld [vmem:[#allocation2 + $0x14] sm:$0xff]   ;;  %458 = vst [vmem:[#allocation2 + $0x1c] sm:$0x1] %v457_v28  ;;  %979 = vrot.lane.b32.xlu0 %v842_v36, %s4682_s1  ;;  %v483_v14 = vld [vmem:[#allocation2 + $0xac] sm:$0x1]  ;;  %s4587_s17 = scalar_lea.hbm %s6861_s9, 512 }
  0x47   : > { %v1051_v40 = vpack.c.b16 %v1033_v34, %v1033_v34  ;;  %v732_v42 = vunpack.c.h.b16 %v4890_v37  ;;  %576 = vst.msk [vmem:[#allocation2 + $0x54] sm:$0xf] %vm387_vm0, %v544_v29  ;;  %v4904_v46 = vld [vmem:[#allocation2 + $0x20] sm:$0xf0]   ;;  %v844_v54 = vshrl.u32 %v4890_v37, 16  ;;  %v847_v55 = vshll.u32 %v4890_v37, 16 }
  0x48   : > { %v4902_v45 = vld [vmem:[#allocation2 + $0x24] sm:$0xff]   ;;  %577 = vst.msk [vmem:[#allocation2 + $0x58] sm:$0xf] %vm387_vm0, %v545_v33  ;;  %v1073_v57 = vrot.slane %v4890_v37, 5  ;;  %v546_v29 = vpack.c.bf16 %v514_v18, %v514_v18  ;;  %v466_v33 = vsel %vm4856_vm3, 0, %v465_v22 }
  0x49   : > { %v1071_v49 = vrot.slane %v1051_v40, 5  ;;  %v735_v50 = vunpack.c.h.b16 %v4902_v45  ;;  %461 = vst [vmem:[#allocation2 + $0x2c] sm:$0x1] %v460_v39  ;;  %v4910_v52 = vld [vmem:[#allocation2 + $0x30] sm:$0xf0]   ;;  %v846_v58 = vrot.slane %v844_v54, 4 }
  0x4a   : > { %v4908_v51 = vld [vmem:[#allocation2 + $0x34] sm:$0xff]   ;;  %586 = vst.msk [vmem:[#allocation2 + $0xa4] sm:$0xf] %vm387_vm0, %v554_v47  ;;  %v849_v59 = vrot.slane %v847_v55, 5  ;;  %v852_v60 = vshrl.u32 %v4902_v45, 16  ;;  %v855_v61 = vshll.u32 %v4902_v45, 16  ;;  %1128 = vrot.lane.b32.xlu2 %v1073_v57, %s4683_s15 }
  0x4b   : > { %v1072_v53 = vsel %vm1069_vm4, %v1070_v41, %v1071_v49  ;;  %587 = vst.msk [vmem:[#allocation2 + $0xa8] sm:$0xf] %vm387_vm0, %v555_v48  ;;  %v738_v56 = vunpack.c.h.b16 %v4908_v51  ;;  %v4925_v0 = vld [vmem:[#allocation2 + $0x40] sm:$0xf0]   ;;  %v860_v8 = vshrl.u32 %v4908_v51, 16  ;;  %v863_v16 = vshll.u32 %v4908_v51, 16 }
  0x4c   : > { %1126 = vrot.lane.b32.xlu1 %v1072_v53, %s4683_s15  ;;  %v4923_v63 = vld [vmem:[#allocation2 + $0x44] sm:$0xff]   ;;  %v850_v3 = vor.u32 %v849_v59, %v846_v58  ;;  %v854_v4 = vrot.slane %v852_v60, 4  ;;  %v857_v5 = vrot.slane %v855_v61, 5  ;;  %v1076_v23 = vrot.slane %v4902_v45, 5  ;;  %464 = vst [vmem:[#allocation2 + $0x3c] sm:$0x1] %v463_v24 }
  0x4d   : > { %v608_v62 = vld [vmem:[#allocation2 + $0x1c] sm:$0x1]  ;;  %v741_v9 = vunpack.c.h.b16 %v4923_v63  ;;  %v862_v25 = vrot.slane %v860_v8, 4  ;;  %v865_v31 = vrot.slane %v863_v16, 5  ;;  %v525_v34 = vld [vmem:[%s4841_s23 + $0xa8] sm:$0xff]  ;;  %v868_v43 = vshrl.u32 %v4923_v63, 16 }
  0x4e   : > { %v1034_v2 = vunpack.c.l.b16 %v608_v62  ;;  %1124 = vrot.lane.b32.xlu0 %v1070_v41, %s4683_s15  ;;  %v858_v15 = vor.u32 %v857_v5, %v854_v4  ;;  %v4941_v27 = vld [vmem:[#allocation2 + $0x50] sm:$0xf0]   ;;  %578 = vst.msk [vmem:[#allocation2 + $0x64] sm:$0xf] %vm387_vm0, %v546_v29  ;;  %v557_v36 = vpack.c.bf16 %v525_v34, %v525_v34  ;;  %v871_v44 = vshll.u32 %v4923_v63, 16  ;;  %v516_v55 = vld [vmem:[%s4841_s23 + $0x60] sm:$0xff] }
  0x4f   : > { %v4939_v26 = vld [vmem:[#allocation2 + $0x54] sm:$0xff]   ;;  %579 = vst.msk [vmem:[#allocation2 + $0x68] sm:$0xf] %vm387_vm0, %v547_v32  ;;  %v866_v41 = vor.u32 %v865_v31, %v862_v25  ;;  %v468_v47 = vld [vmem:[#allocation2 + $0x5c] sm:$0x1]  ;;  %v1079_v53 = vrot.slane %v4908_v51, 5  ;;  %v548_v60 = vpack.c.bf16 %v516_v55, %v516_v55 }
  0x50   : > { %v612_v6 = vld [vmem:[#allocation2 + $0x2c] sm:$0x1]  ;;  %v1052_v7 = vpack.c.b16 %v1034_v2, %v1034_v2  ;;  %467 = vst [vmem:[#allocation2 + $0x4c] sm:$0x1] %v466_v33  ;;  %v469_v48 = vsel %vm4856_vm3, 0, %v468_v47  ;;  %v870_v58 = vrot.slane %v868_v43, 4 }
  0x51   : > { %v1035_v13 = vunpack.c.l.b16 %v612_v6  ;;  %588 = vst.msk [vmem:[#allocation2 + $0xb4] sm:$0xf] %vm387_vm0, %v556_v35  ;;  %v873_v59 = vrot.slane %v871_v44, 5  ;;  %v4966_v2 = vld [vmem:[#allocation2 + $0xa0] sm:$0xf0]   ;;  %v876_v4 = vshrl.u32 %v4939_v26, 16 }
  0x52   : > { %v1074_v10 = vrot.slane %v1052_v7, 5  ;;  %589 = vst.msk [vmem:[#allocation2 + $0xb8] sm:$0xf] %vm387_vm0, %v557_v36  ;;  %v4964_v62 = vld [vmem:[#allocation2 + $0xa4] sm:$0xff]   ;;  %v879_v6 = vshll.u32 %v4939_v26, 16  ;;  %v526_v24 = vld [vmem:[%s4841_s23 + $0xb0] sm:$0xff] }
  0x53   : > { %v1053_v20 = vpack.c.b16 %v1035_v13, %v1035_v13  ;;  %v616_v49 = vld [vmem:[#allocation2 + $0x3c] sm:$0x1]  ;;  %470 = vst [vmem:[#allocation2 + $0x5c] sm:$0x1] %v469_v48  ;;  %v759_v13 = vunpack.c.h.b16 %v4964_v62  ;;  %v558_v29 = vpack.c.bf16 %v526_v24, %v526_v24  ;;  %v916_v36 = vshrl.u32 %v4964_v62, 16 }
  0x54   : > { %981 = vrot.lane.b32.xlu1 %v850_v3, %s4682_s1  ;;  %v1075_v19 = vsel %vm1069_vm4, %v1073_v57, %v1074_v10  ;;  %v1036_v54 = vunpack.c.l.b16 %v616_v49  ;;  %v517_v57 = vld [vmem:[%s4841_s23 + $0x68] sm:$0xff]  ;;  %580 = vst.msk [vmem:[#allocation2 + $0x74] sm:$0xf] %vm387_vm0, %v548_v60  ;;  %v874_v10 = vor.u32 %v873_v59, %v870_v58  ;;  %v527_v25 = vld [vmem:[%s4841_s23 + $0xb8] sm:$0xff]  ;;  %v1085_v47 = vrot.slane %v4939_v26, 5 }
  0x55   : > { %1130 = vrot.lane.b32.xlu2 %v1075_v19, %s4683_s15  ;;  %v1077_v28 = vrot.slane %v1053_v20, 5  ;;  %v549_v61 = vpack.c.bf16 %v517_v57, %v517_v57  ;;  %v878_v19 = vrot.slane %v876_v4, 4  ;;  %v881_v20 = vrot.slane %v879_v6, 5  ;;  %v4984_v31 = vld [vmem:[#allocation2 + $0x60] sm:$0xf0]  }
  0x56   : > { %983 = vrot.lane.b32.xlu0 %v858_v15, %s4682_s1  ;;  %v1054_v3 = vpack.c.b16 %v1036_v54, %v1036_v54  ;;  %v4982_v30 = vld [vmem:[#allocation2 + $0x64] sm:$0xff]   ;;  %v559_v32 = vpack.c.bf16 %v527_v25, %v527_v25  ;;  %590 = vst.msk [vmem:[#allocation2 + $0xc4] sm:$0xf] %vm387_vm0, %v558_v29  ;;  %v471_v43 = vld [vmem:[#allocation2 + $0x6c] sm:$0x1] }
  0x57   : > { %v1078_v40 = vsel %vm1069_vm4, %v1076_v23, %v1077_v28  ;;  %v620_v5 = vld [vmem:[#allocation2 + $0x4c] sm:$0x1]  ;;  %581 = vst.msk [vmem:[#allocation2 + $0x78] sm:$0xf] %vm387_vm0, %v549_v61  ;;  %v1082_v28 = vrot.slane %v4923_v63, 5  ;;  %v882_v33 = vor.u32 %v881_v20, %v878_v19  ;;  %v472_v44 = vsel %vm4856_vm3, 0, %v471_v43 }
  0x58   : > { %v1080_v7 = vrot.slane %v1054_v3, 5  ;;  %v1037_v8 = vunpack.c.l.b16 %v620_v5  ;;  %591 = vst.msk [vmem:[#allocation2 + $0xc8] sm:$0xf] %vm387_vm0, %v559_v32  ;;  %v5000_v57 = vld [vmem:[#allocation2 + $0xb0] sm:$0xf0]   ;;  %v884_v4 = vshrl.u32 %v4982_v30, 16 }
  0x59   : > { %473 = vst [vmem:[#allocation2 + $0x6c] sm:$0x1] %v472_v44  ;;  %v4998_v55 = vld [vmem:[#allocation2 + $0xb4] sm:$0xff]   ;;  %v887_v5 = vshll.u32 %v4982_v30, 16  ;;  %v486_v6 = vld [vmem:[#allocation2 + $0xbc] sm:$0x1] }
  0x5a   : > { %v1081_v15 = vsel %vm1069_vm4, %v1079_v53, %v1080_v7  ;;  %v1055_v16 = vpack.c.b16 %v1037_v8, %v1037_v8  ;;  %v624_v18 = vld [vmem:[#allocation2 + $0x5c] sm:$0x1]  ;;  %v762_v59 = vunpack.c.h.b16 %v4998_v55  ;;  %v487_v8 = vsel %vm4856_vm3, 0, %v486_v6 }
  0x5b   : > { %v1038_v22 = vunpack.c.l.b16 %v624_v18  ;;  %488 = vst [vmem:[#allocation2 + $0xbc] sm:$0x1] %v487_v8  ;;  %v1100_v18 = vrot.slane %v4964_v62, 5  ;;  %v886_v19 = vrot.slane %v884_v4, 4  ;;  %v889_v20 = vrot.slane %v887_v5, 5 }
  0x5c   : > { %1132 = vrot.lane.b32.xlu1 %v1076_v23, %s4683_s15  ;;  %v1083_v21 = vrot.slane %v1055_v16, 5  ;;  %v484_v23 = vsel %vm4856_vm3, 0, %v483_v14  ;;  %v519_v16 = vld [vmem:[%s4841_s23 + $0x78] sm:$0xff]  ;;  %v924_v25 = vshrl.u32 %v4998_v55, 16  ;;  %v1088_v43 = vrot.slane %v4982_v30, 5 }
  0x5d   : > { %1134 = vrot.lane.b32.xlu2 %v1078_v40, %s4683_s15  ;;  %485 = vst [vmem:[#allocation2 + $0xac] sm:$0x1] %v484_v23  ;;  %v1056_v35 = vpack.c.b16 %v1038_v22, %v1038_v22  ;;  %v919_v40 = vshll.u32 %v4964_v62, 16  ;;  %v5016_v22 = vld [vmem:[#allocation2 + $0x70] sm:$0xf0]   ;;  %v551_v24 = vpack.c.bf16 %v519_v16, %v519_v16  ;;  %v890_v32 = vor.u32 %v889_v20, %v886_v19 }
  0x5e   : > { %985 = vrot.lane.b32.xlu0 %v866_v41, %s4682_s1  ;;  %v1084_v34 = vsel %vm1069_vm4, %v1082_v28, %v1083_v21  ;;  %v5014_v21 = vld [vmem:[#allocation2 + $0x74] sm:$0xff]   ;;  %v926_v44 = vrot.slane %v924_v25, 4  ;;  %v1103_v20 = vrot.slane %v4998_v55, 5 }
  0x5f   : > { %v1086_v48 = vrot.slane %v1056_v35, 5  ;;  %v921_v54 = vrot.slane %v919_v40, 5  ;;  %583 = vst.msk [vmem:[#allocation2 + $0x88] sm:$0xf] %vm387_vm0, %v551_v24  ;;  %v474_v35 = vld [vmem:[#allocation2 + $0x7c] sm:$0x1] }
  0x60   : > { %v628_v7 = vld [vmem:[#allocation2 + $0x6c] sm:$0x1]  ;;  %v475_v40 = vsel %vm4856_vm3, 0, %v474_v35  ;;  %v892_v8 = vshrl.u32 %v5014_v21, 16 }
  0x61   : > { %v1087_v60 = vsel %vm1069_vm4, %v1085_v47, %v1086_v48  ;;  %v1039_v14 = vunpack.c.l.b16 %v628_v7  ;;  %476 = vst [vmem:[#allocation2 + $0x7c] sm:$0x1] %v475_v40 }
  0x63   : > { %v1057_v29 = vpack.c.b16 %v1039_v14, %v1039_v14  ;;  %v489_v14 = vld [vmem:[#allocation2 + $0xcc] sm:$0x1] }
  0x64   : > { %1136 = vrot.lane.b32.xlu1 %v1079_v53, %s4683_s15  ;;  %v644_v49 = vld [vmem:[#allocation2 + $0xac] sm:$0x1]  ;;  %v918_v53 = vrot.slane %v916_v36, 4  ;;  %v648_v36 = vld [vmem:[#allocation2 + $0xbc] sm:$0x1]  ;;  %v490_v16 = vsel %vm4856_vm3, 0, %v489_v14 }
  0x65   : > { %1138 = vrot.lane.b32.xlu2 %v1081_v15, %s4683_s15  ;;  %v1043_v58 = vunpack.c.l.b16 %v644_v49  ;;  %v518_v15 = vld [vmem:[%s4841_s23 + $0x70] sm:$0xff]  ;;  %v1044_v48 = vunpack.c.l.b16 %v648_v36  ;;  %v528_v49 = vld [vmem:[%s4841_s23 + $0xc0] sm:$0xff]  ;;  %491 = vst [vmem:[#allocation2 + $0xcc] sm:$0x1] %v490_v16 }
  0x66   : > { %987 = vrot.lane.b32.xlu0 %v874_v10, %s4682_s1  ;;  %v922_v3 = vor.u32 %v921_v54, %v918_v53  ;;  %v550_v23 = vpack.c.bf16 %v518_v15, %v518_v15  ;;  %v529_v53 = vld [vmem:[%s4841_s23 + $0xc8] sm:$0xff] }
  0x67   : > { %v1061_v61 = vpack.c.b16 %v1043_v58, %v1043_v58  ;;  %v5032_v58 = vld [vmem:[#allocation2 + $0xc4] sm:$0xff]   ;;  %v1062_v6 = vpack.c.b16 %v1044_v48, %v1044_v48 }
  0x68   : > { %582 = vst.msk [vmem:[#allocation2 + $0x84] sm:$0xf] %vm387_vm0, %v550_v23  ;;  %v632_v15 = vld [vmem:[#allocation2 + $0x7c] sm:$0x1]  ;;  %v894_v23 = vrot.slane %v892_v8, 4  ;;  %v935_v36 = vshll.u32 %v5032_v58, 16 }
  0x69   : > { %v1101_v10 = vrot.slane %v1061_v61, 5  ;;  %v560_v61 = vpack.c.bf16 %v528_v49, %v528_v49  ;;  %v1040_v19 = vunpack.c.l.b16 %v632_v15 }
  0x6b   : > { %592 = vst.msk [vmem:[#allocation2 + $0xd4] sm:$0xf] %vm387_vm0, %v560_v61  ;;  %v520_v61 = vld [vmem:[%s4841_s23 + $0x80] sm:$0xff] }
  0x6c   : > { %1140 = vrot.lane.b32.xlu1 %v1082_v28, %s4683_s15  ;;  %v1102_v28 = vsel %vm1069_vm4, %v1100_v18, %v1101_v10  ;;  %v895_v10 = vshll.u32 %v5014_v21, 16 }
  0x6d   : > { %1142 = vrot.lane.b32.xlu2 %v1084_v34, %s4683_s15 }
  0x6e   : > { %989 = vrot.lane.b32.xlu0 %v882_v33, %s4682_s1  ;;  %v927_v33 = vshll.u32 %v4998_v55, 16  ;;  %v897_v24 = vrot.slane %v895_v10, 5 }
  0x6f   : > { %v5048_v25 = vld [vmem:[#allocation2 + $0x84] sm:$0xff]  }
  0x70   : > { %v929_v54 = vrot.slane %v927_v33, 5  ;;  %v1058_v33 = vpack.c.b16 %v1040_v19, %v1040_v19  ;;  %v898_v35 = vor.u32 %v897_v24, %v894_v23  ;;  %v900_v16 = vshrl.u32 %v5048_v25, 16  ;;  %v477_v19 = vld [vmem:[#allocation2 + $0x8c] sm:$0x1] }
  0x71   : > { %v1106_v23 = vrot.slane %v5032_v58, 5 }
  0x72   : > { %v930_v7 = vor.u32 %v929_v54, %v926_v44  ;;  %v1091_v44 = vrot.slane %v5014_v21, 5  ;;  %v1092_v48 = vrot.slane %v1058_v33, 5  ;;  %v902_v33 = vrot.slane %v900_v16, 4 }
  0x74   : > { %1144 = vrot.lane.b32.xlu1 %v1085_v47, %s4683_s15  ;;  %v1089_v47 = vrot.slane %v1057_v29, 5  ;;  %v932_v29 = vshrl.u32 %v5032_v58, 16  ;;  %v1093_v10 = vsel %vm1069_vm4, %v1091_v44, %v1092_v48 }
  0x75   : > { %1146 = vrot.lane.b32.xlu2 %v1087_v60, %s4683_s15  ;;  %v5034_v60 = vld [vmem:[#allocation2 + $0xc0] sm:$0xf0]  }
  0x76   : > { %999 = vrot.lane.b32.xlu0 %v922_v3, %s4682_s1  ;;  %v561_v3 = vpack.c.bf16 %v529_v53, %v529_v53  ;;  %v1090_v5 = vsel %vm1069_vm4, %v1088_v43, %v1089_v47  ;;  %v934_v47 = vrot.slane %v932_v29, 4  ;;  %v5061_v53 = vld [vmem:[#allocation2 + $0xd0] sm:$0xf0]  }
  0x77   : > { %v530_v29 = vld [vmem:[%s4841_s23 + $0xd0] sm:$0xff] }
  0x78   : > { %593 = vst.msk [vmem:[#allocation2 + $0xd8] sm:$0xf] %vm387_vm0, %v561_v3  ;;  %v521_v3 = vld [vmem:[%s4841_s23 + $0x88] sm:$0xff] }
  0x7c   : > { %1164 = vrot.lane.b32.xlu1 %v1100_v18, %s4683_s15  ;;  %v1104_v18 = vrot.slane %v1062_v6, 5  ;;  %v552_v6 = vpack.c.bf16 %v520_v61, %v520_v61 }
  0x7d   : > { %1166 = vrot.lane.b32.xlu2 %v1102_v28, %s4683_s15  ;;  %v5050_v28 = vld [vmem:[#allocation2 + $0x80] sm:$0xf0]  }
  0x7e   : > { %991 = vrot.lane.b32.xlu0 %v890_v32, %s4682_s1  ;;  %v1105_v32 = vsel %vm1069_vm4, %v1103_v20, %v1104_v18  ;;  %584 = vst.msk [vmem:[#allocation2 + $0x94] sm:$0xf] %vm387_vm0, %v552_v6  ;;  %v903_v18 = vshll.u32 %v5048_v25, 16  ;;  %v408_v6 = vld [vmem:[#allocation2 + $0x10] sm:$0x8] }
  0x7f   : > { %v5059_v49 = vld [vmem:[#allocation2 + $0xd4] sm:$0xff]  }
  0x80   : > { %v943_v61 = vshll.u32 %v5059_v49, 16 }
  0x84   : > { %1148 = vrot.lane.b32.xlu1 %v1088_v43, %s4683_s15  ;;  %v652_v43 = vld [vmem:[#allocation2 + $0xcc] sm:$0x1] }
  0x85   : > { %1150 = vrot.lane.b32.xlu2 %v1090_v5, %s4683_s15  ;;  %v1045_v54 = vunpack.c.l.b16 %v652_v43  ;;  %v937_v5 = vrot.slane %v935_v36, 5  ;;  %v562_v36 = vpack.c.bf16 %v530_v29, %v530_v29  ;;  %v5083_v48 = vld [vmem:[#allocation2 + $0x90] sm:$0xf0]  }
  0x86   : > { %1001 = vrot.lane.b32.xlu0 %v930_v7, %s4682_s1  ;;  %v553_v7 = vpack.c.bf16 %v521_v3, %v521_v3 }
  0x87   : > { %v1063_v14 = vpack.c.b16 %v1045_v54, %v1045_v54  ;;  %v938_v15 = vor.u32 %v937_v5, %v934_v47  ;;  %594 = vst.msk [vmem:[#allocation2 + $0xe4] sm:$0xf] %vm387_vm0, %v562_v36 }
  0x88   : > { %585 = vst.msk [vmem:[#allocation2 + $0x98] sm:$0xf] %vm387_vm0, %v553_v7 }
  0x89   : > { %v1107_v24 = vrot.slane %v1063_v14, 5  ;;  %v492_v14 = vld [vmem:[#allocation2 + $0xdc] sm:$0x1] }
  0x8a   : > { %v493_v16 = vsel %vm4856_vm3, 0, %v492_v14 }
  0x8b   : > { %v1108_v3 = vsel %vm1069_vm4, %v1106_v23, %v1107_v24  ;;  %494 = vst [vmem:[#allocation2 + $0xdc] sm:$0x1] %v493_v16  ;;  %v945_v24 = vrot.slane %v943_v61, 5 }
  0x8c   : > { %1168 = vrot.lane.b32.xlu1 %v1103_v20, %s4683_s15  ;;  %v478_v20 = vsel %vm4856_vm3, 0, %v477_v19 }
  0x8d   : > { %1170 = vrot.lane.b32.xlu2 %v1105_v32, %s4683_s15  ;;  %479 = vst [vmem:[#allocation2 + $0x8c] sm:$0x1] %v478_v20  ;;  %v531_v32 = vld [vmem:[%s4841_s23 + $0xd8] sm:$0xff] }
  0x8e   : > { %993 = vrot.lane.b32.xlu0 %v898_v35, %s4682_s1  ;;  %v905_v35 = vrot.slane %v903_v18, 5  ;;  %v563_v43 = vpack.c.bf16 %v531_v32, %v531_v32  ;;  %v4202_v18 = vld [vmem:[#allocation6 + $0x10] sm:$0xff]  ;;  %v411_v32 = vld [vmem:[#allocation2 + $0x20] sm:$0x8] }
  0x8f   : > { %v5081_v47 = vld [vmem:[#allocation2 + $0x94] sm:$0xff]   ;;  %1715 = vmatpush.bf16.msra.mxu0 %v4202_v18  ;;  %4207 = vmatpush.bf16.msra.mxu3 %v4202_v18  ;;  %v1109_v18 = vrot.slane %v5059_v49, 5 }
  0x90   : > { %595 = vst.msk [vmem:[#allocation2 + $0xe8] sm:$0xf] %vm387_vm0, %v563_v43  ;;  %v906_v7 = vor.u32 %v905_v35, %v902_v33  ;;  %v4201_v33 = vld [vmem:[#allocation6 + $0x8] sm:$0xff]  ;;  %v5104_v43 = vld [vmem:[#allocation2 + $0xe0] sm:$0xf0]   ;;  %v911_v61 = vshll.u32 %v5081_v47, 16 }
  0x92   : > { %v656_v14 = vld [vmem:[#allocation2 + $0xdc] sm:$0x1] }
  0x93   : > { %1716 = vmatpush.bf16.msra.mxu0 %v4201_v33  ;;  %4208 = vmatpush.bf16.msra.mxu3 %v4201_v33  ;;  %v1046_v16 = vunpack.c.l.b16 %v656_v14  ;;  %v1097_v14 = vrot.slane %v5081_v47, 5 }
  0x94   : > { %1152 = vrot.lane.b32.xlu1 %v1091_v44, %s4683_s15  ;;  %v940_v44 = vshrl.u32 %v5059_v49, 16 }
  0x95   : > { %1154 = vrot.lane.b32.xlu2 %v1093_v10, %s4683_s15  ;;  %v409_v10 = vsel %vm5085_vm7, 0, %v408_v6 }
  0x96   : > { %1003 = vrot.lane.b32.xlu0 %v938_v15, %s4682_s1  ;;  %v636_v15 = vld [vmem:[#allocation2 + $0x8c] sm:$0x1]  ;;  %410 = vst [vmem:[#allocation2 + $0x10] sm:$0x8] %v409_v10  ;;  %v942_v20 = vrot.slane %v940_v44, 4  ;;  %v908_v44 = vshrl.u32 %v5081_v47, 16 }
  0x97   : > { %v1041_v19 = vunpack.c.l.b16 %v636_v15  ;;  %v5102_v36 = vld [vmem:[#allocation2 + $0xe4] sm:$0xff]  }
  0x98   : > { %v946_v6 = vor.u32 %v945_v24, %v942_v20  ;;  %v4200_v15 = vld [vmem:[#allocation6] sm:$0xff]  ;;  %v910_v20 = vrot.slane %v908_v44, 4  ;;  %v913_v24 = vrot.slane %v911_v61, 5  ;;  %v480_v61 = vld [vmem:[#allocation2 + $0x9c] sm:$0x1] }
  0x99   : > { %v1059_v29 = vpack.c.b16 %v1041_v19, %v1041_v19  ;;  %1717 = vmatpush.bf16.msra.mxu0 %v4200_v15  ;;  %4209 = vmatpush.bf16.msra.mxu3 %v4200_v15  ;;  %v532_v15 = vld [vmem:[%s4841_s23 + $0xe0] sm:$0xff] }
  0x9b   : > { %v1095_v35 = vrot.slane %v1059_v29, 5  ;;  %v1064_v29 = vpack.c.b16 %v1046_v16, %v1046_v16  ;;  %v533_v16 = vld [vmem:[%s4841_s23 + $0xe8] sm:$0xff] }
  0x9c   : > { %1172 = vrot.lane.b32.xlu1 %v1106_v23, %s4683_s15  ;;  %v1094_v23 = vrot.slane %v5048_v25, 5 }
  0x9d   : > { %1174 = vrot.lane.b32.xlu2 %v1108_v3, %s4683_s15  ;;  %v412_v3 = vsel %vm5085_vm7, 0, %v411_v32  ;;  %v1110_v32 = vrot.slane %v1064_v29, 5 }
  0x9e   : > { %995 = vrot.lane.b32.xlu0 %v906_v7, %s4682_s1  ;;  %413 = vst [vmem:[#allocation2 + $0x20] sm:$0x8] %v412_v3  ;;  %v1096_v7 = vsel %vm1069_vm4, %v1094_v23, %v1095_v35  ;;  %v914_v35 = vor.u32 %v913_v24, %v910_v20  ;;  %v948_v3 = vshrl.u32 %v5102_v36, 16 }
  0x9f   : > { %v1111_v44 = vsel %vm1069_vm4, %v1109_v18, %v1110_v32 }
  0xa0   : > { %v950_v24 = vrot.slane %v948_v3, 4 }
  0xa4   : > { %1156 = vrot.lane.b32.xlu1 %v1094_v23, %s4683_s15  ;;  %v5116_v19 = vpop.permute.xlu2 %1128  ;;  %v414_v23 = vld [vmem:[#allocation2 + $0x30] sm:$0x8] }
  0xa5   : > { %1158 = vrot.lane.b32.xlu2 %v1096_v7, %s4683_s15  ;;  %v415_v33 = vsel %vm5085_vm7, 0, %v414_v23  ;;  %v481_v7 = vsel %vm4856_vm3, 0, %v480_v61  ;;  %v564_v23 = vpack.c.bf16 %v532_v15, %v532_v15  ;;  %v495_v61 = vld [vmem:[#allocation2 + $0xec] sm:$0x1]  ;;  %v782_v15 = vpack.c.b16 %v729_v17, %v729_v17 }
  0xa6   : > { %1005 = vrot.lane.b32.xlu0 %v946_v6, %s4682_s1  ;;  %416 = vst [vmem:[#allocation2 + $0x30] sm:$0x8] %v415_v33  ;;  %v951_v6 = vshll.u32 %v5102_v36, 16  ;;  %v565_v33 = vpack.c.bf16 %v533_v16, %v533_v16  ;;  %v496_v3 = vsel %vm4856_vm3, 0, %v495_v61  ;;  %v1112_v16 = vrot.slane %v5102_v36, 5 }
  0xa7   : > { %482 = vst [vmem:[#allocation2 + $0x9c] sm:$0x1] %v481_v7  ;;  %v4335_v7 = vld [vmem:[#allocation2] sm:$0x8]  ;;  %v4339_v61 = vld [vmem:[#allocation2 + $0x10] sm:$0x8] }
  0xa8   : > { %v953_v29 = vrot.slane %v951_v6, 5  ;;  %596 = vst.msk [vmem:[#allocation2 + $0xf4] sm:$0xf] %vm387_vm0, %v564_v23 }
  0xa9   : > { %597 = vst.msk [vmem:[#allocation2 + $0xf8] sm:$0xf] %vm387_vm0, %v565_v33 }
  0xaa   : > { %497 = vst [vmem:[#allocation2 + $0xec] sm:$0x1] %v496_v3 }
  0xac   : > { %1176 = vrot.lane.b32.xlu1 %v1109_v18, %s4683_s15  ;;  %v417_v18 = vld [vmem:[#allocation2 + $0x40] sm:$0x8] }
  0xad   : > { %1178 = vrot.lane.b32.xlu2 %v1111_v44, %s4683_s15  ;;  %v418_v32 = vsel %vm5085_vm7, 0, %v417_v18  ;;  %v954_v44 = vor.u32 %v953_v29, %v950_v24  ;;  %v420_v29 = vld [vmem:[#allocation2 + $0x50] sm:$0x8] }
  0xae   : > { %997 = vrot.lane.b32.xlu0 %v914_v35, %s4682_s1  ;;  %419 = vst [vmem:[#allocation2 + $0x40] sm:$0x8] %v418_v32  ;;  %v640_v35 = vld [vmem:[#allocation2 + $0x9c] sm:$0x1]  ;;  %v421_v32 = vsel %vm5085_vm7, 0, %v420_v29 }
  0xaf   : > { %v5131_v20 = vpop.permute.xlu2 %1130  ;;  %v1042_v6 = vunpack.c.l.b16 %v640_v35  ;;  %v5151_v11 = vld [vmem:[#allocation2 + $0xf0] sm:$0xf0]   ;;  %422 = vst [vmem:[#allocation2 + $0x50] sm:$0x8] %v421_v32 }
  0xb0   : > { %v5149_v35 = vld [vmem:[#allocation2 + $0xf4] sm:$0xff]  }
  0xb1   : > { %v1060_v24 = vpack.c.b16 %v1042_v6, %v1042_v6  ;;  %v660_v6 = vld [vmem:[#allocation2 + $0xec] sm:$0x1]  ;;  %v959_v8 = vshll.u32 %v5149_v35, 16  ;;  %v1115_v4 = vrot.slane %v5149_v35, 5 }
  0xb2   : > { %v1047_v5 = vunpack.c.l.b16 %v660_v6 }
  0xb3   : > { %v1098_v18 = vrot.slane %v1060_v24, 5  ;;  %v4336_v24 = vor.u32 %v4870_v12, %v4335_v7  ;;  %v4340_v7 = vor.u32 %v4892_v38, %v4339_v61 }
  0xb4   : > { %1160 = vrot.lane.b32.xlu1 %v1097_v14, %s4683_s15 }
  0xb6   : > { %1007 = vrot.lane.b32.xlu0 %v954_v44, %s4682_s1  ;;  %v1099_v44 = vsel %vm1069_vm4, %v1097_v14, %v1098_v18  ;;  %v784_v14 = vpack.c.b16 %v732_v42, %v732_v42  ;;  %v1065_v18 = vpack.c.b16 %v1047_v5, %v1047_v5 }
  0xb7   : > { %v5145_v23 = vpop.permute.xlu2 %1134  ;;  %1162 = vrot.lane.b32.xlu2 %v1099_v44, %s4683_s15 }
  0xb8   : > { %v980_v33 = vpop.permute.xlu0 %979  ;;  %v1113_v41 = vrot.slane %v1065_v18, 5 }
  0xb9   : > { %v1201_v17 = vsel %vm1196_vm8, %v782_v15, %v980_v33  ;;  %v956_v15 = vshrl.u32 %v5149_v35, 16  ;;  %v1199_v44 = vsel %vm1196_vm8, %v4336_v24, %v980_v33 }
  0xba   : > { %v1114_v33 = vsel %vm1069_vm4, %v1112_v16, %v1113_v41  ;;  %v534_v41 = vld [vmem:[%s4841_s23 + $0xf0] sm:$0xff] }
  0xbb   : > { %v958_v6 = vrot.slane %v956_v15, 4  ;;  %v566_v18 = vpack.c.bf16 %v534_v41, %v534_v41 }
  0xbc   : > { %1180 = vrot.lane.b32.xlu1 %v1112_v16, %s4683_s15  ;;  %v535_v16 = vld [vmem:[%s4841_s23 + $0xf8] sm:$0xff] }
  0xbd   : > { %598 = vst.msk [vmem:[#allocation2 + $0x104] sm:$0xf] %vm387_vm0, %v566_v18 }
  0xbe   : > { %v1127_v29 = vpop.permute.xlu1 %1126 }
  0xbf   : > { %v1291_v40 = vsel %vm1287_vm9, %v1201_v17, %v1127_v29  ;;  %v5160_v32 = vpop.permute.xlu2 %1138  ;;  %v961_v17 = vrot.slane %v959_v8, 5  ;;  %v435_v29 = vld [vmem:[#allocation2 + $0xa0] sm:$0x8]  ;;  %1182 = vrot.lane.b32.xlu2 %v1114_v33, %s4683_s15 }
  0xc0   : > { %v1368_v10 = vshrl.u32 %v1291_v40, 16  ;;  %v1371_v34 = vshll.u32 %v1291_v40, 16  ;;  %v1125_v12 = vpop.permute.xlu0 %1124  ;;  %v436_v38 = vsel %vm5085_vm7, 0, %v435_v29 }
  0xc1   : > { %v1289_v3 = vsel %vm1287_vm9, %v1199_v44, %v1125_v12  ;;  %v962_v5 = vor.u32 %v961_v17, %v958_v6  ;;  %437 = vst [vmem:[#allocation2 + $0xa0] sm:$0x8] %v436_v38  ;;  %v423_v12 = vld [vmem:[#allocation2 + $0x60] sm:$0x8] }
  0xc2   : > { %v1370_v40 = vrot.slane %v1368_v10, 3  ;;  %v1373_v39 = vrot.slane %v1371_v34, 4  ;;  %v1361_v37 = vshrl.u32 %v1289_v3, 16  ;;  %v1364_v42 = vshll.u32 %v1289_v3, 16 }
  0xc3   : > { %1009 = vrot.lane.b32.xlu0 %v962_v5, %s4682_s1 }
  0xc4   : > { %1184 = vrot.lane.b32.xlu1 %v1115_v4, %s4683_s15  ;;  %v1363_v8 = vrot.slane %v1361_v37, 3  ;;  %v1366_v10 = vrot.slane %v1364_v42, 4  ;;  %v1374_v3 = vor.u32 %v1373_v39, %v1370_v40  ;;  %v567_v37 = vpack.c.bf16 %v535_v16, %v535_v16 }
  0xc6   : > { %v982_v61 = vpop.permute.xlu1 %981  ;;  %v1367_v24 = vor.u32 %v1366_v10, %v1363_v8  ;;  %599 = vst.msk [vmem:[#allocation2 + $0x108] sm:$0xf] %vm387_vm0, %v567_v37 }
  0xc7   : > { %v1204_v34 = vsel %vm1196_vm8, %v4340_v7, %v982_v61  ;;  %v1206_v15 = vsel %vm1196_vm8, %v784_v14, %v982_v61  ;;  %v5183_v44 = vpop.permute.xlu2 %1142  ;;  %v424_v7 = vsel %vm5085_vm7, 0, %v423_v12  ;;  %v498_v14 = vld [vmem:[#allocation2 + $0xfc] sm:$0x1]  ;;  %v438_v61 = vld [vmem:[#allocation2 + $0xb0] sm:$0x8] }
  0xc8   : > { %v1293_v6 = vsel %vm1287_vm9, %v1204_v34, %v5116_v19  ;;  %v1375_v17 = vsel %vm1360_vm10, %v1367_v24, %v1374_v3  ;;  %v984_v29 = vpop.permute.xlu0 %983  ;;  %v1295_v39 = vsel %vm1287_vm9, %v1206_v15, %v5131_v20  ;;  %425 = vst [vmem:[#allocation2 + $0x60] sm:$0x8] %v424_v7  ;;  %v4343_v19 = vld [vmem:[#allocation2 + $0x20] sm:$0x8]  ;;  %v499_v42 = vsel %vm4856_vm3, 0, %v498_v14 }
  0xc9   : > { %4142 = vmatmul.msk.bf16.vlgmr.msra.gmra.mxu0 %vm1655_vm11, %v1375_v17  ;;  %v1376_v40 = vshrl.u32 %v1293_v6, 16  ;;  %v1379_v5 = vshll.u32 %v1293_v6, 16  ;;  %v1383_v33 = vshrl.u32 %v1295_v39, 16  ;;  %v1386_v38 = vshll.u32 %v1295_v39, 16  ;;  %500 = vst [vmem:[#allocation2 + $0xfc] sm:$0x1] %v499_v42 }
  0xca   : > { %v439_v3 = vsel %vm5085_vm7, 0, %v438_v61  ;;  %v786_v24 = vpack.c.b16 %v735_v50, %v735_v50  ;;  %v5206_v12 = vld [vmem:[#allocation2 + $0x100] sm:$0xf0]   ;;  %v4344_v6 = vor.u32 %v4904_v46, %v4343_v19 }
  0xcb   : > { %v1378_v10 = vrot.slane %v1376_v40, 3  ;;  %v1381_v34 = vrot.slane %v1379_v5, 4  ;;  %v1385_v20 = vrot.slane %v1383_v33, 3  ;;  %v1388_v41 = vrot.slane %v1386_v38, 4  ;;  %440 = vst [vmem:[#allocation2 + $0xb0] sm:$0x8] %v439_v3 }
  0xcc   : > { %v1211_v45 = vsel %vm1196_vm8, %v786_v24, %v984_v29  ;;  %v1209_v50 = vsel %vm1196_vm8, %v4344_v6, %v984_v29  ;;  %v4347_v29 = vld [vmem:[#allocation2 + $0x30] sm:$0x8] }
  0xcd   : > { %v5204_v18 = vld [vmem:[#allocation2 + $0x104] sm:$0xff]   ;;  %v1382_v39 = vor.u32 %v1381_v34, %v1378_v10  ;;  %v1389_v14 = vor.u32 %v1388_v41, %v1385_v20  ;;  %v1299_v38 = vsel %vm1287_vm9, %v1211_v45, %v5145_v23  ;;  %v4351_v45 = vld [vmem:[#allocation2 + $0xa0] sm:$0x8] }
  0xce   : > { %v1133_v8 = vpop.permute.xlu1 %1132  ;;  %v777_v17 = vunpack.c.h.b16 %v5204_v18  ;;  %v964_v5 = vshrl.u32 %v5204_v18, 16  ;;  %v967_v33 = vshll.u32 %v5204_v18, 16  ;;  %v1118_v3 = vrot.slane %v5204_v18, 5 }
  0xcf   : > { %v5202_v15 = vpop.permute.xlu2 %1146  ;;  %v1390_v46 = vsel %vm1360_vm10, %v1382_v39, %v1389_v14  ;;  %v1297_v10 = vsel %vm1287_vm9, %v1209_v50, %v1133_v8  ;;  %v1398_v24 = vshrl.u32 %v1299_v38, 16  ;;  %v441_v50 = vld [vmem:[#allocation2 + $0xc0] sm:$0x8] }
  0xd0   : > { %v986_v16 = vpop.permute.xlu0 %985  ;;  %v664_v7 = vld [vmem:[#allocation2 + $0xfc] sm:$0x1]  ;;  %v966_v34 = vrot.slane %v964_v5, 4  ;;  %v969_v20 = vrot.slane %v967_v33, 5  ;;  %v1391_v39 = vshrl.u32 %v1297_v10, 16  ;;  %v1394_v14 = vshll.u32 %v1297_v10, 16  ;;  %1188 = vrot.lane.b32.xlu1 %v1118_v3, %s4683_s15 }
  0xd1   : > { %v1048_v40 = vunpack.c.l.b16 %v664_v7  ;;  %v1401_v7 = vshll.u32 %v1299_v38, 16  ;;  %v426_v10 = vld [vmem:[#allocation2 + $0x70] sm:$0x8] }
  0xd2   : > { %v970_v6 = vor.u32 %v969_v20, %v966_v34  ;;  %v1393_v5 = vrot.slane %v1391_v39, 3  ;;  %v1396_v33 = vrot.slane %v1394_v14, 4  ;;  %v501_v34 = vld [vmem:[#allocation2 + $0x10c] sm:$0x1]  ;;  %v427_v51 = vsel %vm5085_vm7, 0, %v426_v10 }
  0xd3   : > { %v1066_v42 = vpack.c.b16 %v1048_v40, %v1048_v40  ;;  %v1400_v40 = vrot.slane %v1398_v24, 3  ;;  %428 = vst [vmem:[#allocation2 + $0x70] sm:$0x8] %v427_v51  ;;  %v4352_v39 = vor.u32 %v4966_v2, %v4351_v45 }
  0xd4   : > { %1011 = vrot.lane.b32.xlu0 %v970_v6, %s4682_s1 }
  0xd5   : > { %v1116_v61 = vrot.slane %v1066_v42, 5  ;;  %v1403_v42 = vrot.slane %v1401_v7, 4 }
  0xd6   : > { %v1137_v37 = vpop.permute.xlu1 %1136 }
  0xd7   : > { %v1117_v41 = vsel %vm1069_vm4, %v1115_v4, %v1116_v61  ;;  %v1167_v23 = vpop.permute.xlu2 %1166  ;;  %v788_v4 = vpack.c.b16 %v738_v56, %v738_v56  ;;  %v4348_v61 = vor.u32 %v4910_v52, %v4347_v29  ;;  %v502_v56 = vsel %vm4856_vm3, 0, %v501_v34 }
  0xd8   : > { %v5217_v19 = vpop.permute.xlu0 %987  ;;  %1186 = vrot.lane.b32.xlu2 %v1117_v41, %s4683_s15  ;;  %v1404_v20 = vor.u32 %v1403_v42, %v1400_v40  ;;  %v1397_v41 = vor.u32 %v1396_v33, %v1393_v5  ;;  %v802_v52 = vpack.c.b16 %v759_v13, %v759_v13  ;;  %503 = vst [vmem:[#allocation2 + $0x10c] sm:$0x1] %v502_v56  ;;  %v4355_v42 = vld [vmem:[#allocation2 + $0x40] sm:$0x8] }
  0xd9   : > { %4143 = vmatmul.msk.bf16.gmra.mxu0 %vm1655_vm11, %v1390_v46  ;;  %v442_v46 = vsel %vm5085_vm7, 0, %v441_v50  ;;  %v1216_v24 = vsel %vm1196_vm8, %v788_v4, %v986_v16  ;;  %v1214_v7 = vsel %vm1196_vm8, %v4348_v61, %v986_v16 }
  0xda   : > { %443 = vst [vmem:[#allocation2 + $0xc0] sm:$0x8] %v442_v46  ;;  %v1303_v14 = vsel %vm1287_vm9, %v1216_v24, %v5160_v32  ;;  %v1301_v40 = vsel %vm1287_vm9, %v1214_v7, %v1137_v37  ;;  %v1405_v4 = vsel %vm1360_vm10, %v1397_v41, %v1404_v20  ;;  %v790_v20 = vpack.c.b16 %v741_v9, %v741_v9 }
  0xdb   : > { %v1413_v16 = vshrl.u32 %v1303_v14, 16  ;;  %v1416_v33 = vshll.u32 %v1303_v14, 16  ;;  %v1406_v2 = vshrl.u32 %v1301_v40, 16  ;;  %v1409_v32 = vshll.u32 %v1301_v40, 16 }
  0xdd   : > { %v1415_v7 = vrot.slane %v1413_v16, 3  ;;  %v1411_v40 = vrot.slane %v1409_v32, 4 }
  0xde   : > { %v5226_v8 = vpop.permute.xlu1 %1140 }
  0xdf   : > { %v5251_v29 = vpop.permute.xlu2 %1150  ;;  %v668_v37 = vld [vmem:[#allocation2 + $0x10c] sm:$0x1] }
  0xe0   : > { %v5235_v38 = vpop.permute.xlu0 %989  ;;  %v1049_v56 = vunpack.c.l.b16 %v668_v37 }
  0xe6   : > { %v5245_v6 = vpop.permute.xlu1 %1144 }
  0xe7   : > { %v1171_v14 = vpop.permute.xlu2 %1170 }
  0xe8   : > { %v1000_v50 = vpop.permute.xlu0 %999 }
  0xe9   : > { %4144 = vmatmul.msk.bf16.gmra.mxu0 %vm1655_vm11, %v1405_v4  ;;  %v1251_v62 = vsel %vm1196_vm8, %v802_v52, %v1000_v50  ;;  %v1249_v13 = vsel %vm1196_vm8, %v4352_v39, %v1000_v50  ;;  %v1408_v52 = vrot.slane %v1406_v2, 3  ;;  %v4359_v39 = vld [vmem:[#allocation2 + $0xb0] sm:$0x8]  ;;  %v1067_v4 = vpack.c.b16 %v1049_v56, %v1049_v56 }
  0xea   : > { %v1331_v5 = vsel %vm1287_vm9, %v1251_v62, %v1167_v23  ;;  %v1418_v23 = vrot.slane %v1416_v33, 4  ;;  %v1221_v2 = vsel %vm1196_vm8, %v790_v20, %v5217_v19 }
  0xeb   : > { %v1518_v45 = vshrl.u32 %v1331_v5, 16  ;;  %v1521_v46 = vshll.u32 %v1331_v5, 16  ;;  %v1412_v33 = vor.u32 %v1411_v40, %v1408_v52  ;;  %v1307_v37 = vsel %vm1287_vm9, %v1221_v2, %v5183_v44  ;;  %v4367_v2 = vld [vmem:[#allocation2 + $0xc0] sm:$0x8] }
  0xec   : > { %v1419_v16 = vor.u32 %v1418_v23, %v1415_v7  ;;  %v1428_v44 = vshrl.u32 %v1307_v37, 16  ;;  %v1431_v7 = vshll.u32 %v1307_v37, 16 }
  0xed   : > { %v1520_v10 = vrot.slane %v1518_v45, 3  ;;  %v1523_v34 = vrot.slane %v1521_v46, 4  ;;  %v1119_v46 = vrot.slane %v1067_v4, 5 }
  0xee   : > { %v1165_v61 = vpop.permute.xlu1 %1164  ;;  %v1420_v56 = vsel %vm1360_vm10, %v1412_v33, %v1419_v16  ;;  %v6876_v33 = vunpack.c.h.b16 %v4939_v26 }
  0xef   : > { %v1329_v51 = vsel %vm1287_vm9, %v1249_v13, %v1165_v61  ;;  %v1524_v50 = vor.u32 %v1523_v34, %v1520_v10  ;;  %v4356_v13 = vor.u32 %v4925_v0, %v4355_v42  ;;  %v1120_v9 = vsel %vm1069_vm4, %v1118_v3, %v1119_v46  ;;  %v429_v10 = vld [vmem:[#allocation2 + $0x80] sm:$0x8]  ;;  %v444_v34 = vld [vmem:[#allocation2 + $0xd0] sm:$0x8] }
  0xf0   : > { %v1511_v41 = vshrl.u32 %v1329_v51, 16  ;;  %v1514_v24 = vshll.u32 %v1329_v51, 16  ;;  %v5266_v45 = vpop.permute.xlu0 %991  ;;  %1190 = vrot.lane.b32.xlu2 %v1120_v9, %s4683_s15  ;;  %v804_v3 = vpack.c.b16 %v762_v59, %v762_v59  ;;  %v4360_v42 = vor.u32 %v5000_v57, %v4359_v39  ;;  %v5296_v59 = vpop.permute.xlu2 %1154 }
  0xf1   : > { %v1219_v0 = vsel %vm1196_vm8, %v4356_v13, %v5217_v19  ;;  %v430_v19 = vsel %vm5085_vm7, 0, %v429_v10  ;;  %v445_v55 = vsel %vm5085_vm7, 0, %v444_v34  ;;  %v1433_v9 = vrot.slane %v1431_v7, 4 }
  0xf2   : > { %v1513_v62 = vrot.slane %v1511_v41, 3  ;;  %v1516_v5 = vrot.slane %v1514_v24, 4  ;;  %v1305_v51 = vsel %vm1287_vm9, %v1219_v0, %v5226_v8  ;;  %431 = vst [vmem:[#allocation2 + $0x80] sm:$0x8] %v430_v19  ;;  %v4363_v41 = vld [vmem:[#allocation2 + $0x50] sm:$0x8] }
  0xf3   : > { %446 = vst [vmem:[#allocation2 + $0xd0] sm:$0x8] %v445_v55  ;;  %v1421_v23 = vshrl.u32 %v1305_v51, 16  ;;  %v1424_v4 = vshll.u32 %v1305_v51, 16  ;;  %v4364_v10 = vor.u32 %v4941_v27, %v4363_v41 }
  0xf4   : > { %v1517_v63 = vor.u32 %v1516_v5, %v1513_v62 }
  0xf5   : > { %v1423_v16 = vrot.slane %v1421_v23, 3 }
  0xf6   : > { %v5274_v61 = vpop.permute.xlu1 %1148  ;;  %v1525_v32 = vsel %vm1360_vm10, %v1517_v63, %v1524_v50  ;;  %v1430_v63 = vrot.slane %v1428_v44, 3  ;;  %v6877_v44 = vunpack.c.h.b16 %v5032_v58 }
  0xf7   : > { %4152 = vmatmul.msk.bf16.vlgmr.msra.gmra.mxu3 %vm1655_vm11, %v1525_v32  ;;  %v1426_v32 = vrot.slane %v1424_v4, 4  ;;  %v4371_v4 = vld [vmem:[#allocation2 + $0x60] sm:$0x8] }
  0xf8   : > { %v1002_v20 = vpop.permute.xlu0 %1001  ;;  %v806_v27 = vpack.c.b16 %v6877_v44, %v6877_v44  ;;  %v4372_v44 = vor.u32 %v4984_v31, %v4371_v4 }
  0xf9   : > { %4145 = vmatmul.msk.bf16.gmra.mxu0 %vm1655_vm11, %v1420_v56  ;;  %v1256_v57 = vsel %vm1196_vm8, %v804_v3, %v1002_v20  ;;  %v1254_v8 = vsel %vm1196_vm8, %v4360_v42, %v1002_v20  ;;  %v1175_v56 = vpop.permute.xlu2 %1174  ;;  %v1434_v20 = vor.u32 %v1433_v9, %v1430_v63  ;;  %v1427_v19 = vor.u32 %v1426_v32, %v1423_v16 }
  0xfa   : > { %v1335_v24 = vsel %vm1287_vm9, %v1256_v57, %v1171_v14  ;;  %v792_v14 = vpack.c.b16 %v6876_v33, %v6876_v33  ;;  %v1224_v57 = vsel %vm1196_vm8, %v4364_v10, %v5235_v38 }
  0xfb   : > { %v1533_v52 = vshrl.u32 %v1335_v24, 16  ;;  %v1536_v39 = vshll.u32 %v1335_v24, 16  ;;  %v1309_v24 = vsel %vm1287_vm9, %v1224_v57, %v5245_v6  ;;  %v1435_v7 = vsel %vm1360_vm10, %v1427_v19, %v1434_v20 }
  0xfc   : > { %v1226_v51 = vsel %vm1196_vm8, %v792_v14, %v5235_v38  ;;  %v1439_v6 = vshll.u32 %v1309_v24, 16 }
  0xfd   : > { %v1535_v50 = vrot.slane %v1533_v52, 3  ;;  %v1538_v62 = vrot.slane %v1536_v39, 4  ;;  %v1311_v41 = vsel %vm1287_vm9, %v1226_v51, %v5202_v15  ;;  %v432_v39 = vld [vmem:[#allocation2 + $0x90] sm:$0x8]  ;;  %v447_v51 = vld [vmem:[#allocation2 + $0xe0] sm:$0x8] }
  0xfe   : > { %v1169_v40 = vpop.permute.xlu1 %1168  ;;  %v1443_v52 = vshrl.u32 %v1311_v41, 16  ;;  %v1446_v58 = vshll.u32 %v1311_v41, 16  ;;  %v448_v57 = vsel %vm5085_vm7, 0, %v447_v51 }
  0xff   : > { %v1333_v5 = vsel %vm1287_vm9, %v1254_v8, %v1169_v40  ;;  %v1539_v0 = vor.u32 %v1538_v62, %v1535_v50  ;;  %v4368_v8 = vor.u32 %v5034_v60, %v4367_v2  ;;  %v433_v60 = vsel %vm5085_vm7, 0, %v432_v39  ;;  %449 = vst [vmem:[#allocation2 + $0xe0] sm:$0x8] %v448_v57 }
 0x100   : > { %v1526_v13 = vshrl.u32 %v1333_v5, 16  ;;  %v1529_v46 = vshll.u32 %v1333_v5, 16  ;;  %v5304_v37 = vpop.permute.xlu0 %993  ;;  %v1436_v50 = vshrl.u32 %v1309_v24, 16  ;;  %434 = vst [vmem:[#allocation2 + $0x90] sm:$0x8] %v433_v60  ;;  %v1445_v33 = vrot.slane %v1443_v52, 3 }
 0x101   : > { %v1448_v14 = vrot.slane %v1446_v58, 4  ;;  %v6879_v52 = vunpack.c.h.b16 %v5059_v49  ;;  %v4379_v49 = vld [vmem:[#allocation2 + $0x70] sm:$0x8] }
 0x102   : > { %v1528_v3 = vrot.slane %v1526_v13, 3  ;;  %v1531_v42 = vrot.slane %v1529_v46, 4  ;;  %v5330_v13 = vpop.permute.xlu2 %1158 }
 0x103   : > { %v1449_v41 = vor.u32 %v1448_v14, %v1445_v33  ;;  %v808_v31 = vpack.c.b16 %v6879_v52, %v6879_v52  ;;  %v6881_v52 = vunpack.c.h.b16 %v5102_v36 }
 0x104   : > { %v1532_v34 = vor.u32 %v1531_v42, %v1528_v3  ;;  %v1441_v3 = vrot.slane %v1439_v6, 4  ;;  %v6878_v42 = vunpack.c.h.b16 %v4982_v30 }
 0x106   : > { %v5309_v55 = vpop.permute.xlu1 %1152  ;;  %v1540_v26 = vsel %vm1360_vm10, %v1532_v34, %v1539_v0  ;;  %v1438_v0 = vrot.slane %v1436_v50, 3  ;;  %v794_v10 = vpack.c.b16 %v6878_v42, %v6878_v42  ;;  %v4375_v34 = vld [vmem:[#allocation2 + $0xd0] sm:$0x8]  ;;  %v6880_v42 = vunpack.c.h.b16 %v5014_v21 }
 0x107   : > { %4153 = vmatmul.msk.bf16.gmra.mxu3 %vm1655_vm11, %v1540_v26  ;;  %v4376_v39 = vor.u32 %v5061_v53, %v4375_v34  ;;  %v4383_v34 = vld [vmem:[#allocation2 + $0xe0] sm:$0x8] }
 0x108   : > { %v1004_v23 = vpop.permute.xlu0 %1003  ;;  %v1231_v30 = vsel %vm1196_vm8, %v794_v10, %v5266_v45  ;;  %v796_v10 = vpack.c.b16 %v6880_v42, %v6880_v42 }
 0x109   : > { %4146 = vmatmul.msk.bf16.gmra.mxu0 %vm1655_vm11, %v1435_v7  ;;  %v1261_v38 = vsel %vm1196_vm8, %v806_v27, %v1004_v23  ;;  %v1259_v40 = vsel %vm1196_vm8, %v4368_v8, %v1004_v23  ;;  %v1442_v8 = vor.u32 %v1441_v3, %v1438_v0  ;;  %v1229_v23 = vsel %vm1196_vm8, %v4372_v44, %v5266_v45 }
 0x10a   : > { %v1339_v15 = vsel %vm1287_vm9, %v1261_v38, %v1175_v56  ;;  %v1179_v38 = vpop.permute.xlu2 %1178  ;;  %v1315_v58 = vsel %vm1287_vm9, %v1231_v30, %v5251_v29  ;;  %v1313_v4 = vsel %vm1287_vm9, %v1229_v23, %v5274_v61  ;;  %v4380_v44 = vor.u32 %v5016_v22, %v4379_v49 }
 0x10b   : > { %v1548_v62 = vshrl.u32 %v1339_v15, 16  ;;  %v1551_v5 = vshll.u32 %v1339_v15, 16  ;;  %v1458_v60 = vshrl.u32 %v1315_v58, 16  ;;  %v1461_v53 = vshll.u32 %v1315_v58, 16 }
 0x10c   : > { %v1236_v30 = vsel %vm1196_vm8, %v796_v10, %v5304_v37  ;;  %v1234_v23 = vsel %vm1196_vm8, %v4380_v44, %v5304_v37  ;;  %v4384_v22 = vor.u32 %v5104_v43, %v4383_v34 }
 0x10d   : > { %v1550_v63 = vrot.slane %v1548_v62, 3  ;;  %v1553_v9 = vrot.slane %v1551_v5, 4  ;;  %v1451_v62 = vshrl.u32 %v1313_v4, 16  ;;  %v1463_v0 = vrot.slane %v1461_v53, 4 }
 0x10e   : > { %v1173_v46 = vpop.permute.xlu1 %1172 }
 0x10f   : > { %v1337_v16 = vsel %vm1287_vm9, %v1259_v40, %v1173_v46  ;;  %v1554_v56 = vor.u32 %v1553_v9, %v1550_v63  ;;  %v1450_v40 = vsel %vm1360_vm10, %v1442_v8, %v1449_v41  ;;  %v1454_v46 = vshll.u32 %v1313_v4, 16  ;;  %v450_v4 = vld [vmem:[#allocation2 + $0xf0] sm:$0x8] }
 0x110   : > { %v1541_v2 = vshrl.u32 %v1337_v16, 16  ;;  %v1544_v32 = vshll.u32 %v1337_v16, 16  ;;  %v5336_v26 = vpop.permute.xlu0 %995  ;;  %v1453_v3 = vrot.slane %v1451_v62, 3 }
 0x111   : > { %v1456_v51 = vrot.slane %v1454_v46, 4 }
 0x112   : > { %v1543_v20 = vrot.slane %v1541_v2, 3  ;;  %v1546_v19 = vrot.slane %v1544_v32, 4  ;;  %v5363_v33 = vpop.permute.xlu2 %1162  ;;  %v1460_v32 = vrot.slane %v1458_v60, 3 }
 0x113   : > { %v1457_v8 = vor.u32 %v1456_v51, %v1453_v3 }
 0x114   : > { %v1547_v27 = vor.u32 %v1546_v19, %v1543_v20  ;;  %v1464_v41 = vor.u32 %v1463_v0, %v1460_v32 }
 0x116   : > { %v1555_v24 = vsel %vm1360_vm10, %v1547_v27, %v1554_v56  ;;  %v5344_v7 = vpop.permute.xlu1 %1156 }
 0x117   : > { %4154 = vmatmul.msk.bf16.gmra.mxu3 %vm1655_vm11, %v1555_v24 }
 0x118   : > { %v1006_v15 = vpop.permute.xlu0 %1005 }
 0x119   : > { %4147 = vmatmul.msk.bf16.gmra.mxu0 %vm1655_vm11, %v1450_v40  ;;  %v1266_v45 = vsel %vm1196_vm8, %v808_v31, %v1006_v15  ;;  %v1264_v50 = vsel %vm1196_vm8, %v4376_v39, %v1006_v15  ;;  %v810_v31 = vpack.c.b16 %v6881_v52, %v6881_v52  ;;  %v4387_v39 = vld [vmem:[#allocation2 + $0x80] sm:$0x8]  ;;  %v1317_v40 = vsel %vm1287_vm9, %v1234_v23, %v5309_v55  ;;  %v4395_v52 = vld [vmem:[#allocation2 + $0x90] sm:$0x8] }
 0x11a   : > { %v1343_v6 = vsel %vm1287_vm9, %v1266_v45, %v1179_v38  ;;  %v1319_v38 = vsel %vm1287_vm9, %v1236_v30, %v5296_v59  ;;  %v1183_v58 = vpop.permute.xlu2 %1182  ;;  %v1465_v15 = vsel %vm1360_vm10, %v1457_v8, %v1464_v41  ;;  %v451_v45 = vsel %vm5085_vm7, 0, %v450_v4 }
 0x11b   : > { %v1563_v5 = vshrl.u32 %v1343_v6, 16  ;;  %v1566_v29 = vshll.u32 %v1343_v6, 16  ;;  %452 = vst [vmem:[#allocation2 + $0xf0] sm:$0x8] %v451_v45  ;;  %v1473_v43 = vshrl.u32 %v1319_v38, 16  ;;  %v1476_v49 = vshll.u32 %v1319_v38, 16 }
 0x11c   : > { %v1469_v53 = vshll.u32 %v1317_v40, 16  ;;  %v4388_v0 = vor.u32 %v5050_v28, %v4387_v39 }
 0x11d   : > { %v1565_v61 = vrot.slane %v1563_v5, 3  ;;  %v1568_v9 = vrot.slane %v1566_v29, 4 }
 0x11e   : > { %v1177_v63 = vpop.permute.xlu1 %1176  ;;  %v1471_v3 = vrot.slane %v1469_v53, 4  ;;  %v1239_v41 = vsel %vm1196_vm8, %v4388_v0, %v5336_v26 }
 0x11f   : > { %v1341_v16 = vsel %vm1287_vm9, %v1264_v50, %v1177_v63  ;;  %v1569_v56 = vor.u32 %v1568_v9, %v1565_v61  ;;  %v1466_v50 = vshrl.u32 %v1317_v40, 16  ;;  %v6882_v63 = vunpack.c.h.b16 %v5048_v25 }
 0x120   : > { %v1556_v14 = vshrl.u32 %v1341_v16, 16  ;;  %v1559_v2 = vshll.u32 %v1341_v16, 16  ;;  %v5368_v57 = vpop.permute.xlu0 %997  ;;  %v6883_v25 = vunpack.c.h.b16 %v5149_v35  ;;  %v1321_v35 = vsel %vm1287_vm9, %v1239_v41, %v5344_v7 }
 0x121   : > { %v798_v61 = vpack.c.b16 %v6882_v63, %v6882_v63  ;;  %v1468_v32 = vrot.slane %v1466_v50, 3  ;;  %v1481_v7 = vshrl.u32 %v1321_v35, 16  ;;  %v5425_v63 = vld [vmem:[#allocation2 + $0x110] sm:$0xf0]  }
 0x122   : > { %v1558_v20 = vrot.slane %v1556_v14, 3  ;;  %v1561_v19 = vrot.slane %v1559_v2, 4  ;;  %v1475_v14 = vrot.slane %v1473_v43, 3  ;;  %v1478_v2 = vrot.slane %v1476_v49, 4  ;;  %v4391_v51 = vld [vmem:[#allocation2 + $0xf0] sm:$0x8] }
 0x123   : > { %v812_v44 = vpack.c.b16 %v6883_v25, %v6883_v25  ;;  %v1241_v28 = vsel %vm1196_vm8, %v798_v61, %v5336_v26  ;;  %v6884_v49 = vunpack.c.h.b16 %v5081_v47  ;;  %v453_v61 = vld [vmem:[#allocation2 + $0x100] sm:$0x8] }
 0x124   : > { %v1562_v27 = vor.u32 %v1561_v19, %v1558_v20  ;;  %v1479_v20 = vor.u32 %v1478_v2, %v1475_v14  ;;  %v4392_v19 = vor.u32 %v5151_v11, %v4391_v51  ;;  %v1323_v11 = vsel %vm1287_vm9, %v1241_v28, %v5330_v13  ;;  %v5451_v28 = vld [vmem:[#allocation2 + $0x4] sm:$0xff]  }
 0x125   : > { %v800_v50 = vpack.c.b16 %v6884_v49, %v6884_v49  ;;  %v454_v47 = vsel %vm5085_vm7, 0, %v453_v61 }
 0x126   : > { %v1570_v24 = vsel %vm1360_vm10, %v1562_v27, %v1569_v56  ;;  %v5374_v21 = vpop.permute.xlu1 %1160  ;;  %v1472_v27 = vor.u32 %v1471_v3, %v1468_v32  ;;  %455 = vst [vmem:[#allocation2 + $0x100] sm:$0x8] %v454_v47 }
 0x127   : > { %4155 = vmatmul.msk.bf16.gmra.mxu3 %vm1655_vm11, %v1570_v24  ;;  %v1246_v32 = vsel %vm1196_vm8, %v800_v50, %v5368_v57 }
 0x128   : > { %v1008_v37 = vpop.permute.xlu0 %1007  ;;  %v1480_v26 = vsel %vm1360_vm10, %v1472_v27, %v1479_v20  ;;  %v1327_v54 = vsel %vm1287_vm9, %v1246_v32, %v5363_v33  ;;  %v401_v33 = vld [vmem:[#allocation2 + $0x11c] sm:$0x1] }
 0x129   : > { %4148 = vmatmul.msk.bf16.gmra.mxu0 %vm1655_vm11, %v1465_v15  ;;  %v1271_v36 = vsel %vm1196_vm8, %v810_v31, %v1008_v37  ;;  %v1269_v59 = vsel %vm1196_vm8, %v4384_v22, %v1008_v37  ;;  %v1488_v15 = vshrl.u32 %v1323_v11, 16  ;;  %v1491_v37 = vshll.u32 %v1323_v11, 16 }
 0x12a   : > { %v1347_v60 = vsel %vm1287_vm9, %v1271_v36, %v1183_v58  ;;  %v1506_v27 = vshll.u32 %v1327_v54, 16 }
 0x12b   : > { %v1578_v6 = vshrl.u32 %v1347_v60, 16  ;;  %v1581_v55 = vshll.u32 %v1347_v60, 16  ;;  %v1484_v60 = vshll.u32 %v1321_v35, 16  ;;  %v1490_v53 = vrot.slane %v1488_v15, 3 }
 0x12d   : > { %v1580_v5 = vrot.slane %v1578_v6, 3  ;;  %v1583_v29 = vrot.slane %v1581_v55, 4  ;;  %v4399_v25 = vld [vmem:[#allocation2 + $0x100] sm:$0x8] }
 0x12e   : > { %v1181_v62 = vpop.permute.xlu1 %1180  ;;  %v4400_v35 = vor.u32 %v5206_v12, %v4399_v25 }
 0x12f   : > { %v1345_v46 = vsel %vm1287_vm9, %v1269_v59, %v1181_v62  ;;  %v1584_v42 = vor.u32 %v1583_v29, %v1580_v5  ;;  %v1493_v62 = vrot.slane %v1491_v37, 4  ;;  %v1483_v5 = vrot.slane %v1481_v7, 3 }
 0x130   : > { %v1571_v9 = vshrl.u32 %v1345_v46, 16  ;;  %v1574_v16 = vshll.u32 %v1345_v46, 16  ;;  %v4396_v29 = vor.u32 %v5083_v48, %v4395_v52  ;;  %v5423_v46 = vld [vmem:[#allocation2 + $0x114] sm:$0xff]   ;;  %v814_v52 = vpack.c.b16 %v777_v17, %v777_v17 }
 0x131   : > { %v1494_v2 = vor.u32 %v1493_v62, %v1490_v53  ;;  %v972_v3 = vshrl.u32 %v5423_v46, 16 }
 0x132   : > { %v1573_v10 = vrot.slane %v1571_v9, 3  ;;  %v1576_v34 = vrot.slane %v1574_v16, 4  ;;  %v1187_v30 = vpop.permute.xlu2 %1186  ;;  %v1486_v9 = vrot.slane %v1484_v60, 4  ;;  %v780_v16 = vunpack.c.h.b16 %v5423_v46 }
 0x133   : > { %v1244_v48 = vsel %vm1196_vm8, %v4396_v29, %v5368_v57  ;;  %v974_v51 = vrot.slane %v972_v3, 4  ;;  %v2469_v3 = vshll.u32 %v5451_v28, 16 }
 0x134   : > { %v1577_v56 = vor.u32 %v1576_v34, %v1573_v10  ;;  %v1487_v0 = vor.u32 %v1486_v9, %v1483_v5  ;;  %v1121_v34 = vrot.slane %v5423_v46, 5  ;;  %v1325_v20 = vsel %vm1287_vm9, %v1244_v48, %v5374_v21  ;;  %v2234_v21 = vld [vmem:[#allocation2 + $0xc] sm:$0x1] }
 0x135   : > { %v1010_v23 = vpop.permute.xlu0 %1009  ;;  %v1496_v41 = vshrl.u32 %v1325_v20, 16  ;;  %v2663_v11 = vunpack.c.l.b16 %v2234_v21  ;;  %v2466_v48 = vshrl.u32 %v5451_v28, 16 }
 0x136   : > { %v1585_v8 = vsel %vm1360_vm10, %v1577_v56, %v1584_v42  ;;  %v1185_v24 = vpop.permute.xlu1 %1184  ;;  %v1274_v31 = vsel %vm1196_vm8, %v4392_v19, %v1010_v23  ;;  %v1276_v22 = vsel %vm1196_vm8, %v812_v44, %v1010_v23  ;;  %v975_v42 = vshll.u32 %v5423_v46, 16  ;;  %1192 = vrot.lane.b32.xlu1 %v1121_v34, %s4683_s15  ;;  %v4205_v46 = vld [vmem:[#allocation8 + $0x10] sm:$0xff] }
 0x137   : > { %4156 = vmatmul.msk.bf16.gmra.mxu3 %vm1655_vm11, %v1585_v8  ;;  %v1351_v38 = vsel %vm1287_vm9, %v1276_v22, %v1187_v30  ;;  %v1349_v39 = vsel %vm1287_vm9, %v1274_v31, %v1185_v24  ;;  %v1495_v57 = vsel %vm1360_vm10, %v1487_v0, %v1494_v2  ;;  %v1503_v44 = vshrl.u32 %v1327_v54, 16  ;;  %v5453_v8 = vld [vmem:[#allocation2] sm:$0xf0]   ;;  %3340 = vmatpush.bf16.msra.mxu1 %v4205_v46 }
 0x138   : > { %v1593_v58 = vshrl.u32 %v1351_v38, 16  ;;  %v1596_v4 = vshll.u32 %v1351_v38, 16  ;;  %v1586_v40 = vshrl.u32 %v1349_v39, 16  ;;  %v1589_v13 = vshll.u32 %v1349_v39, 16  ;;  %4210 = vmatpush.bf16.msra.mxu2 %v4205_v46 }
 0x139   : > { %4149 = vmatmul.msk.bf16.gmra.mxu0 %vm1655_vm11, %v1480_v26  ;;  %v977_v56 = vrot.slane %v975_v42, 5  ;;  %v402_v30 = vsel %vm4856_vm3, 0, %v401_v33  ;;  %v1499_v24 = vshll.u32 %v1325_v20, 16  ;;  %v2359_v23 = vunpack.c.h.b16 %v5451_v28 }
 0x13a   : > { %v1595_v45 = vrot.slane %v1593_v58, 3  ;;  %v1598_v36 = vrot.slane %v1596_v4, 4  ;;  %v1588_v43 = vrot.slane %v1586_v40, 3  ;;  %v1591_v59 = vrot.slane %v1589_v13, 4  ;;  %403 = vst [vmem:[#allocation2 + $0x11c] sm:$0x1] %v402_v30 }
 0x13b   : > { %v978_v19 = vor.u32 %v977_v56, %v974_v51  ;;  %v2681_v31 = vpack.c.b16 %v2663_v11, %v2663_v11  ;;  %v1505_v22 = vrot.slane %v1503_v44, 3  ;;  %v1508_v26 = vrot.slane %v1506_v27, 4 }
 0x13c   : > { %v1599_v6 = vor.u32 %v1598_v36, %v1595_v45  ;;  %v1592_v55 = vor.u32 %v1591_v59, %v1588_v43  ;;  %v1498_v58 = vrot.slane %v1496_v41, 3  ;;  %v1501_v1 = vrot.slane %v1499_v24, 4 }
 0x13d   : > { %1013 = vrot.lane.b32.xlu0 %v978_v19, %s4682_s1  ;;  %v2699_v13 = vrot.slane %v5451_v28, 5  ;;  %v2700_v15 = vrot.slane %v2681_v31, 5  ;;  %v1509_v49 = vor.u32 %v1508_v26, %v1505_v22  ;;  %v2468_v54 = vrot.slane %v2466_v48, 4  ;;  %v4203_v48 = vld [vmem:[#allocation8] sm:$0xff] }
 0x13e   : > { %v1600_v14 = vsel %vm1360_vm10, %v1592_v55, %v1599_v6  ;;  %v1502_v50 = vor.u32 %v1501_v1, %v1498_v58  ;;  %v2471_v51 = vrot.slane %v2469_v3, 5  ;;  %v4407_v58 = vld [vmem:[#allocation2] sm:$0x8] }
 0x13f   : > { %v2701_v7 = vsel %vm1069_vm4, %v2699_v13, %v2700_v15 }
 0x140   : > { %2755 = vrot.lane.b32.xlu1 %v2701_v7, %s4683_s15  ;;  %v1510_v2 = vsel %vm1360_vm10, %v1502_v50, %v1509_v49  ;;  %v2472_v56 = vor.u32 %v2471_v51, %v2468_v54 }
 0x141   : > { %v672_v60 = vld [vmem:[#allocation2 + $0x11c] sm:$0x1] }
 0x142   : > { %v1189_v40 = vpop.permute.xlu1 %1188  ;;  %v1050_v6 = vunpack.c.l.b16 %v672_v60 }
 0x144   : > { %v1068_v29 = vpack.c.b16 %v1050_v6, %v1050_v6 }
 0x145   : > { %2753 = vrot.lane.b32.xlu0 %v2699_v13, %s4683_s15 }
 0x146   : > { %v5440_v10 = vpop.f32.mrf.mxu0  ;;  %v1012_v4 = vpop.permute.xlu0 %1011 }
 0x147   : > { %4157 = vmatmul.msk.bf16.gmra.mxu3 %vm1655_vm11, %v1600_v14  ;;  %v1279_v37 = vsel %vm1196_vm8, %v4400_v35, %v1012_v4  ;;  %v1281_v12 = vsel %vm1196_vm8, %v814_v52, %v1012_v4  ;;  %v1122_v14 = vrot.slane %v1068_v29, 5  ;;  %v816_v4 = vpack.c.b16 %v780_v16, %v780_v16 }
 0x148   : > { %v1353_v17 = vsel %vm1287_vm9, %v1279_v37, %v1189_v40 }
 0x149   : > { %4150 = vmatmul.msk.bf16.gmra.mxu0 %vm1655_vm11, %v1495_v57  ;;  %v1601_v43 = vshrl.u32 %v1353_v17, 16  ;;  %v1604_v59 = vshll.u32 %v1353_v17, 16  ;;  %v1123_v0 = vsel %vm1069_vm4, %v1121_v34, %v1122_v14 }
 0x14a   : > { %v1191_v39 = vpop.permute.xlu2 %1190  ;;  %1194 = vrot.lane.b32.xlu2 %v1123_v0, %s4683_s15 }
 0x14b   : > { %v1355_v18 = vsel %vm1287_vm9, %v1281_v12, %v1191_v39  ;;  %v1603_v62 = vrot.slane %v1601_v43, 3  ;;  %v1606_v5 = vrot.slane %v1604_v59, 4  ;;  %v4403_v39 = vld [vmem:[#allocation2 + $0x110] sm:$0x8]  ;;  %v2412_v12 = vpack.c.b16 %v2359_v23, %v2359_v23 }
 0x14c   : > { %v1608_v45 = vshrl.u32 %v1355_v18, 16  ;;  %v1611_v36 = vshll.u32 %v1355_v18, 16  ;;  %v4404_v40 = vor.u32 %v5425_v63, %v4403_v39  ;;  %v4408_v18 = vor.u32 %v5453_v8, %v4407_v58 }
 0x14d   : > { %v1607_v47 = vor.u32 %v1606_v5, %v1603_v62 }
 0x14e   : > { %v5462_v38 = vpop.f32.mrf.mxu0  ;;  %v1610_v55 = vrot.slane %v1608_v45, 3  ;;  %v1613_v53 = vrot.slane %v1611_v36, 4 }
 0x150   : > { %v1614_v9 = vor.u32 %v1613_v53, %v1610_v55  ;;  %v4204_v53 = vld [vmem:[#allocation8 + $0x8] sm:$0xff] }
 0x151   : > { %3341 = vmatpush.bf16.msra.mxu1 %v4204_v53  ;;  %4211 = vmatpush.bf16.msra.mxu2 %v4204_v53 }
 0x152   : > { %v1615_v32 = vsel %vm1360_vm10, %v1607_v47, %v1614_v9  ;;  %2609 = vrot.lane.b32.xlu2 %v2472_v56, %s4682_s1 }
 0x155   : > { %3342 = vmatpush.bf16.msra.mxu1 %v4203_v48  ;;  %4212 = vmatpush.bf16.msra.mxu2 %v4203_v48 }
 0x156   : > { %v5472_v61 = vpop.f32.mrf.mxu0 }
 0x157   : > { %4158 = vmatmul.msk.bf16.gmra.mxu3 %vm1655_vm11, %v1615_v32 }
 0x159   : > { %4151 = vmatmul.msk.bf16.gmra.mxu0 %vm1655_vm11, %v1510_v2 }
 0x15e   : > { %v5484_v42 = vpop.f32.mrf.mxu0 }
 0x166   : > { %v5487_v20 = vpop.f32.mrf.mxu0 }
 0x16e   : > { %v5489_v57 = vpop.f32.mrf.mxu0 }
 0x176   : > { %v5491_v19 = vpop.f32.mrf.mxu0 }
 0x17a   : > { %v5493_v34 = vpop.f32.mrf.mxu3 }
 0x17b   : > { %1877 = vrot.lane.b32.xlu0 %v5493_v34, %s4684_s20 }
 0x17e   : > { %v5497_v25 = vpop.f32.mrf.mxu0 }
 0x182   : > { %v5499_v44 = vpop.f32.mrf.mxu3 }
 0x183   : > { %1879 = vrot.lane.b32.xlu1 %v5499_v44, %s4684_s20  ;;  %1841 = vrot.lane.b32.xlu0 %v5472_v61, %s4684_s20 }
 0x186   : > { %v5505_v33 = vpop.f32.mrf.mxu0 }
 0x18a   : > { %v5507_v27 = vpop.f32.mrf.mxu3 }
 0x18b   : > { %2007 = vrot.lane.b32.xlu2 %v5507_v27, %s4685_s29  ;;  %1843 = vrot.lane.b32.xlu1 %v5484_v42, %s4684_s20 }
 0x18e   : > { %v5513_v41 = vpop.f32.mrf.mxu0 }
 0x192   : > { %v5515_v21 = vpop.f32.mrf.mxu3 }
 0x193   : > { %1881 = vrot.lane.b32.xlu2 %v5507_v27, %s4684_s20  ;;  %2009 = vrot.lane.b32.xlu0 %v5515_v21, %s4685_s29 }
 0x194   : > { %1845 = vrot.lane.b32.xlu1 %v5487_v20, %s4684_s20 }
 0x196   : > { %v5529_v24 = vpop.f32.mrf.mxu0 }
 0x19a   : > { %v5523_v30 = vpop.f32.mrf.mxu3 }
 0x19b   : > { %1883 = vrot.lane.b32.xlu0 %v5515_v21, %s4684_s20  ;;  %1971 = vrot.lane.b32.xlu2 %v5487_v20, %s4685_s29 }
 0x19c   : > { %2011 = vrot.lane.b32.xlu1 %v5523_v30, %s4685_s29 }
 0x19e   : > { %v5539_v11 = vpop.f32.mrf.mxu0 }
 0x1a2   : > { %v5549_v52 = vpop.f32.mrf.mxu3 }
 0x1a3   : > { %1847 = vrot.lane.b32.xlu2 %v5489_v57, %s4684_s20  ;;  %1973 = vrot.lane.b32.xlu0 %v5489_v57, %s4685_s29 }
 0x1a4   : > { %1885 = vrot.lane.b32.xlu1 %v5523_v30, %s4684_s20  ;;  %v1195_v22 = vpop.permute.xlu2 %1194 }
 0x1a6   : > { %v5547_v35 = vpop.f32.mrf.mxu0 }
 0x1a8   : > { %v1193_v1 = vpop.permute.xlu1 %1192 }
 0x1aa   : > { %v5557_v31 = vpop.f32.mrf.mxu3 }
 0x1ab   : > { %1849 = vrot.lane.b32.xlu2 %v5491_v19, %s4684_s20  ;;  %1975 = vrot.lane.b32.xlu0 %v5491_v19, %s4685_s29 }
 0x1ac   : > { %1977 = vrot.lane.b32.xlu1 %v5497_v25, %s4685_s29  ;;  %v2610_v28 = vpop.permute.xlu2 %2609 }
 0x1ad   : > { %v2827_v49 = vsel %vm1196_vm8, %v4408_v18, %v2610_v28  ;;  %v2829_v50 = vsel %vm1196_vm8, %v2412_v12, %v2610_v28 }
 0x1ae   : > { %v5559_v26 = vpop.f32.mrf.mxu0 }
 0x1af   : > { %v1014_v13 = vpop.permute.xlu0 %1013 }
 0x1b0   : > { %v1284_v15 = vsel %vm1196_vm8, %v4404_v40, %v1014_v13  ;;  %v1286_v37 = vsel %vm1196_vm8, %v816_v4, %v1014_v13 }
 0x1b1   : > { %v1357_v17 = vsel %vm1287_vm9, %v1284_v15, %v1193_v1  ;;  %v1359_v7 = vsel %vm1287_vm9, %v1286_v37, %v1195_v22 }
 0x1b2   : > { %v1616_v45 = vshrl.u32 %v1357_v17, 16  ;;  %v1619_v16 = vshll.u32 %v1357_v17, 16  ;;  %v1623_v36 = vshrl.u32 %v1359_v7, 16  ;;  %v1626_v63 = vshll.u32 %v1359_v7, 16  ;;  %v5579_v43 = vpop.f32.mrf.mxu3  ;;  %v2756_v62 = vpop.permute.xlu1 %2755 }
 0x1b3   : > { %2013 = vrot.lane.b32.xlu2 %v5549_v52, %s4685_s29  ;;  %1851 = vrot.lane.b32.xlu0 %v5497_v25, %s4684_s20  ;;  %v2918_v9 = vsel %vm1287_vm9, %v2829_v50, %v2756_v62 }
 0x1b4   : > { %1979 = vrot.lane.b32.xlu1 %v5505_v33, %s4685_s29  ;;  %v1618_v8 = vrot.slane %v1616_v45, 3  ;;  %v1621_v23 = vrot.slane %v1619_v16, 4  ;;  %v1625_v59 = vrot.slane %v1623_v36, 3  ;;  %v1628_v6 = vrot.slane %v1626_v63, 4  ;;  %v5644_v45 = vld [vmem:[%s6854_s2] ss:$0 sm:$0xff] }
 0x1b5   : > { %v2994_v14 = vshrl.u32 %v2918_v9, 16  ;;  %v2997_v2 = vshll.u32 %v2918_v9, 16 }
 0x1b6   : > { %v5585_v60 = vpop.f32.mrf.mxu0  ;;  %v1622_v55 = vor.u32 %v1621_v23, %v1618_v8  ;;  %v1629_v29 = vor.u32 %v1628_v6, %v1625_v59 }
 0x1b7   : > { %v2754_v5 = vpop.permute.xlu0 %2753  ;;  %v2996_v54 = vrot.slane %v2994_v14, 3  ;;  %v2999_v51 = vrot.slane %v2997_v2, 4 }
 0x1b8   : > { %v2916_v47 = vsel %vm1287_vm9, %v2827_v49, %v2754_v5  ;;  %v1630_v3 = vsel %vm1360_vm10, %v1622_v55, %v1629_v29 }
 0x1b9   : > { %v2987_v32 = vshrl.u32 %v2916_v47, 16  ;;  %v2990_v0 = vshll.u32 %v2916_v47, 16  ;;  %4159 = vmatmul.msk.bf16.gmra.mxu3 %vm1655_vm11, %v1630_v3  ;;  %v3000_v39 = vor.u32 %v2999_v51, %v2996_v54 }
 0x1ba   : > { %v5604_v40 = vpop.f32.mrf.mxu3 }
 0x1bb   : > { %1887 = vrot.lane.b32.xlu2 %v5549_v52, %s4684_s20  ;;  %2015 = vrot.lane.b32.xlu0 %v5557_v31, %s4685_s29  ;;  %v2989_v56 = vrot.slane %v2987_v32, 3  ;;  %v2992_v22 = vrot.slane %v2990_v0, 4 }
 0x1bc   : > { %1853 = vrot.lane.b32.xlu1 %v5505_v33, %s4684_s20 }
 0x1bd   : > { %v2993_v58 = vor.u32 %v2992_v22, %v2989_v56 }
 0x1be   : > { %v5601_v1 = vpop.f32.mrf.mxu0 }
 0x1bf   : > { %v3001_v4 = vsel %vm1360_vm10, %v2993_v58, %v3000_v39 }
 0x1c0   : > { %4172 = vmatmul.msk.bf16.vlgmr.msra.gmra.mxu1 %vm1655_vm11, %v3001_v4 }
 0x1c2   : > { %v5615_v15 = vpop.f32.mrf.mxu3 }
 0x1c3   : > { %1889 = vrot.lane.b32.xlu0 %v5557_v31, %s4684_s20  ;;  %1981 = vrot.lane.b32.xlu2 %v5513_v41, %s4685_s29 }
 0x1c4   : > { %2017 = vrot.lane.b32.xlu1 %v5579_v43, %s4685_s29 }
 0x1c6   : > { %v5613_v13 = vpop.f32.mrf.mxu0 }
 0x1ca   : > { %v5623_v37 = vpop.f32.mrf.mxu3 }
 0x1cb   : > { %1855 = vrot.lane.b32.xlu2 %v5513_v41, %s4684_s20  ;;  %1983 = vrot.lane.b32.xlu0 %v5529_v24, %s4685_s29 }
 0x1cc   : > { %1891 = vrot.lane.b32.xlu1 %v5579_v43, %s4684_s20 }
 0x1ce   : > { %v5625_v12 = vpop.f32.mrf.mxu0 }
 0x1d2   : > { %v5647_v36 = vpop.f32.mrf.mxu3 }
 0x1d3   : > { %2019 = vrot.lane.b32.xlu2 %v5604_v40, %s4685_s29  ;;  %1857 = vrot.lane.b32.xlu0 %v5529_v24, %s4684_s20 }
 0x1d4   : > { %1985 = vrot.lane.b32.xlu1 %v5539_v11, %s4685_s29 }
 0x1d6   : > { %v5637_v17 = vpop.f32.mrf.mxu0 }
 0x1da   : > { %v5658_v53 = vpop.f32.mrf.mxu3 }
 0x1db   : > { %1893 = vrot.lane.b32.xlu2 %v5604_v40, %s4684_s20  ;;  %2021 = vrot.lane.b32.xlu0 %v5615_v15, %s4685_s29 }
 0x1dc   : > { %1859 = vrot.lane.b32.xlu1 %v5539_v11, %s4684_s20 }
 0x1de   : > { %v5668_v47 = vpop.f32.mrf.mxu0 }
 0x1e3   : > { %1895 = vrot.lane.b32.xlu0 %v5615_v15, %s4684_s20  ;;  %1987 = vrot.lane.b32.xlu2 %v5547_v35, %s4685_s29 }
 0x1e4   : > { %2023 = vrot.lane.b32.xlu1 %v5623_v37, %s4685_s29 }
 0x1e5   : > { %v2008_v18 = vpop.permute.xlu2 %2007 }
 0x1eb   : > { %1861 = vrot.lane.b32.xlu2 %v5547_v35, %s4684_s20  ;;  %1989 = vrot.lane.b32.xlu0 %v5559_v26, %s4685_s29 }
 0x1ec   : > { %1897 = vrot.lane.b32.xlu1 %v5623_v37, %s4684_s20 }
 0x1ed   : > { %v1882_v7 = vpop.permute.xlu2 %1881  ;;  %v1878_v46 = vpop.permute.xlu0 %1877 }
 0x1ee   : > { %v1955_v16 = vadd.f32 %v1878_v46, %v5637_v17  ;;  %v1957_v56 = vadd.f32 %v1882_v7, %v5493_v34 }
 0x1f0   : > { %v2085_v63 = vadd.f32 %v2008_v18, %v1955_v16 }
 0x1f2   : > { %v2120_v28 = vadd.f32 %v5644_v45, %v2085_v63 }
 0x1f3   : > { %2025 = vrot.lane.b32.xlu2 %v5647_v36, %s4685_s29  ;;  %1863 = vrot.lane.b32.xlu0 %v5559_v26, %s4684_s20 }
 0x1f4   : > { %v2152_v8 = vmax.f32 %v2120_v28, 0.0  ;;  %1991 = vrot.lane.b32.xlu1 %v5585_v60, %s4685_s29 }
 0x1f5   : > { %v1880_v23 = vpop.permute.xlu1 %1879  ;;  %v1842_v59 = vpop.permute.xlu0 %1841 }
 0x1f6   : > { %v2184_v49 = vpack.c.bf16 %v2152_v8, %v2152_v8  ;;  %v1937_v50 = vadd.f32 %v1842_v59, %v5440_v10  ;;  %v1972_v6 = vpop.permute.xlu2 %1971  ;;  %v1956_v14 = vadd.f32 %v1880_v23, %v5668_v47 }
 0x1f8   : > { %2216 = vst.msk [vmem:[#allocation2 + $0xa4] sm:$0xf] %vm387_vm0, %v2184_v49  ;;  %v2067_v55 = vadd.f32 %v1972_v6, %v1937_v50 }
 0x1fa   : > { %v2102_v62 = vadd.f32 %v5644_v45, %v2067_v55 }
 0x1fb   : > { %1899 = vrot.lane.b32.xlu2 %v5647_v36, %s4684_s20  ;;  %2027 = vrot.lane.b32.xlu0 %v5658_v53, %s4685_s29 }
 0x1fc   : > { %v2134_v5 = vmax.f32 %v2102_v62, 0.0  ;;  %1865 = vrot.lane.b32.xlu1 %v5585_v60, %s4684_s20 }
 0x1fd   : > { %v1844_v29 = vpop.permute.xlu1 %1843 }
 0x1fe   : > { %v2166_v10 = vpack.c.bf16 %v2134_v5, %v2134_v5  ;;  %v1848_v9 = vpop.permute.xlu2 %1847  ;;  %v1938_v7 = vadd.f32 %v1844_v29, %v5462_v38 }
 0x1ff   : > { %v5696_v50 = vld [vmem:[#allocation2 + $0xa0] sm:$0xf0]  }
 0x200   : > { %2198 = vst.msk [vmem:[#allocation2 + $0x14] sm:$0xf] %vm387_vm0, %v2166_v10 }
 0x203   : > { %1993 = vrot.lane.b32.xlu2 %v5601_v1, %s4685_s29  ;;  %1995 = vrot.lane.b32.xlu0 %v5613_v13, %s4685_s29 }
 0x204   : > { %1997 = vrot.lane.b32.xlu1 %v5625_v12, %s4685_s29 }
 0x205   : > { %v2010_v2 = vpop.permute.xlu0 %2009 }
 0x206   : > { %v2086_v32 = vadd.f32 %v2010_v2, %v1956_v14  ;;  %v1846_v0 = vpop.permute.xlu1 %1845  ;;  %v1850_v48 = vpop.permute.xlu2 %1849 }
 0x207   : > { %v1939_v2 = vadd.f32 %v1846_v0, %v5472_v61 }
 0x208   : > { %v2121_v3 = vadd.f32 %v5644_v45, %v2086_v32 }
 0x20a   : > { %v2153_v54 = vmax.f32 %v2121_v3, 0.0  ;;  %v1940_v3 = vadd.f32 %v1848_v9, %v5484_v42  ;;  %v1941_v42 = vadd.f32 %v1850_v48, %v5487_v20 }
 0x20b   : > { %1867 = vrot.lane.b32.xlu2 %v5601_v1, %s4684_s20  ;;  %1869 = vrot.lane.b32.xlu0 %v5613_v13, %s4684_s20 }
 0x20c   : > { %v2185_v51 = vpack.c.bf16 %v2153_v54, %v2153_v54  ;;  %1871 = vrot.lane.b32.xlu1 %v5625_v12, %s4684_s20 }
 0x20d   : > { %v1884_v22 = vpop.permute.xlu0 %1883 }
 0x20e   : > { %2217 = vst.msk [vmem:[#allocation2 + $0xa8] sm:$0xf] %vm387_vm0, %v2185_v51  ;;  %v1958_v39 = vadd.f32 %v1884_v22, %v5499_v44  ;;  %v2012_v58 = vpop.permute.xlu1 %2011  ;;  %v2014_v4 = vpop.permute.xlu2 %2013  ;;  %v2238_v51 = vld [vmem:[#allocation2 + $0x1c] sm:$0x1] }
 0x20f   : > { %v2087_v18 = vadd.f32 %v2012_v58, %v1957_v56 }
 0x210   : > { %v2088_v46 = vadd.f32 %v2014_v4, %v1958_v39 }
 0x211   : > { %v2122_v16 = vadd.f32 %v5644_v45, %v2087_v18  ;;  %v2664_v18 = vunpack.c.l.b16 %v2238_v51 }
 0x212   : > { %v2123_v63 = vadd.f32 %v5644_v45, %v2088_v46  ;;  %v2274_v46 = vld [vmem:[#allocation2 + $0xac] sm:$0x1] }
 0x213   : > { %v2154_v28 = vmax.f32 %v2122_v16, 0.0  ;;  %1999 = vrot.lane.b32.xlu2 %v5637_v17, %s4685_s29  ;;  %2001 = vrot.lane.b32.xlu0 %v5668_v47, %s4685_s29 }
 0x214   : > { %v2155_v8 = vmax.f32 %v2123_v63, 0.0 }
 0x215   : > { %v2186_v23 = vpack.c.bf16 %v2154_v28, %v2154_v28  ;;  %v1974_v59 = vpop.permute.xlu0 %1973  ;;  %v5694_v49 = vld [vmem:[#allocation2 + $0xa4] sm:$0xff]   ;;  %v2682_v28 = vpack.c.b16 %v2664_v18, %v2664_v18 }
 0x216   : > { %v2187_v6 = vpack.c.bf16 %v2155_v8, %v2155_v8  ;;  %v1886_v55 = vpop.permute.xlu1 %1885  ;;  %v2068_v62 = vadd.f32 %v1974_v59, %v1938_v7  ;;  %v5698_v5 = vpop.permute.xlu2 %1887  ;;  %v2389_v10 = vunpack.c.h.b16 %v5694_v49  ;;  %v2729_v14 = vrot.slane %v5694_v49, 5 }
 0x217   : > { %2218 = vst.msk [vmem:[#allocation2 + $0xb4] sm:$0xf] %vm387_vm0, %v2186_v23  ;;  %v5716_v23 = vld [vmem:[#allocation2 + $0x10] sm:$0xf0]   ;;  %v2673_v59 = vunpack.c.l.b16 %v2274_v46  ;;  %v1959_v18 = vadd.f32 %v1886_v55, %v5507_v27 }
 0x218   : > { %2219 = vst.msk [vmem:[#allocation2 + $0xb8] sm:$0xf] %vm387_vm0, %v2187_v6  ;;  %v2103_v38 = vadd.f32 %v5644_v45, %v2068_v62  ;;  %2793 = vrot.lane.b32.xlu1 %v2729_v14, %s4683_s15 }
 0x219   : > { %v2691_v51 = vpack.c.b16 %v2673_v59, %v2673_v59 }
 0x21a   : > { %v2135_v29 = vmax.f32 %v2103_v38, 0.0 }
 0x21c   : > { %v2167_v32 = vpack.c.bf16 %v2135_v29, %v2135_v29 }
 0x21d   : > { %v1976_v54 = vpop.permute.xlu0 %1975 }
 0x21e   : > { %2199 = vst.msk [vmem:[#allocation2 + $0x18] sm:$0xf] %vm387_vm0, %v2167_v32  ;;  %v2069_v56 = vadd.f32 %v1976_v54, %v1939_v2  ;;  %v1978_v22 = vpop.permute.xlu1 %1977  ;;  %v1982_v39 = vpop.permute.xlu2 %1981  ;;  %v5725_v32 = vld [vmem:[#allocation2 + $0xb0] sm:$0xf0]  }
 0x21f   : > { %v2070_v58 = vadd.f32 %v1978_v22, %v1940_v3  ;;  %v5723_v2 = vld [vmem:[#allocation2 + $0xb4] sm:$0xff]   ;;  %v2703_v3 = vrot.slane %v2682_v28, 5 }
 0x220   : > { %v2104_v4 = vadd.f32 %v5644_v45, %v2069_v56 }
 0x221   : > { %v2105_v61 = vadd.f32 %v5644_v45, %v2070_v58 }
 0x222   : > { %v2136_v0 = vmax.f32 %v2104_v4, 0.0 }
 0x223   : > { %v2137_v16 = vmax.f32 %v2105_v61, 0.0 }
 0x224   : > { %v2168_v63 = vpack.c.bf16 %v2136_v0, %v2136_v0  ;;  %v2546_v0 = vshrl.u32 %v5694_v49, 16 }
 0x225   : > { %v2169_v9 = vpack.c.bf16 %v2137_v16, %v2137_v16  ;;  %v1852_v7 = vpop.permute.xlu0 %1851  ;;  %v5714_v8 = vld [vmem:[#allocation2 + $0x14] sm:$0xff]  }
 0x226   : > { %2200 = vst.msk [vmem:[#allocation2 + $0x24] sm:$0xf] %vm387_vm0, %v2168_v63  ;;  %v1942_v6 = vadd.f32 %v1852_v7, %v5489_v57  ;;  %v1980_v62 = vpop.permute.xlu1 %1979  ;;  %v5720_v38 = vpop.permute.xlu2 %1855  ;;  %v2362_v29 = vunpack.c.h.b16 %v5714_v8  ;;  %v2702_v22 = vrot.slane %v5714_v8, 5  ;;  %v2474_v58 = vshrl.u32 %v5714_v8, 16 }
 0x227   : > { %2201 = vst.msk [vmem:[#allocation2 + $0x28] sm:$0xf] %vm387_vm0, %v2169_v9  ;;  %v2071_v20 = vadd.f32 %v1980_v62, %v1941_v42  ;;  %v2477_v4 = vshll.u32 %v5714_v8, 16  ;;  %v2730_v7 = vrot.slane %v2691_v51, 5 }
 0x228   : > { %v2072_v48 = vadd.f32 %v1982_v39, %v1942_v6  ;;  %v2549_v39 = vshll.u32 %v5694_v49, 16  ;;  %2757 = vrot.lane.b32.xlu2 %v2702_v22, %s4683_s15  ;;  %v2704_v16 = vsel %vm1069_vm4, %v2702_v22, %v2703_v3  ;;  %v2476_v63 = vrot.slane %v2474_v58, 4  ;;  %v4419_v49 = vld [vmem:[#allocation2 + $0x20] sm:$0x8] }
 0x229   : > { %v2106_v54 = vadd.f32 %v5644_v45, %v2071_v20  ;;  %v2479_v28 = vrot.slane %v2477_v4, 5  ;;  %2759 = vrot.lane.b32.xlu0 %v2704_v16, %s4683_s15  ;;  %v2554_v58 = vshrl.u32 %v5723_v2, 16  ;;  %v2557_v4 = vshll.u32 %v5723_v2, 16  ;;  %v2242_v16 = vld [vmem:[#allocation2 + $0x2c] sm:$0x1] }
 0x22a   : > { %v2107_v57 = vadd.f32 %v5644_v45, %v2072_v48  ;;  %v2551_v3 = vrot.slane %v2549_v39, 5 }
 0x22b   : > { %v2138_v61 = vmax.f32 %v2106_v54, 0.0  ;;  %v2480_v62 = vor.u32 %v2479_v28, %v2476_v63  ;;  %v2548_v54 = vrot.slane %v2546_v0, 4  ;;  %v1960_v63 = vadd.f32 %v5698_v5, %v5515_v21 }
 0x22c   : > { %v2139_v46 = vmax.f32 %v2107_v57, 0.0 }
 0x22d   : > { %v2170_v42 = vpack.c.bf16 %v2138_v61, %v2138_v61  ;;  %v2016_v9 = vpop.permute.xlu0 %2015  ;;  %v5742_v48 = vld [vmem:[#allocation2 + $0x20] sm:$0xf0]   ;;  %2611 = vrot.lane.b32.xlu1 %v2480_v62, %s4682_s1  ;;  %v2552_v61 = vor.u32 %v2551_v3, %v2548_v54 }
 0x22e   : > { %v2171_v59 = vpack.c.bf16 %v2139_v46, %v2139_v46  ;;  %v2089_v6 = vadd.f32 %v2016_v9, %v1959_v18  ;;  %v1854_v27 = vpop.permute.xlu1 %1853  ;;  %v2020_v55 = vpop.permute.xlu2 %2019  ;;  %v5740_v20 = vld [vmem:[#allocation2 + $0x24] sm:$0xff]   ;;  %v2731_v18 = vsel %vm1069_vm4, %v2729_v14, %v2730_v7  ;;  %v2556_v7 = vrot.slane %v2554_v58, 4 }
 0x22f   : > { %2202 = vst.msk [vmem:[#allocation2 + $0x34] sm:$0xf] %vm387_vm0, %v2170_v42  ;;  %v2365_v57 = vunpack.c.h.b16 %v5740_v20  ;;  %v2482_v0 = vshrl.u32 %v5740_v20, 16  ;;  %v2485_v39 = vshll.u32 %v5740_v20, 16 }
 0x230   : > { %2203 = vst.msk [vmem:[#allocation2 + $0x38] sm:$0xf] %vm387_vm0, %v2171_v59  ;;  %v2124_v22 = vadd.f32 %v5644_v45, %v2089_v6  ;;  %2795 = vrot.lane.b32.xlu2 %v2731_v18, %s4683_s15  ;;  %v2559_v59 = vrot.slane %v2557_v4, 5  ;;  %v5764_v6 = vpop.f32.mrf.mxu3 }
 0x231   : > { %2629 = vrot.lane.b32.xlu0 %v2552_v61, %s4682_s1  ;;  %v2484_v54 = vrot.slane %v2482_v0, 4  ;;  %v2487_v3 = vrot.slane %v2485_v39, 5 }
 0x232   : > { %v2156_v51 = vmax.f32 %v2124_v22, 0.0  ;;  %v2665_v22 = vunpack.c.l.b16 %v2242_v16  ;;  %v2560_v4 = vor.u32 %v2559_v59, %v2556_v7  ;;  %v2705_v7 = vrot.slane %v5740_v20, 5 }
 0x233   : > { %v2488_v0 = vor.u32 %v2487_v3, %v2484_v54 }
 0x234   : > { %v2188_v46 = vpack.c.bf16 %v2156_v51, %v2156_v51  ;;  %v2683_v39 = vpack.c.b16 %v2665_v22, %v2665_v22 }
 0x235   : > { %v1890_v28 = vpop.permute.xlu0 %1889  ;;  %2029 = vrot.lane.b32.xlu1 %v5764_v6, %s4685_s29 }
 0x236   : > { %2220 = vst.msk [vmem:[#allocation2 + $0xc4] sm:$0xf] %vm387_vm0, %v2188_v46  ;;  %v1961_v42 = vadd.f32 %v1890_v28, %v5523_v30  ;;  %v2018_v14 = vpop.permute.xlu1 %2017  ;;  %v5762_v9 = vpop.permute.xlu2 %1893  ;;  %v5768_v21 = vld [vmem:[#allocation2 + $0x30] sm:$0xf0]   ;;  %v2278_v30 = vld [vmem:[#allocation2 + $0xbc] sm:$0x1] }
 0x237   : > { %v2090_v62 = vadd.f32 %v2018_v14, %v1960_v63  ;;  %v5766_v51 = vld [vmem:[#allocation2 + $0x34] sm:$0xff]   ;;  %v2674_v16 = vunpack.c.l.b16 %v2278_v30  ;;  %v1943_v63 = vadd.f32 %v1854_v27, %v5491_v19  ;;  %v2706_v54 = vrot.slane %v2683_v39, 5  ;;  %v2246_v27 = vld [vmem:[#allocation2 + $0x3c] sm:$0x1] }
 0x238   : > { %v2091_v5 = vadd.f32 %v2020_v55, %v1961_v42  ;;  %v2368_v61 = vunpack.c.h.b16 %v5766_v51  ;;  %2631 = vrot.lane.b32.xlu2 %v2560_v4, %s4682_s1  ;;  %v2493_v30 = vshll.u32 %v5766_v51, 16 }
 0x239   : > { %v2125_v18 = vadd.f32 %v5644_v45, %v2090_v62  ;;  %2613 = vrot.lane.b32.xlu0 %v2488_v0, %s4682_s1  ;;  %v2692_v3 = vpack.c.b16 %v2674_v16, %v2674_v16 }
 0x23a   : > { %v2126_v58 = vadd.f32 %v5644_v45, %v2091_v5  ;;  %v2490_v5 = vshrl.u32 %v5766_v51, 16 }
 0x23b   : > { %v2157_v46 = vmax.f32 %v2125_v18, 0.0  ;;  %v2707_v18 = vsel %vm1069_vm4, %v2705_v7, %v2706_v54  ;;  %v2733_v4 = vrot.slane %v2692_v3, 5 }
 0x23c   : > { %v2158_v28 = vmax.f32 %v2126_v58, 0.0  ;;  %v2732_v58 = vrot.slane %v5723_v2, 5 }
 0x23d   : > { %v2189_v55 = vpack.c.bf16 %v2157_v46, %v2157_v46  ;;  %v1984_v42 = vpop.permute.xlu0 %1983  ;;  %2761 = vrot.lane.b32.xlu1 %v2705_v7, %s4683_s15  ;;  %v2666_v46 = vunpack.c.l.b16 %v2246_v27 }
 0x23e   : > { %v2190_v14 = vpack.c.bf16 %v2158_v28, %v2158_v28  ;;  %v1892_v62 = vpop.permute.xlu1 %1891  ;;  %v2073_v56 = vadd.f32 %v1984_v42, %v1943_v63  ;;  %v1988_v59 = vpop.permute.xlu2 %1987  ;;  %v2492_v28 = vrot.slane %v2490_v5, 4 }
 0x23f   : > { %2221 = vst.msk [vmem:[#allocation2 + $0xc8] sm:$0xf] %vm387_vm0, %v2189_v55  ;;  %v2495_v55 = vrot.slane %v2493_v30, 5  ;;  %v2684_v7 = vpack.c.b16 %v2666_v46, %v2666_v46  ;;  %v1962_v5 = vadd.f32 %v1892_v62, %v5549_v52 }
 0x240   : > { %2222 = vst.msk [vmem:[#allocation2 + $0xd4] sm:$0xf] %vm387_vm0, %v2190_v14  ;;  %v2108_v19 = vadd.f32 %v5644_v45, %v2073_v56  ;;  %2763 = vrot.lane.b32.xlu2 %v2707_v18, %s4683_s15  ;;  %v1944_v56 = vadd.f32 %v5720_v38, %v5497_v25  ;;  %v2734_v14 = vsel %vm1069_vm4, %v2732_v58, %v2733_v4 }
 0x241   : > { %2797 = vrot.lane.b32.xlu0 %v2732_v58, %s4683_s15 }
 0x242   : > { %v2140_v22 = vmax.f32 %v2108_v19, 0.0  ;;  %v2496_v19 = vor.u32 %v2495_v55, %v2492_v28  ;;  %v2250_v28 = vld [vmem:[#allocation2 + $0x4c] sm:$0x1] }
 0x244   : > { %v2172_v0 = vpack.c.bf16 %v2140_v22, %v2140_v22  ;;  %v2709_v22 = vrot.slane %v2684_v7, 5 }
 0x245   : > { %v1858_v39 = vpop.permute.xlu0 %1857  ;;  %2799 = vrot.lane.b32.xlu1 %v2734_v14, %s4683_s15 }
 0x246   : > { %2204 = vst.msk [vmem:[#allocation2 + $0x44] sm:$0xf] %vm387_vm0, %v2172_v0  ;;  %v1945_v16 = vadd.f32 %v1858_v39, %v5505_v33  ;;  %v1986_v63 = vpop.permute.xlu1 %1985  ;;  %v5796_v25 = vpop.permute.xlu2 %1861  ;;  %v2708_v33 = vrot.slane %v5766_v51, 5 }
 0x247   : > { %v2074_v42 = vadd.f32 %v1986_v63, %v1944_v56 }
 0x248   : > { %v2075_v54 = vadd.f32 %v1988_v59, %v1945_v16  ;;  %2615 = vrot.lane.b32.xlu2 %v2496_v19, %s4682_s1  ;;  %v2710_v0 = vsel %vm1069_vm4, %v2708_v33, %v2709_v22  ;;  %v1963_v16 = vadd.f32 %v5762_v9, %v5557_v31  ;;  %v2667_v31 = vunpack.c.l.b16 %v2250_v28 }
 0x249   : > { %v2109_v3 = vadd.f32 %v5644_v45, %v2074_v42  ;;  %2765 = vrot.lane.b32.xlu0 %v2708_v33, %s4683_s15 }
 0x24a   : > { %v2110_v38 = vadd.f32 %v5644_v45, %v2075_v54  ;;  %v2685_v22 = vpack.c.b16 %v2667_v31, %v2667_v31 }
 0x24b   : > { %v2141_v27 = vmax.f32 %v2109_v3, 0.0 }
 0x24c   : > { %v2142_v30 = vmax.f32 %v2110_v38, 0.0 }
 0x24d   : > { %v2173_v18 = vpack.c.bf16 %v2141_v27, %v2141_v27  ;;  %v2022_v59 = vpop.permute.xlu0 %2021  ;;  %2767 = vrot.lane.b32.xlu1 %v2710_v0, %s4683_s15  ;;  %v5818_v7 = vld [vmem:[#allocation2 + $0x40] sm:$0xf0]  }
 0x24e   : > { %v2174_v58 = vpack.c.bf16 %v2142_v30, %v2142_v30  ;;  %v2092_v4 = vadd.f32 %v2022_v59, %v1962_v5  ;;  %v1860_v46 = vpop.permute.xlu1 %1859  ;;  %v2026_v62 = vpop.permute.xlu2 %2025 }
 0x24f   : > { %2205 = vst.msk [vmem:[#allocation2 + $0x48] sm:$0xf] %vm387_vm0, %v2173_v18  ;;  %v1946_v27 = vadd.f32 %v1860_v46, %v5513_v41 }
 0x250   : > { %2206 = vst.msk [vmem:[#allocation2 + $0x54] sm:$0xf] %vm387_vm0, %v2174_v58  ;;  %v2127_v56 = vadd.f32 %v5644_v45, %v2092_v4  ;;  %1873 = vrot.lane.b32.xlu2 %v5637_v17, %s4684_s20 }
 0x251   : > { %1875 = vrot.lane.b32.xlu0 %v5668_v47, %s4684_s20 }
 0x252   : > { %v2159_v52 = vmax.f32 %v2127_v56, 0.0  ;;  %v2712_v56 = vrot.slane %v2685_v22, 5 }
 0x254   : > { %v2191_v39 = vpack.c.bf16 %v2159_v52, %v2159_v52 }
 0x255   : > { %v1896_v63 = vpop.permute.xlu0 %1895  ;;  %2003 = vrot.lane.b32.xlu1 %v5493_v34, %s4685_s29 }
 0x256   : > { %2223 = vst.msk [vmem:[#allocation2 + $0xd8] sm:$0xf] %vm387_vm0, %v2191_v39  ;;  %v1964_v55 = vadd.f32 %v1896_v63, %v5579_v43  ;;  %v2024_v42 = vpop.permute.xlu1 %2023  ;;  %v5816_v14 = vld [vmem:[#allocation2 + $0x44] sm:$0xff]   ;;  %v5830_v30 = vpop.permute.xlu2 %1899  ;;  %v1947_v39 = vadd.f32 %v5796_v25, %v5529_v24  ;;  %v2254_v63 = vld [vmem:[#allocation2 + $0x5c] sm:$0x1] }
 0x257   : > { %v2093_v54 = vadd.f32 %v2024_v42, %v1963_v16  ;;  %v2371_v17 = vunpack.c.h.b16 %v5816_v14  ;;  %v2498_v43 = vshrl.u32 %v5816_v14, 16  ;;  %v2501_v19 = vshll.u32 %v5816_v14, 16  ;;  %v5846_v42 = vld [vmem:[#allocation2 + $0xc4] sm:$0xff]  }
 0x258   : > { %v2094_v3 = vadd.f32 %v2026_v62, %v1964_v55  ;;  %2005 = vrot.lane.b32.xlu2 %v5499_v44, %s4685_s29  ;;  %v2711_v46 = vrot.slane %v5816_v14, 5  ;;  %v2395_v24 = vunpack.c.h.b16 %v5846_v42 }
 0x259   : > { %v2128_v47 = vadd.f32 %v5644_v45, %v2093_v54  ;;  %1901 = vrot.lane.b32.xlu0 %v5658_v53, %s4684_s20  ;;  %v2500_v18 = vrot.slane %v2498_v43, 4  ;;  %v2503_v59 = vrot.slane %v2501_v19, 5  ;;  %v5848_v54 = vld [vmem:[#allocation2 + $0xc0] sm:$0xf0]  }
 0x25a   : > { %v2129_v9 = vadd.f32 %v5644_v45, %v2094_v3  ;;  %v2713_v53 = vsel %vm1069_vm4, %v2711_v46, %v2712_v56 }
 0x25b   : > { %v2160_v38 = vmax.f32 %v2128_v47, 0.0  ;;  %v2504_v41 = vor.u32 %v2503_v59, %v2500_v18  ;;  %v5859_v18 = vld [vmem:[#allocation2 + $0x50] sm:$0xf0]  }
 0x25c   : > { %v2161_v33 = vmax.f32 %v2129_v9, 0.0  ;;  %v2668_v9 = vunpack.c.l.b16 %v2254_v63 }
 0x25d   : > { %v2192_v5 = vpack.c.bf16 %v2160_v38, %v2160_v38  ;;  %v1990_v34 = vpop.permute.xlu0 %1989  ;;  %2617 = vrot.lane.b32.xlu1 %v2504_v41, %s4682_s1  ;;  %v2562_v41 = vshrl.u32 %v5846_v42, 16 }
 0x25e   : > { %v2193_v58 = vpack.c.bf16 %v2161_v33, %v2161_v33  ;;  %v1898_v4 = vpop.permute.xlu1 %1897  ;;  %v2076_v0 = vadd.f32 %v1990_v34, %v1946_v27  ;;  %v1994_v3 = vpop.permute.xlu2 %1993  ;;  %v2686_v33 = vpack.c.b16 %v2668_v9, %v2668_v9 }
 0x25f   : > { %2224 = vst.msk [vmem:[#allocation2 + $0xe4] sm:$0xf] %vm387_vm0, %v2192_v5  ;;  %v1965_v19 = vadd.f32 %v1898_v4, %v5604_v40 }
 0x260   : > { %2225 = vst.msk [vmem:[#allocation2 + $0xe8] sm:$0xf] %vm387_vm0, %v2193_v58  ;;  %v2111_v44 = vadd.f32 %v5644_v45, %v2076_v0  ;;  %2769 = vrot.lane.b32.xlu2 %v2711_v46, %s4683_s15  ;;  %v2715_v4 = vrot.slane %v2686_v33, 5  ;;  %v5882_v33 = vld [vmem:[#allocation2 + $0xd0] sm:$0xf0]  }
 0x261   : > { %2771 = vrot.lane.b32.xlu0 %v2713_v53, %s4683_s15 }
 0x262   : > { %v2143_v52 = vmax.f32 %v2111_v44, 0.0  ;;  %v2565_v44 = vshll.u32 %v5846_v42, 16 }
 0x264   : > { %v2175_v62 = vpack.c.bf16 %v2143_v52, %v2143_v52  ;;  %v2567_v9 = vrot.slane %v2565_v44, 5 }
 0x265   : > { %v1864_v16 = vpop.permute.xlu0 %1863  ;;  %1903 = vrot.lane.b32.xlu1 %v5764_v6, %s4684_s20 }
 0x266   : > { %2207 = vst.msk [vmem:[#allocation2 + $0x58] sm:$0xf] %vm387_vm0, %v2175_v62  ;;  %v1948_v28 = vadd.f32 %v1864_v16, %v5539_v11  ;;  %v1992_v55 = vpop.permute.xlu1 %1991  ;;  %v1804_v11 = vpop.f32.mrf.mxu3 }
 0x267   : > { %v2077_v31 = vadd.f32 %v1992_v55, %v1947_v39  ;;  %v1868_v46 = vpop.permute.xlu2 %1867 }
 0x268   : > { %v2078_v47 = vadd.f32 %v1994_v3, %v1948_v28  ;;  %2031 = vrot.lane.b32.xlu2 %v1804_v11, %s4685_s29  ;;  %v1950_v3 = vadd.f32 %v1868_v46, %v5559_v26 }
 0x269   : > { %v2112_v38 = vadd.f32 %v5644_v45, %v2077_v31 }
 0x26a   : > { %v2113_v25 = vadd.f32 %v5644_v45, %v2078_v47  ;;  %v2564_v47 = vrot.slane %v2562_v41, 4  ;;  %v2735_v41 = vrot.slane %v5846_v42, 5 }
 0x26b   : > { %v2144_v43 = vmax.f32 %v2112_v38, 0.0 }
 0x26c   : > { %v2145_v27 = vmax.f32 %v2113_v25, 0.0 }
 0x26d   : > { %v2176_v22 = vpack.c.bf16 %v2144_v43, %v2144_v43  ;;  %v2028_v5 = vpop.permute.xlu0 %2027  ;;  %v5857_v34 = vld [vmem:[#allocation2 + $0x54] sm:$0xff]  }
 0x26e   : > { %v2177_v59 = vpack.c.bf16 %v2145_v27, %v2145_v27  ;;  %v2095_v6 = vadd.f32 %v2028_v5, %v1965_v19  ;;  %v1866_v58 = vpop.permute.xlu1 %1865  ;;  %v2374_v0 = vunpack.c.h.b16 %v5857_v34  ;;  %v2714_v52 = vrot.slane %v5857_v34, 5  ;;  %v5880_v27 = vld [vmem:[#allocation2 + $0xd4] sm:$0xff]   ;;  %v2282_v5 = vld [vmem:[#allocation2 + $0xcc] sm:$0x1] }
 0x26f   : > { %2208 = vst.msk [vmem:[#allocation2 + $0x64] sm:$0xf] %vm387_vm0, %v2176_v22  ;;  %v2506_v62 = vshrl.u32 %v5857_v34, 16  ;;  %v2509_v53 = vshll.u32 %v5857_v34, 16  ;;  %v1949_v39 = vadd.f32 %v1866_v58, %v5547_v35  ;;  %v2675_v44 = vunpack.c.l.b16 %v2282_v5 }
 0x270   : > { %2209 = vst.msk [vmem:[#allocation2 + $0x68] sm:$0xf] %vm387_vm0, %v2177_v59  ;;  %v2130_v40 = vadd.f32 %v5644_v45, %v2095_v6  ;;  %2773 = vrot.lane.b32.xlu1 %v2714_v52, %s4683_s15  ;;  %v2716_v63 = vsel %vm1069_vm4, %v2714_v52, %v2715_v4  ;;  %v2568_v6 = vor.u32 %v2567_v9, %v2564_v47  ;;  %v2258_v47 = vld [vmem:[#allocation2 + $0x6c] sm:$0x1] }
 0x271   : > { %v2508_v28 = vrot.slane %v2506_v62, 4  ;;  %v2511_v55 = vrot.slane %v2509_v53, 5  ;;  %2775 = vrot.lane.b32.xlu2 %v2716_v63, %s4683_s15  ;;  %v2669_v5 = vunpack.c.l.b16 %v2258_v47 }
 0x272   : > { %v2162_v56 = vmax.f32 %v2130_v40, 0.0 }
 0x273   : > { %v2512_v43 = vor.u32 %v2511_v55, %v2508_v28  ;;  %v1806_v55 = vpop.f32.mrf.mxu3 }
 0x274   : > { %v2194_v16 = vpack.c.bf16 %v2162_v56, %v2162_v56 }
 0x275   : > { %v1996_v31 = vpop.permute.xlu0 %1995  ;;  %2619 = vrot.lane.b32.xlu0 %v2512_v43, %s4682_s1  ;;  %v2570_v43 = vshrl.u32 %v5880_v27, 16 }
 0x276   : > { %2226 = vst.msk [vmem:[#allocation2 + $0xf4] sm:$0xf] %vm387_vm0, %v2194_v16  ;;  %v2079_v38 = vadd.f32 %v1996_v31, %v1949_v39  ;;  %v1998_v25 = vpop.permute.xlu1 %1997  ;;  %v5878_v19 = vld [vmem:[#allocation2 + $0x60] sm:$0xf0]   ;;  %v2000_v39 = vpop.permute.xlu2 %1999 }
 0x277   : > { %v2080_v35 = vadd.f32 %v1998_v25, %v1950_v3  ;;  %v5876_v11 = vld [vmem:[#allocation2 + $0x64] sm:$0xff]   ;;  %v2693_v3 = vpack.c.b16 %v2675_v44, %v2675_v44 }
 0x278   : > { %v2114_v26 = vadd.f32 %v5644_v45, %v2079_v38  ;;  %v2377_v22 = vunpack.c.h.b16 %v5876_v11  ;;  %2633 = vrot.lane.b32.xlu1 %v2568_v6, %s4682_s1  ;;  %v2514_v56 = vshrl.u32 %v5876_v11, 16  ;;  %v2517_v52 = vshll.u32 %v5876_v11, 16 }
 0x279   : > { %v2115_v59 = vadd.f32 %v5644_v45, %v2080_v35  ;;  %2801 = vrot.lane.b32.xlu2 %v2735_v41, %s4683_s15  ;;  %v2573_v35 = vshll.u32 %v5880_v27, 16 }
 0x27a   : > { %v2146_v58 = vmax.f32 %v2114_v26, 0.0  ;;  %v2516_v63 = vrot.slane %v2514_v56, 4  ;;  %v2519_v28 = vrot.slane %v2517_v52, 5  ;;  %v2736_v26 = vrot.slane %v2693_v3, 5 }
 0x27b   : > { %v2147_v4 = vmax.f32 %v2115_v59, 0.0  ;;  %v2572_v56 = vrot.slane %v2570_v43, 4  ;;  %v2575_v52 = vrot.slane %v2573_v35, 5 }
 0x27c   : > { %v2178_v46 = vpack.c.bf16 %v2146_v58, %v2146_v58  ;;  %v2520_v25 = vor.u32 %v2519_v28, %v2516_v63  ;;  %v2687_v63 = vpack.c.b16 %v2669_v5, %v2669_v5  ;;  %v5913_v28 = vld [vmem:[#allocation2 + $0xe4] sm:$0xff]  }
 0x27d   : > { %v2179_v62 = vpack.c.bf16 %v2147_v4, %v2147_v4  ;;  %v1870_v53 = vpop.permute.xlu0 %1869  ;;  %2033 = vrot.lane.b32.xlu0 %v1806_v55, %s4685_s29  ;;  %v5915_v55 = vld [vmem:[#allocation2 + $0xe0] sm:$0xf0]  }
 0x27e   : > { %2210 = vst.msk [vmem:[#allocation2 + $0x74] sm:$0xf] %vm387_vm0, %v2178_v46  ;;  %v1951_v16 = vadd.f32 %v1870_v53, %v5585_v60  ;;  %v1872_v9 = vpop.permute.xlu1 %1871  ;;  %v2717_v60 = vrot.slane %v5876_v11, 5 }
 0x27f   : > { %2211 = vst.msk [vmem:[#allocation2 + $0x78] sm:$0xf] %vm387_vm0, %v2179_v62  ;;  %v1952_v6 = vadd.f32 %v1872_v9, %v5601_v1  ;;  %v2576_v9 = vor.u32 %v2575_v52, %v2572_v56  ;;  %v2578_v56 = vshrl.u32 %v5913_v28, 16  ;;  %v2581_v52 = vshll.u32 %v5913_v28, 16 }
 0x280   : > { %v2081_v31 = vadd.f32 %v2000_v39, %v1951_v16  ;;  %2621 = vrot.lane.b32.xlu1 %v2520_v25, %s4682_s1  ;;  %v2286_v39 = vld [vmem:[#allocation2 + $0xdc] sm:$0x1]  ;;  %v2737_v16 = vsel %vm1069_vm4, %v2735_v41, %v2736_v26  ;;  %v2738_v41 = vrot.slane %v5880_v27, 5  ;;  %v2718_v25 = vrot.slane %v2687_v63, 5 }
 0x281   : > { %2777 = vrot.lane.b32.xlu2 %v2717_v60, %s4683_s15 }
 0x282   : > { %v2116_v38 = vadd.f32 %v5644_v45, %v2081_v31  ;;  %v5905_v46 = vpop.permute.xlu2 %2757  ;;  %v2676_v31 = vunpack.c.l.b16 %v2286_v39 }
 0x284   : > { %v2148_v59 = vmax.f32 %v2116_v38, 0.0  ;;  %v2741_v38 = vrot.slane %v5913_v28, 5 }
 0x285   : > { %v2002_v58 = vpop.permute.xlu0 %2001  ;;  %v5909_v53 = vld [vmem:[#allocation2 + $0x70] sm:$0xf0]   ;;  %2803 = vrot.lane.b32.xlu0 %v2737_v16, %s4683_s15 }
 0x286   : > { %v2180_v4 = vpack.c.bf16 %v2148_v59, %v2148_v59  ;;  %v2082_v44 = vadd.f32 %v2002_v58, %v1952_v6  ;;  %v5907_v62 = vld [vmem:[#allocation2 + $0x74] sm:$0xff]   ;;  %v2719_v6 = vsel %vm1069_vm4, %v2717_v60, %v2718_v25  ;;  %v2694_v58 = vpack.c.b16 %v2676_v31, %v2676_v31  ;;  %v2266_v25 = vld [vmem:[#allocation2 + $0x8c] sm:$0x1] }
 0x287   : > { %v2522_v43 = vshrl.u32 %v5907_v62, 16  ;;  %v2525_v35 = vshll.u32 %v5907_v62, 16  ;;  %v2720_v39 = vrot.slane %v5907_v62, 5 }
 0x288   : > { %2212 = vst.msk [vmem:[#allocation2 + $0x84] sm:$0xf] %vm387_vm0, %v2180_v4  ;;  %v2117_v3 = vadd.f32 %v5644_v45, %v2082_v44  ;;  %2635 = vrot.lane.b32.xlu1 %v2576_v9, %s4682_s1  ;;  %v2262_v4 = vld [vmem:[#allocation2 + $0x7c] sm:$0x1]  ;;  %v2739_v16 = vrot.slane %v2694_v58, 5  ;;  %v2583_v9 = vrot.slane %v2581_v52, 5 }
 0x289   : > { %2805 = vrot.lane.b32.xlu2 %v2738_v41, %s4683_s15  ;;  %v2524_v5 = vrot.slane %v2522_v43, 4  ;;  %v2527_v59 = vrot.slane %v2525_v35, 5  ;;  %v2670_v63 = vunpack.c.l.b16 %v2262_v4 }
 0x28a   : > { %v2149_v47 = vmax.f32 %v2117_v3, 0.0  ;;  %v5927_v45 = vpop.permute.xlu2 %2795  ;;  %v2740_v43 = vsel %vm1069_vm4, %v2738_v41, %v2739_v16 }
 0x28b   : > { %v2528_v44 = vor.u32 %v2527_v59, %v2524_v5  ;;  %v2688_v35 = vpack.c.b16 %v2670_v63, %v2670_v63  ;;  %v2794_v5 = vpop.permute.xlu1 %2793 }
 0x28c   : > { %v2181_v26 = vpack.c.bf16 %v2149_v47, %v2149_v47  ;;  %v2580_v47 = vrot.slane %v2578_v56, 4 }
 0x28d   : > { %2779 = vrot.lane.b32.xlu0 %v2719_v6, %s4683_s15  ;;  %v4411_v6 = vld [vmem:[#allocation2 + $0x10] sm:$0x8]  ;;  %v2721_v56 = vrot.slane %v2688_v35, 5  ;;  %v2414_v35 = vpack.c.b16 %v2362_v29, %v2362_v29 }
 0x28e   : > { %2213 = vst.msk [vmem:[#allocation2 + $0x88] sm:$0xf] %vm387_vm0, %v2181_v26  ;;  %v2290_v26 = vld [vmem:[#allocation2 + $0xec] sm:$0x1]  ;;  %v2584_v59 = vor.u32 %v2583_v9, %v2580_v47  ;;  %v4415_v9 = vld [vmem:[#allocation2 + $0xa0] sm:$0x8] }
 0x28f   : > { %v5938_v60 = vld [vmem:[#allocation2 + $0x80] sm:$0xf0]   ;;  %v2722_v47 = vsel %vm1069_vm4, %v2720_v39, %v2721_v56 }
 0x290   : > { %2623 = vrot.lane.b32.xlu1 %v2528_v44, %s4682_s1  ;;  %v2677_v44 = vunpack.c.l.b16 %v2290_v26  ;;  %v4412_v26 = vor.u32 %v5716_v23, %v4411_v6 }
 0x291   : > { %2781 = vrot.lane.b32.xlu2 %v2720_v39, %s4683_s15 }
 0x292   : > { %v5940_v31 = vpop.permute.xlu2 %2631  ;;  %v2695_v16 = vpack.c.b16 %v2677_v44, %v2677_v44 }
 0x295   : > { %v5936_v3 = vld [vmem:[#allocation2 + $0x84] sm:$0xff]   ;;  %2807 = vrot.lane.b32.xlu0 %v2740_v43, %s4683_s15 }
 0x296   : > { %v2530_v58 = vshrl.u32 %v5936_v3, 16  ;;  %v2533_v4 = vshll.u32 %v5936_v3, 16  ;;  %v2723_v39 = vrot.slane %v5936_v3, 5 }
 0x298   : > { %2637 = vrot.lane.b32.xlu1 %v2584_v59, %s4682_s1  ;;  %v2532_v41 = vrot.slane %v2530_v58, 4  ;;  %v2535_v52 = vrot.slane %v2533_v4, 5  ;;  %v2742_v58 = vrot.slane %v2695_v16, 5  ;;  %v2671_v4 = vunpack.c.l.b16 %v2266_v25 }
 0x299   : > { %2809 = vrot.lane.b32.xlu2 %v2741_v38, %s4683_s15  ;;  %v4416_v25 = vor.u32 %v5696_v50, %v4415_v9 }
 0x29a   : > { %v5950_v63 = vpop.permute.xlu2 %2763  ;;  %v2536_v1 = vor.u32 %v2535_v52, %v2532_v41  ;;  %v2432_v41 = vpack.c.b16 %v2389_v10, %v2389_v10  ;;  %v2743_v52 = vsel %vm1069_vm4, %v2741_v38, %v2742_v58  ;;  %v2689_v16 = vpack.c.b16 %v2671_v4, %v2671_v4 }
 0x29b   : > { %v2760_v43 = vpop.permute.xlu0 %2759 }
 0x29d   : > { %2783 = vrot.lane.b32.xlu0 %v2722_v47, %s4683_s15 }
 0x29f   : > { %v2612_v59 = vpop.permute.xlu1 %2611 }
 0x2a0   : > { %v2832_v44 = vsel %vm1196_vm8, %v4412_v26, %v2612_v59  ;;  %v2834_v40 = vsel %vm1196_vm8, %v2414_v35, %v2612_v59  ;;  %2625 = vrot.lane.b32.xlu1 %v2536_v1, %s4682_s1  ;;  %v1966_v35 = vadd.f32 %v5830_v30, %v5615_v15 }
 0x2a1   : > { %v2920_v56 = vsel %vm1287_vm9, %v2832_v44, %v5905_v46  ;;  %v2922_v47 = vsel %vm1287_vm9, %v2834_v40, %v2760_v43  ;;  %2785 = vrot.lane.b32.xlu2 %v2723_v39, %s4683_s15 }
 0x2a2   : > { %v3002_v8 = vshrl.u32 %v2920_v56, 16  ;;  %v3005_v23 = vshll.u32 %v2920_v56, 16  ;;  %v3009_v29 = vshrl.u32 %v2922_v47, 16  ;;  %v3012_v6 = vshll.u32 %v2922_v47, 16  ;;  %v5976_v50 = vpop.permute.xlu2 %2615 }
 0x2a3   : > { %v2630_v1 = vpop.permute.xlu0 %2629 }
 0x2a4   : > { %v3004_v46 = vrot.slane %v3002_v8, 3  ;;  %v3007_v26 = vrot.slane %v3005_v23, 4  ;;  %v3011_v40 = vrot.slane %v3009_v29, 3  ;;  %v3014_v43 = vrot.slane %v3012_v6, 4 }
 0x2a5   : > { %v2877_v59 = vsel %vm1196_vm8, %v4416_v25, %v2630_v1  ;;  %v2879_v44 = vsel %vm1196_vm8, %v2432_v41, %v2630_v1  ;;  %2811 = vrot.lane.b32.xlu0 %v2743_v52, %s4683_s15  ;;  %v2724_v29 = vrot.slane %v2689_v16, 5 }
 0x2a6   : > { %v2956_v10 = vsel %vm1287_vm9, %v2877_v59, %v2794_v5  ;;  %v2958_v38 = vsel %vm1287_vm9, %v2879_v44, %v5927_v45  ;;  %v3008_v9 = vor.u32 %v3007_v26, %v3004_v46  ;;  %v3015_v58 = vor.u32 %v3014_v43, %v3011_v40  ;;  %v5986_v45 = vld [vmem:[%s6854_s2] ss:$0 sm:$0xff]  ;;  %v4423_v46 = vld [vmem:[#allocation2 + $0xb0] sm:$0x8] }
 0x2a7   : > { %v3137_v4 = vshrl.u32 %v2956_v10, 16  ;;  %v3140_v56 = vshll.u32 %v2956_v10, 16  ;;  %v3144_v47 = vshrl.u32 %v2958_v38, 16  ;;  %v3147_v15 = vshll.u32 %v2958_v38, 16  ;;  %v2030_v30 = vpop.permute.xlu1 %2029 }
 0x2a8   : > { %v2096_v8 = vadd.f32 %v2030_v30, %v1966_v35  ;;  %v3016_v23 = vsel %vm1360_vm10, %v3008_v9, %v3015_v58  ;;  %v2416_v26 = vpack.c.b16 %v2365_v57, %v2365_v57  ;;  %v2725_v35 = vsel %vm1069_vm4, %v2723_v39, %v2724_v29 }
 0x2a9   : > { %v3139_v6 = vrot.slane %v3137_v4, 3  ;;  %v3142_v25 = vrot.slane %v3140_v56, 4  ;;  %v3146_v41 = vrot.slane %v3144_v47, 3  ;;  %v3149_v52 = vrot.slane %v3147_v15, 4  ;;  %4173 = vmatmul.msk.bf16.gmra.mxu1 %vm1655_vm11, %v3016_v23 }
 0x2aa   : > { %v2131_v5 = vadd.f32 %v5986_v45, %v2096_v8  ;;  %v4420_v59 = vor.u32 %v5742_v48, %v4419_v49  ;;  %v6002_v48 = vpop.permute.xlu2 %1873  ;;  %v2294_v49 = vld [vmem:[#allocation2 + $0xfc] sm:$0x1]  ;;  %v4427_v8 = vld [vmem:[#allocation2 + $0x30] sm:$0x8] }
 0x2ab   : > { %v3143_v40 = vor.u32 %v3142_v25, %v3139_v6  ;;  %v3150_v16 = vor.u32 %v3149_v52, %v3146_v41  ;;  %v2614_v1 = vpop.permute.xlu0 %2613  ;;  %v2678_v6 = vunpack.c.l.b16 %v2294_v49  ;;  %v6885_v52 = vunpack.c.h.b16 %v5723_v2 }
 0x2ac   : > { %v2163_v43 = vmax.f32 %v2131_v5, 0.0  ;;  %v2839_v44 = vsel %vm1196_vm8, %v2416_v26, %v2614_v1  ;;  %v2837_v57 = vsel %vm1196_vm8, %v4420_v59, %v2614_v1 }
 0x2ad   : > { %2787 = vrot.lane.b32.xlu0 %v2725_v35, %s4683_s15  ;;  %v3151_v10 = vsel %vm1360_vm10, %v3143_v40, %v3150_v16  ;;  %v2926_v20 = vsel %vm1287_vm9, %v2839_v44, %v5950_v63  ;;  %v4424_v63 = vor.u32 %v5725_v32, %v4423_v46  ;;  %v2434_v5 = vpack.c.b16 %v6885_v52, %v6885_v52  ;;  %v6017_v44 = vld [vmem:[#allocation2 + $0xf0] sm:$0xf0]  }
 0x2ae   : > { %v2195_v38 = vpack.c.bf16 %v2163_v43, %v2163_v43  ;;  %4182 = vmatmul.msk.bf16.vlgmr.msra.gmra.mxu2 %vm1655_vm11, %v3151_v10  ;;  %v3024_v9 = vshrl.u32 %v2926_v20, 16  ;;  %v3027_v58 = vshll.u32 %v2926_v20, 16  ;;  %v2696_v10 = vpack.c.b16 %v2678_v6, %v2678_v6 }
 0x2af   : > { %v2762_v4 = vpop.permute.xlu1 %2761  ;;  %v2882_v25 = vsel %vm1196_vm8, %v4424_v63, %v5940_v31  ;;  %v2884_v32 = vsel %vm1196_vm8, %v2434_v5, %v5940_v31  ;;  %v4428_v31 = vor.u32 %v5768_v21, %v4427_v8 }
 0x2b0   : > { %2227 = vst.msk [vmem:[#allocation2 + $0xf8] sm:$0xf] %vm387_vm0, %v2195_v38  ;;  %v2924_v39 = vsel %vm1287_vm9, %v2837_v57, %v2762_v4  ;;  %v3026_v56 = vrot.slane %v3024_v9, 3  ;;  %v3029_v47 = vrot.slane %v3027_v58, 4 }
 0x2b1   : > { %v3017_v15 = vshrl.u32 %v2924_v39, 16  ;;  %v3020_v30 = vshll.u32 %v2924_v39, 16 }
 0x2b2   : > { %v3030_v16 = vor.u32 %v3029_v47, %v3026_v56  ;;  %v2006_v4 = vpop.permute.xlu2 %2005  ;;  %v2745_v56 = vrot.slane %v2696_v10, 5  ;;  %v2418_v47 = vpack.c.b16 %v2368_v61, %v2368_v61 }
 0x2b3   : > { %v3019_v23 = vrot.slane %v3017_v15, 3  ;;  %v3022_v29 = vrot.slane %v3020_v30, 4  ;;  %v2798_v41 = vpop.permute.xlu0 %2797  ;;  %v2842_v15 = vsel %vm1196_vm8, %v4428_v31, %v5976_v50  ;;  %v1953_v31 = vadd.f32 %v6002_v48, %v5613_v13  ;;  %v2270_v48 = vld [vmem:[#allocation2 + $0x9c] sm:$0x1] }
 0x2b4   : > { %v2960_v40 = vsel %vm1287_vm9, %v2882_v25, %v2798_v41  ;;  %v2844_v51 = vsel %vm1196_vm8, %v2418_v47, %v5976_v50 }
 0x2b5   : > { %v3023_v26 = vor.u32 %v3022_v29, %v3019_v23  ;;  %v3152_v43 = vshrl.u32 %v2960_v40, 16  ;;  %v3155_v1 = vshll.u32 %v2960_v40, 16 }
 0x2b7   : > { %v2800_v46 = vpop.permute.xlu1 %2799  ;;  %v3031_v35 = vsel %vm1360_vm10, %v3023_v26, %v3030_v16  ;;  %v6015_v59 = vld [vmem:[#allocation2 + $0xf4] sm:$0xff]   ;;  %v3154_v2 = vrot.slane %v3152_v43, 3  ;;  %v3157_v38 = vrot.slane %v3155_v1, 4 }
 0x2b8   : > { %v2962_v20 = vsel %vm1287_vm9, %v2884_v32, %v2800_v46  ;;  %v2404_v58 = vunpack.c.h.b16 %v6015_v59  ;;  %v2744_v6 = vrot.slane %v6015_v59, 5  ;;  %v2586_v21 = vshrl.u32 %v6015_v59, 16 }
 0x2b9   : > { %v3159_v57 = vshrl.u32 %v2962_v20, 16  ;;  %v3162_v9 = vshll.u32 %v2962_v20, 16  ;;  %4174 = vmatmul.msk.bf16.gmra.mxu1 %vm1655_vm11, %v3031_v35  ;;  %v3158_v30 = vor.u32 %v3157_v38, %v3154_v2  ;;  %v2589_v41 = vshll.u32 %v6015_v59, 16 }
 0x2ba   : > { %2813 = vrot.lane.b32.xlu2 %v2744_v6, %s4683_s15  ;;  %v2746_v52 = vsel %vm1069_vm4, %v2744_v6, %v2745_v56  ;;  %v2588_v26 = vrot.slane %v2586_v21, 4  ;;  %v2770_v2 = vpop.permute.xlu2 %2769 }
 0x2bb   : > { %v3161_v39 = vrot.slane %v3159_v57, 3  ;;  %v3164_v49 = vrot.slane %v3162_v9, 4  ;;  %v2766_v63 = vpop.permute.xlu0 %2765  ;;  %2815 = vrot.lane.b32.xlu0 %v2746_v52, %s4683_s15  ;;  %v2591_v16 = vrot.slane %v2589_v41, 5  ;;  %v2672_v52 = vunpack.c.l.b16 %v2270_v48 }
 0x2bc   : > { %v2928_v29 = vsel %vm1287_vm9, %v2842_v15, %v2766_v63  ;;  %v4431_v15 = vld [vmem:[#allocation2 + $0x40] sm:$0x8] }
 0x2bd   : > { %v3165_v23 = vor.u32 %v3164_v49, %v3161_v39  ;;  %v3032_v8 = vshrl.u32 %v2928_v29, 16  ;;  %v3035_v25 = vshll.u32 %v2928_v29, 16  ;;  %v2592_v50 = vor.u32 %v2591_v16, %v2588_v26 }
 0x2bf   : > { %v2768_v61 = vpop.permute.xlu1 %2767  ;;  %v3166_v5 = vsel %vm1360_vm10, %v3158_v30, %v3165_v23  ;;  %v3034_v43 = vrot.slane %v3032_v8, 3  ;;  %v3037_v1 = vrot.slane %v3035_v25, 4  ;;  %2639 = vrot.lane.b32.xlu1 %v2592_v50, %s4682_s1  ;;  %v4432_v25 = vor.u32 %v5818_v7, %v4431_v15 }
 0x2c0   : > { %v2930_v40 = vsel %vm1287_vm9, %v2844_v51, %v2768_v61  ;;  %4183 = vmatmul.msk.bf16.gmra.mxu2 %vm1655_vm11, %v3166_v5 }
 0x2c1   : > { %v3039_v32 = vshrl.u32 %v2930_v40, 16  ;;  %v3042_v46 = vshll.u32 %v2930_v40, 16  ;;  %v3038_v20 = vor.u32 %v3037_v1, %v3034_v43 }
 0x2c2   : > { %v2032_v8 = vpop.permute.xlu2 %2031 }
 0x2c3   : > { %v3041_v35 = vrot.slane %v3039_v32, 3  ;;  %v3044_v10 = vrot.slane %v3042_v46, 4  ;;  %v1876_v38 = vpop.permute.xlu0 %1875  ;;  %v2690_v46 = vpack.c.b16 %v2672_v52, %v2672_v52 }
 0x2c4   : > { %v1954_v9 = vadd.f32 %v1876_v38, %v5625_v12 }
 0x2c5   : > { %v3045_v57 = vor.u32 %v3044_v10, %v3041_v35 }
 0x2c6   : > { %v2084_v39 = vadd.f32 %v2006_v4, %v1954_v9 }
 0x2c7   : > { %v2004_v49 = vpop.permute.xlu1 %2003  ;;  %v3046_v56 = vsel %vm1360_vm10, %v3038_v20, %v3045_v57 }
 0x2c8   : > { %v2083_v47 = vadd.f32 %v2004_v49, %v1953_v31  ;;  %v2119_v30 = vadd.f32 %v5986_v45, %v2084_v39  ;;  %v2727_v39 = vrot.slane %v2690_v46, 5 }
 0x2c9   : > { %4175 = vmatmul.msk.bf16.gmra.mxu1 %vm1655_vm11, %v3046_v56 }
 0x2ca   : > { %v2118_v63 = vadd.f32 %v5986_v45, %v2083_v47  ;;  %v2151_v23 = vmax.f32 %v2119_v30, 0.0 }
 0x2cb   : > { %v1902_v6 = vpop.permute.xlu0 %1901 }
 0x2cc   : > { %v2150_v29 = vmax.f32 %v2118_v63, 0.0  ;;  %v2183_v21 = vpack.c.bf16 %v2151_v23, %v2151_v23  ;;  %v1967_v12 = vadd.f32 %v1902_v6, %v5623_v37  ;;  %v2420_v37 = vpack.c.b16 %v2371_v17, %v2371_v17  ;;  %v2776_v63 = vpop.permute.xlu2 %2775 }
 0x2ce   : > { %v2182_v13 = vpack.c.bf16 %v2150_v29, %v2150_v29  ;;  %2215 = vst.msk [vmem:[#allocation2 + $0x98] sm:$0xf] %vm387_vm0, %v2183_v21  ;;  %v2097_v4 = vadd.f32 %v2032_v8, %v1967_v12  ;;  %v4435_v21 = vld [vmem:[#allocation2 + $0x50] sm:$0x8] }
 0x2cf   : > { %v2618_v41 = vpop.permute.xlu1 %2617  ;;  %v4436_v48 = vor.u32 %v5859_v18, %v4435_v21 }
 0x2d0   : > { %2214 = vst.msk [vmem:[#allocation2 + $0x94] sm:$0xf] %vm387_vm0, %v2182_v13  ;;  %v2132_v51 = vadd.f32 %v5986_v45, %v2097_v4  ;;  %v2847_v61 = vsel %vm1196_vm8, %v4432_v25, %v2618_v41  ;;  %v2849_v43 = vsel %vm1196_vm8, %v2420_v37, %v2618_v41  ;;  %v4439_v13 = vld [vmem:[#allocation2 + $0xc0] sm:$0x8]  ;;  %v2422_v4 = vpack.c.b16 %v2374_v0, %v2374_v0 }
 0x2d1   : > { %v2932_v5 = vsel %vm1287_vm9, %v2847_v61, %v2770_v2  ;;  %v4440_v18 = vor.u32 %v5848_v54, %v4439_v13 }
 0x2d2   : > { %v2164_v26 = vmax.f32 %v2132_v51, 0.0  ;;  %v3047_v40 = vshrl.u32 %v2932_v5, 16  ;;  %v3050_v16 = vshll.u32 %v2932_v5, 16 }
 0x2d3   : > { %v2772_v7 = vpop.permute.xlu0 %2771 }
 0x2d4   : > { %v2196_v1 = vpack.c.bf16 %v2164_v26, %v2164_v26  ;;  %v2934_v32 = vsel %vm1287_vm9, %v2849_v43, %v2772_v7  ;;  %v3049_v50 = vrot.slane %v3047_v40, 3  ;;  %v3052_v35 = vrot.slane %v3050_v16, 4  ;;  %v2802_v25 = vpop.permute.xlu2 %2801 }
 0x2d5   : > { %v3054_v10 = vshrl.u32 %v2934_v32, 16  ;;  %v3057_v38 = vshll.u32 %v2934_v32, 16  ;;  %v4443_v32 = vld [vmem:[#allocation2 + $0x60] sm:$0x8] }
 0x2d6   : > { %2228 = vst.msk [vmem:[#allocation2 + $0x104] sm:$0xf] %vm387_vm0, %v2196_v1  ;;  %v3053_v31 = vor.u32 %v3052_v35, %v3049_v50 }
 0x2d7   : > { %v6061_v14 = vld [vmem:[#allocation2 + $0x94] sm:$0xff]   ;;  %v3056_v2 = vrot.slane %v3054_v10, 3  ;;  %v3059_v20 = vrot.slane %v3057_v38, 4  ;;  %v1904_v49 = vpop.permute.xlu1 %1903 }
 0x2d8   : > { %v6063_v17 = vld [vmem:[#allocation2 + $0x90] sm:$0xf0]   ;;  %v2386_v57 = vunpack.c.h.b16 %v6061_v14  ;;  %v2726_v47 = vrot.slane %v6061_v14, 5  ;;  %v2538_v15 = vshrl.u32 %v6061_v14, 16  ;;  %v2541_v30 = vshll.u32 %v6061_v14, 16 }
 0x2d9   : > { %v3060_v9 = vor.u32 %v3059_v20, %v3056_v2  ;;  %v1968_v46 = vadd.f32 %v1904_v49, %v5647_v36  ;;  %v4444_v36 = vor.u32 %v5878_v19, %v4443_v32  ;;  %v2436_v49 = vpack.c.b16 %v2395_v24, %v2395_v24 }
 0x2da   : > { %2789 = vrot.lane.b32.xlu2 %v2726_v47, %s4683_s15  ;;  %v2728_v23 = vsel %vm1069_vm4, %v2726_v47, %v2727_v39  ;;  %v2540_v29 = vrot.slane %v2538_v15, 4  ;;  %v2543_v6 = vrot.slane %v2541_v30, 5  ;;  %v4447_v30 = vld [vmem:[#allocation2 + $0xd0] sm:$0x8] }
 0x2db   : > { %v3061_v56 = vsel %vm1360_vm10, %v3053_v31, %v3060_v9  ;;  %2791 = vrot.lane.b32.xlu0 %v2728_v23, %s4683_s15 }
 0x2dc   : > { %4176 = vmatmul.msk.bf16.gmra.mxu1 %vm1655_vm11, %v3061_v56  ;;  %v2544_v12 = vor.u32 %v2543_v6, %v2540_v29  ;;  %v2778_v9 = vpop.permute.xlu2 %2777 }
 0x2de   : > { %2627 = vrot.lane.b32.xlu1 %v2544_v12, %s4682_s1  ;;  %v2298_v12 = vld [vmem:[#allocation2 + $0x10c] sm:$0x1] }
 0x2e2   : > { %v2774_v8 = vpop.permute.xlu1 %2773 }
 0x2e4   : > { %v2806_v24 = vpop.permute.xlu2 %2805 }
 0x2e7   : > { %v2620_v41 = vpop.permute.xlu0 %2619 }
 0x2e8   : > { %v2852_v51 = vsel %vm1196_vm8, %v4436_v48, %v2620_v41  ;;  %v2854_v61 = vsel %vm1196_vm8, %v2422_v4, %v2620_v41  ;;  %v4451_v41 = vld [vmem:[#allocation2 + $0x70] sm:$0x8] }
 0x2e9   : > { %v2936_v52 = vsel %vm1287_vm9, %v2852_v51, %v2774_v8  ;;  %v2938_v37 = vsel %vm1287_vm9, %v2854_v61, %v2776_v63  ;;  %v2679_v51 = vunpack.c.l.b16 %v2298_v12  ;;  %v6099_v61 = vld [vmem:[#allocation2 + $0x114] sm:$0xff]  }
 0x2ea   : > { %v3062_v5 = vshrl.u32 %v2936_v52, 16  ;;  %v3065_v26 = vshll.u32 %v2936_v52, 16  ;;  %v3069_v40 = vshrl.u32 %v2938_v37, 16  ;;  %v3072_v16 = vshll.u32 %v2938_v37, 16  ;;  %v2634_v43 = vpop.permute.xlu1 %2633  ;;  %v6101_v52 = vld [vmem:[#allocation2 + $0x110] sm:$0xf0]  }
 0x2eb   : > { %v2887_v50 = vsel %vm1196_vm8, %v4440_v18, %v2634_v43  ;;  %v2889_v29 = vsel %vm1196_vm8, %v2436_v49, %v2634_v43 }
 0x2ec   : > { %v3064_v34 = vrot.slane %v3062_v5, 3  ;;  %v3067_v7 = vrot.slane %v3065_v26, 4  ;;  %v3071_v0 = vrot.slane %v3069_v40, 3  ;;  %v3074_v1 = vrot.slane %v3072_v16, 4  ;;  %v2302_v40 = vld [vmem:[#allocation2 + $0x11c] sm:$0x1] }
 0x2ed   : > { %v2964_v31 = vsel %vm1287_vm9, %v2887_v50, %v2802_v25  ;;  %v4448_v26 = vor.u32 %v5882_v33, %v4447_v30  ;;  %v2424_v16 = vpack.c.b16 %v2377_v22, %v2377_v22  ;;  %v6113_v50 = vld [vmem:[#allocation2 + $0x100] sm:$0xf0]   ;;  %v2697_v33 = vpack.c.b16 %v2679_v51, %v2679_v51 }
 0x2ee   : > { %v3068_v35 = vor.u32 %v3067_v7, %v3064_v34  ;;  %v3075_v10 = vor.u32 %v3074_v1, %v3071_v0  ;;  %v3167_v56 = vshrl.u32 %v2964_v31, 16  ;;  %v3170_v15 = vshll.u32 %v2964_v31, 16 }
 0x2ef   : > { %v2034_v38 = vpop.permute.xlu0 %2033  ;;  %v2410_v7 = vunpack.c.h.b16 %v6099_v61  ;;  %v2680_v11 = vunpack.c.l.b16 %v2302_v40  ;;  %v2748_v49 = vrot.slane %v2697_v33, 5  ;;  %v4452_v30 = vor.u32 %v5909_v53, %v4451_v41 }
 0x2f0   : > { %v2098_v2 = vadd.f32 %v2034_v38, %v1968_v46  ;;  %v3076_v20 = vsel %vm1360_vm10, %v3068_v35, %v3075_v10  ;;  %v3169_v21 = vrot.slane %v3167_v56, 3  ;;  %v3172_v8 = vrot.slane %v3170_v15, 4  ;;  %v6115_v35 = vld [vmem:[#allocation2 + $0xe0] sm:$0x8] }
 0x2f1   : > { %4177 = vmatmul.msk.bf16.gmra.mxu1 %vm1655_vm11, %v3076_v20  ;;  %v2750_v51 = vrot.slane %v6099_v61, 5  ;;  %v6887_v33 = vunpack.c.h.b16 %v5907_v62 }
 0x2f2   : > { %v2133_v54 = vadd.f32 %v5986_v45, %v2098_v2  ;;  %v2622_v39 = vpop.permute.xlu1 %2621  ;;  %v3173_v43 = vor.u32 %v3172_v8, %v3169_v21 }
 0x2f3   : > { %v2857_v23 = vsel %vm1196_vm8, %v4444_v36, %v2622_v39  ;;  %v2859_v0 = vsel %vm1196_vm8, %v2424_v16, %v2622_v39 }
 0x2f4   : > { %v2165_v47 = vmax.f32 %v2133_v54, 0.0  ;;  %v2940_v19 = vsel %vm1287_vm9, %v2857_v23, %v2778_v9  ;;  %v6886_v54 = vunpack.c.h.b16 %v5880_v27  ;;  %v2698_v23 = vpack.c.b16 %v2680_v11, %v2680_v11 }
 0x2f5   : > { %v3077_v37 = vshrl.u32 %v2940_v19, 16  ;;  %v3080_v5 = vshll.u32 %v2940_v19, 16  ;;  %v2602_v19 = vshrl.u32 %v6099_v61, 16  ;;  %v2426_v11 = vpack.c.b16 %v6887_v33, %v6887_v33 }
 0x2f6   : > { %v2197_v63 = vpack.c.bf16 %v2165_v47, %v2165_v47  ;;  %v2438_v39 = vpack.c.b16 %v6886_v54, %v6886_v54 }
 0x2f7   : > { %v2804_v6 = vpop.permute.xlu0 %2803  ;;  %v3079_v22 = vrot.slane %v3077_v37, 3  ;;  %v3082_v10 = vrot.slane %v3080_v5, 4  ;;  %v2751_v37 = vrot.slane %v2698_v23, 5 }
 0x2f8   : > { %2229 = vst.msk [vmem:[#allocation2 + $0x108] sm:$0xf] %vm387_vm0, %v2197_v63  ;;  %v2966_v45 = vsel %vm1287_vm9, %v2889_v29, %v2804_v6  ;;  %v2782_v29 = vpop.permute.xlu2 %2781 }
 0x2f9   : > { %v3174_v42 = vshrl.u32 %v2966_v45, 16  ;;  %v3177_v13 = vshll.u32 %v2966_v45, 16  ;;  %v3083_v63 = vor.u32 %v3082_v10, %v3079_v22  ;;  %v2604_v22 = vrot.slane %v2602_v19, 4 }
 0x2fa   : > { %v2636_v25 = vpop.permute.xlu1 %2635 }
 0x2fb   : > { %v3176_v48 = vrot.slane %v3174_v42, 3  ;;  %v3179_v4 = vrot.slane %v3177_v13, 4  ;;  %v2892_v34 = vsel %vm1196_vm8, %v4448_v26, %v2636_v25  ;;  %v2894_v27 = vsel %vm1196_vm8, %v2438_v39, %v2636_v25  ;;  %v4459_v39 = vld [vmem:[#allocation2 + $0x80] sm:$0x8] }
 0x2fc   : > { %v2968_v2 = vsel %vm1287_vm9, %v2892_v34, %v2806_v24  ;;  %v2605_v42 = vshll.u32 %v6099_v61, 16 }
 0x2fd   : > { %v3180_v18 = vor.u32 %v3179_v4, %v3176_v48  ;;  %v3182_v15 = vshrl.u32 %v2968_v2, 16  ;;  %v3185_v6 = vshll.u32 %v2968_v2, 16 }
 0x2fe   : > { %v2607_v10 = vrot.slane %v2605_v42, 5 }
 0x2ff   : > { %v2780_v1 = vpop.permute.xlu0 %2779  ;;  %v3181_v32 = vsel %vm1360_vm10, %v3173_v43, %v3180_v18  ;;  %v6111_v46 = vld [vmem:[#allocation2 + $0x104] sm:$0xff]   ;;  %v3184_v5 = vrot.slane %v3182_v15, 3  ;;  %v3187_v26 = vrot.slane %v3185_v6, 4 }
 0x300   : > { %v2942_v38 = vsel %vm1287_vm9, %v2859_v0, %v2780_v1  ;;  %4184 = vmatmul.msk.bf16.gmra.mxu2 %vm1655_vm11, %v3181_v32  ;;  %v2407_v31 = vunpack.c.h.b16 %v6111_v46  ;;  %v2747_v45 = vrot.slane %v6111_v46, 5  ;;  %v2594_v12 = vshrl.u32 %v6111_v46, 16 }
 0x301   : > { %v3084_v20 = vshrl.u32 %v2942_v38, 16  ;;  %v3087_v9 = vshll.u32 %v2942_v38, 16  ;;  %v2597_v8 = vshll.u32 %v6111_v46, 16  ;;  %v4456_v1 = vor.u32 %v5915_v55, %v6115_v35 }
 0x302   : > { %v2624_v36 = vpop.permute.xlu1 %2623  ;;  %2817 = vrot.lane.b32.xlu2 %v2747_v45, %s4683_s15  ;;  %v2749_v53 = vsel %vm1069_vm4, %v2747_v45, %v2748_v49  ;;  %v2596_v4 = vrot.slane %v2594_v12, 4  ;;  %v2752_v38 = vsel %vm1069_vm4, %v2750_v51, %v2751_v37  ;;  %v3188_v54 = vor.u32 %v3187_v26, %v3184_v5  ;;  %v6155_v45 = vpop.f32.mrf.mxu1 }
 0x303   : > { %v3086_v56 = vrot.slane %v3084_v20, 3  ;;  %v3089_v47 = vrot.slane %v3087_v9, 4  ;;  %v2862_v13 = vsel %vm1196_vm8, %v4452_v30, %v2624_v36  ;;  %2819 = vrot.lane.b32.xlu0 %v2749_v53, %s4683_s15  ;;  %v2599_v41 = vrot.slane %v2597_v8, 5 }
 0x304   : > { %v2944_v18 = vsel %vm1287_vm9, %v2862_v13, %v2782_v29  ;;  %v2608_v15 = vor.u32 %v2607_v10, %v2604_v22  ;;  %v6888_v12 = vunpack.c.h.b16 %v5913_v28  ;;  %v4460_v8 = vor.u32 %v5938_v60, %v4459_v39 }
 0x305   : > { %v3090_v21 = vor.u32 %v3089_v47, %v3086_v56  ;;  %v2600_v43 = vor.u32 %v2599_v41, %v2596_v4  ;;  %v3092_v2 = vshrl.u32 %v2944_v18, 16  ;;  %v3095_v20 = vshll.u32 %v2944_v18, 16  ;;  %v2810_v56 = vpop.permute.xlu2 %2809 }
 0x306   : > { %v2864_v47 = vsel %vm1196_vm8, %v2426_v11, %v2624_v36 }
 0x307   : > { %v2808_v24 = vpop.permute.xlu0 %2807  ;;  %v3091_v48 = vsel %vm1360_vm10, %v3083_v63, %v3090_v21  ;;  %2641 = vrot.lane.b32.xlu1 %v2600_v43, %s4682_s1  ;;  %v3094_v30 = vrot.slane %v3092_v2, 3  ;;  %v3097_v63 = vrot.slane %v3095_v20, 4  ;;  %v6889_v43 = vunpack.c.h.b16 %v5936_v3 }
 0x308   : > { %v2970_v25 = vsel %vm1287_vm9, %v2894_v27, %v2808_v24  ;;  %4178 = vmatmul.msk.bf16.gmra.mxu1 %vm1655_vm11, %v3091_v48  ;;  %v2440_v27 = vpack.c.b16 %v6888_v12, %v6888_v12 }
 0x309   : > { %v3189_v40 = vshrl.u32 %v2970_v25, 16  ;;  %v3192_v16 = vshll.u32 %v2970_v25, 16  ;;  %v3098_v24 = vor.u32 %v3097_v63, %v3094_v30 }
 0x30a   : > { %v2638_v32 = vpop.permute.xlu1 %2637  ;;  %2821 = vrot.lane.b32.xlu2 %v2750_v51, %s4683_s15  ;;  %v6171_v11 = vpop.f32.mrf.mxu1 }
 0x30b   : > { %v3191_v34 = vrot.slane %v3189_v40, 3  ;;  %v3194_v0 = vrot.slane %v3192_v16, 4  ;;  %v2897_v55 = vsel %vm1196_vm8, %v4456_v1, %v2638_v32  ;;  %2823 = vrot.lane.b32.xlu0 %v2752_v38, %s4683_s15  ;;  %v2899_v48 = vsel %vm1196_vm8, %v2440_v27, %v2638_v32  ;;  %s4010_s15 = scalar_lea.sflag [#allocation5], %s4835_s24 }
 0x30c   : > { %v2972_v36 = vsel %vm1287_vm9, %v2897_v55, %v2810_v56 }
 0x30d   : > { %v3195_v9 = vor.u32 %v3194_v0, %v3191_v34  ;;  %v3197_v42 = vshrl.u32 %v2972_v36, 16  ;;  %v3200_v13 = vshll.u32 %v2972_v36, 16  ;;  %v2786_v51 = vpop.permute.xlu2 %2785  ;;  %v2428_v34 = vpack.c.b16 %v6889_v43, %v6889_v43 }
 0x30f   : > { %v2784_v35 = vpop.permute.xlu0 %2783  ;;  %v3196_v62 = vsel %vm1360_vm10, %v3188_v54, %v3195_v9  ;;  %2643 = vrot.lane.b32.xlu1 %v2608_v15, %s4682_s1  ;;  %v3199_v60 = vrot.slane %v3197_v42, 3  ;;  %v3202_v37 = vrot.slane %v3200_v13, 4  ;;  %s4024_s1 = sshll.u32 %s4021_s28, 4  ;;  %s4025_s1 = int_to_ptr.hbm [resolvable:$true] %s4024_s1 }
 0x310   : > { %v2946_v49 = vsel %vm1287_vm9, %v2864_v47, %v2784_v35  ;;  %4185 = vmatmul.msk.bf16.gmra.mxu2 %vm1655_vm11, %v3196_v62 }
 0x311   : > { %v3099_v23 = vshrl.u32 %v2946_v49, 16  ;;  %v3102_v29 = vshll.u32 %v2946_v49, 16  ;;  %v3203_v33 = vor.u32 %v3202_v37, %v3199_v60  ;;  %v4463_v49 = vld [vmem:[#allocation2 + $0xf0] sm:$0x8] }
 0x312   : > { %v2626_v19 = vpop.permute.xlu1 %2625  ;;  %v4464_v63 = vor.u32 %v6017_v44, %v4463_v49  ;;  %v4467_v37 = vld [vmem:[#allocation2 + $0x90] sm:$0x8] }
 0x313   : > { %v3101_v6 = vrot.slane %v3099_v23, 3  ;;  %v3104_v21 = vrot.slane %v3102_v29, 4  ;;  %v2867_v4 = vsel %vm1196_vm8, %v4460_v8, %v2626_v19  ;;  %v2869_v22 = vsel %vm1196_vm8, %v2428_v34, %v2626_v19 }
 0x314   : > { %v2948_v40 = vsel %vm1287_vm9, %v2867_v4, %v2786_v51  ;;  %v2442_v23 = vpack.c.b16 %v2404_v58, %v2404_v58 }
 0x315   : > { %v3105_v53 = vor.u32 %v3104_v21, %v3101_v6  ;;  %v3107_v0 = vshrl.u32 %v2948_v40, 16  ;;  %v3110_v1 = vshll.u32 %v2948_v40, 16  ;;  %v2814_v36 = vpop.permute.xlu2 %2813  ;;  %v4468_v40 = vor.u32 %v6063_v17, %v4467_v37 }
 0x317   : > { %v2812_v25 = vpop.permute.xlu0 %2811  ;;  %v3106_v41 = vsel %vm1360_vm10, %v3098_v24, %v3105_v53  ;;  %v3109_v20 = vrot.slane %v3107_v0, 3  ;;  %v3112_v9 = vrot.slane %v3110_v1, 4 }
 0x318   : > { %v2974_v28 = vsel %vm1287_vm9, %v2899_v48, %v2812_v25  ;;  %4179 = vmatmul.msk.bf16.gmra.mxu1 %vm1655_vm11, %v3106_v41 }
 0x319   : > { %v3204_v5 = vshrl.u32 %v2974_v28, 16  ;;  %v3207_v26 = vshll.u32 %v2974_v28, 16  ;;  %v3113_v55 = vor.u32 %v3112_v9, %v3109_v20 }
 0x31b   : > { %v3206_v16 = vrot.slane %v3204_v5, 3  ;;  %v3209_v18 = vrot.slane %v3207_v26, 4 }
 0x31d   : > { %v3210_v32 = vor.u32 %v3209_v18, %v3206_v16  ;;  %v2430_v16 = vpack.c.b16 %v2386_v57, %v2386_v57 }
 0x31f   : > { %v2788_v10 = vpop.permute.xlu0 %2787  ;;  %v3211_v38 = vsel %vm1360_vm10, %v3203_v33, %v3210_v32 }
 0x320   : > { %v2950_v2 = vsel %vm1287_vm9, %v2869_v22, %v2788_v10  ;;  %4186 = vmatmul.msk.bf16.gmra.mxu2 %vm1655_vm11, %v3211_v38 }
 0x321   : > { %v3114_v3 = vshrl.u32 %v2950_v2, 16  ;;  %v3117_v54 = vshll.u32 %v2950_v2, 16 }
 0x323   : > { %v3116_v39 = vrot.slane %v3114_v3, 3  ;;  %v3119_v56 = vrot.slane %v3117_v54, 4 }
 0x325   : > { %v3120_v47 = vor.u32 %v3119_v56, %v3116_v39 }
 0x326   : > { %v6177_v35 = vpop.f32.mrf.mxu1 }
 0x327   : > { %3466 = vrot.lane.b32.xlu1 %v6177_v35, %s4684_s20  ;;  %v3121_v62 = vsel %vm1360_vm10, %v3113_v55, %v3120_v47  ;;  %v4471_v47 = vld [vmem:[#allocation2 + $0x100] sm:$0x8] }
 0x328   : > { %4180 = vmatmul.msk.bf16.gmra.mxu1 %vm1655_vm11, %v3121_v62  ;;  %v4475_v62 = vld [vmem:[#allocation2 + $0x110] sm:$0x8] }
 0x329   : > { %v4476_v46 = vor.u32 %v6101_v52, %v4475_v62 }
 0x32d   : > { %v2816_v6 = vpop.permute.xlu0 %2815 }
 0x32e   : > { %v6183_v15 = vpop.f32.mrf.mxu1 }
 0x331   : > { %v6185_v30 = vpop.f32.mrf.mxu2  ;;  %v2640_v29 = vpop.permute.xlu1 %2639 }
 0x332   : > { %3502 = vrot.lane.b32.xlu0 %v6185_v30, %s4684_s20  ;;  %3628 = vrot.lane.b32.xlu2 %v6185_v30, %s4685_s29  ;;  %v2902_v21 = vsel %vm1196_vm8, %v4464_v63, %v2640_v29  ;;  %v2904_v12 = vsel %vm1196_vm8, %v2442_v23, %v2640_v29  ;;  %v4472_v63 = vor.u32 %v6113_v50, %v4471_v47 }
 0x333   : > { %v2976_v27 = vsel %vm1287_vm9, %v2902_v21, %v2814_v36  ;;  %v2978_v8 = vsel %vm1287_vm9, %v2904_v12, %v2816_v6  ;;  %v2444_v23 = vpack.c.b16 %v2407_v31, %v2407_v31  ;;  %v2446_v31 = vpack.c.b16 %v2410_v7, %v2410_v7 }
 0x334   : > { %v3212_v19 = vshrl.u32 %v2976_v27, 16  ;;  %v3215_v42 = vshll.u32 %v2976_v27, 16  ;;  %v3219_v13 = vshrl.u32 %v2978_v8, 16  ;;  %v3222_v53 = vshll.u32 %v2978_v8, 16  ;;  %v2790_v43 = vpop.permute.xlu2 %2789 }
 0x336   : > { %v6199_v44 = vpop.f32.mrf.mxu1  ;;  %v3214_v58 = vrot.slane %v3212_v19, 3  ;;  %v3217_v24 = vrot.slane %v3215_v42, 4  ;;  %v3221_v48 = vrot.slane %v3219_v13, 3  ;;  %v3224_v4 = vrot.slane %v3222_v53, 4 }
 0x338   : > { %v3218_v25 = vor.u32 %v3217_v24, %v3214_v58  ;;  %v3225_v41 = vor.u32 %v3224_v4, %v3221_v48 }
 0x339   : > { %v6201_v59 = vpop.f32.mrf.mxu2 }
 0x33a   : > { %3470 = vrot.lane.b32.xlu0 %v6199_v44, %s4684_s20  ;;  %3468 = vrot.lane.b32.xlu2 %v6183_v15, %s4684_s20  ;;  %v3226_v28 = vsel %vm1360_vm10, %v3218_v25, %v3225_v41 }
 0x33b   : > { %3630 = vrot.lane.b32.xlu1 %v6201_v59, %s4685_s29  ;;  %4187 = vmatmul.msk.bf16.gmra.mxu2 %vm1655_vm11, %v3226_v28 }
 0x33e   : > { %v6219_v60 = vpop.f32.mrf.mxu1 }
 0x342   : > { %3504 = vrot.lane.b32.xlu2 %v6201_v59, %s4684_s20 }
 0x343   : > { %3596 = vrot.lane.b32.xlu1 %v6199_v44, %s4685_s29  ;;  %v6215_v51 = vpop.f32.mrf.mxu2 }
 0x344   : > { %3632 = vrot.lane.b32.xlu0 %v6215_v51, %s4685_s29 }
 0x346   : > { %v6227_v5 = vpop.f32.mrf.mxu1 }
 0x34a   : > { %3598 = vrot.lane.b32.xlu2 %v6219_v60, %s4685_s29 }
 0x34b   : > { %3506 = vrot.lane.b32.xlu1 %v6215_v51, %s4684_s20  ;;  %v6229_v26 = vpop.f32.mrf.mxu2 }
 0x34c   : > { %3472 = vrot.lane.b32.xlu0 %v6219_v60, %s4684_s20 }
 0x34d   : > { %v2792_v34 = vpop.permute.xlu0 %2791 }
 0x34e   : > { %v6247_v9 = vpop.f32.mrf.mxu1 }
 0x350   : > { %v2628_v18 = vpop.permute.xlu1 %2627 }
 0x351   : > { %v2872_v0 = vsel %vm1196_vm8, %v4468_v40, %v2628_v18  ;;  %v2874_v1 = vsel %vm1196_vm8, %v2430_v16, %v2628_v18 }
 0x352   : > { %3634 = vrot.lane.b32.xlu2 %v6229_v26, %s4685_s29  ;;  %v2952_v32 = vsel %vm1287_vm9, %v2872_v0, %v2790_v43  ;;  %v2954_v33 = vsel %vm1287_vm9, %v2874_v1, %v2792_v34 }
 0x353   : > { %3600 = vrot.lane.b32.xlu1 %v6227_v5, %s4685_s29  ;;  %v3122_v22 = vshrl.u32 %v2952_v32, 16  ;;  %v3125_v17 = vshll.u32 %v2952_v32, 16  ;;  %v3129_v10 = vshrl.u32 %v2954_v33, 16  ;;  %v3132_v14 = vshll.u32 %v2954_v33, 16 }
 0x354   : > { %3508 = vrot.lane.b32.xlu0 %v6229_v26, %s4684_s20 }
 0x355   : > { %v3124_v38 = vrot.slane %v3122_v22, 3  ;;  %v3127_v57 = vrot.slane %v3125_v17, 4  ;;  %v3131_v2 = vrot.slane %v3129_v10, 3  ;;  %v3134_v20 = vrot.slane %v3132_v14, 4 }
 0x357   : > { %v3128_v3 = vor.u32 %v3127_v57, %v3124_v38  ;;  %v3135_v54 = vor.u32 %v3134_v20, %v3131_v2 }
 0x359   : > { %v3136_v39 = vsel %vm1360_vm10, %v3128_v3, %v3135_v54  ;;  %v6253_v56 = vpop.f32.mrf.mxu1 }
 0x35a   : > { %3474 = vrot.lane.b32.xlu2 %v6227_v5, %s4684_s20  ;;  %4181 = vmatmul.msk.bf16.gmra.mxu1 %vm1655_vm11, %v3136_v39 }
 0x35c   : > { %3602 = vrot.lane.b32.xlu0 %v6247_v9, %s4685_s29  ;;  %v2818_v55 = vpop.permute.xlu2 %2817 }
 0x361   : > { %v6259_v36 = vpop.f32.mrf.mxu1 }
 0x364   : > { %v2822_v50 = vpop.permute.xlu2 %2821 }
 0x36e   : > { %v6275_v37 = vpop.f32.mrf.mxu1 }
 0x375   : > { %v2820_v49 = vpop.permute.xlu0 %2819 }
 0x376   : > { %v6293_v38 = vpop.f32.mrf.mxu1 }
 0x379   : > { %v2642_v29 = vpop.permute.xlu1 %2641 }
 0x37a   : > { %v2907_v6 = vsel %vm1196_vm8, %v4472_v63, %v2642_v29  ;;  %v2909_v21 = vsel %vm1196_vm8, %v2444_v23, %v2642_v29 }
 0x37b   : > { %v2980_v12 = vsel %vm1287_vm9, %v2907_v6, %v2818_v55  ;;  %v2982_v27 = vsel %vm1287_vm9, %v2909_v21, %v2820_v49 }
 0x37c   : > { %v3227_v8 = vshrl.u32 %v2980_v12, 16  ;;  %v3230_v19 = vshll.u32 %v2980_v12, 16  ;;  %v3234_v42 = vshrl.u32 %v2982_v27, 16  ;;  %v3237_v13 = vshll.u32 %v2982_v27, 16 }
 0x37d   : > { %v2824_v28 = vpop.permute.xlu0 %2823 }
 0x37e   : > { %v3229_v53 = vrot.slane %v3227_v8, 3  ;;  %v3232_v58 = vrot.slane %v3230_v19, 4  ;;  %v3236_v24 = vrot.slane %v3234_v42, 3  ;;  %v3239_v48 = vrot.slane %v3237_v13, 4 }
 0x380   : > { %v3233_v25 = vor.u32 %v3232_v58, %v3229_v53  ;;  %v3240_v41 = vor.u32 %v3239_v48, %v3236_v24 }
 0x381   : > { %v2644_v52 = vpop.permute.xlu1 %2643 }
 0x382   : > { %v3241_v61 = vsel %vm1360_vm10, %v3233_v25, %v3240_v41  ;;  %v2912_v7 = vsel %vm1196_vm8, %v4476_v46, %v2644_v52  ;;  %v2914_v40 = vsel %vm1196_vm8, %v2446_v31, %v2644_v52 }
 0x383   : > { %v6269_v4 = vpop.f32.mrf.mxu2  ;;  %4188 = vmatmul.msk.bf16.gmra.mxu2 %vm1655_vm11, %v3241_v61  ;;  %v2984_v16 = vsel %vm1287_vm9, %v2912_v7, %v2822_v50  ;;  %v2986_v18 = vsel %vm1287_vm9, %v2914_v40, %v2824_v28 }
 0x384   : > { %3510 = vrot.lane.b32.xlu2 %v6269_v4, %s4684_s20  ;;  %3636 = vrot.lane.b32.xlu1 %v6269_v4, %s4685_s29  ;;  %v3242_v43 = vshrl.u32 %v2984_v16, 16  ;;  %v3245_v34 = vshll.u32 %v2984_v16, 16  ;;  %v3249_v0 = vshrl.u32 %v2986_v18, 16  ;;  %v3252_v1 = vshll.u32 %v2986_v18, 16 }
 0x385   : > { %v6305_v39 = vpop.f32.mrf.mxu1 }
 0x386   : > { %v3244_v22 = vrot.slane %v3242_v43, 3  ;;  %v3247_v17 = vrot.slane %v3245_v34, 4  ;;  %v3251_v10 = vrot.slane %v3249_v0, 3  ;;  %v3254_v14 = vrot.slane %v3252_v1, 4 }
 0x388   : > { %v3255_v57 = vor.u32 %v3254_v14, %v3251_v10  ;;  %v3248_v2 = vor.u32 %v3247_v17, %v3244_v22 }
 0x38a   : > { %v3256_v54 = vsel %vm1360_vm10, %v3248_v2, %v3255_v57 }
 0x38b   : > { %v6283_v32 = vpop.f32.mrf.mxu2 }
 0x38c   : > { %v6285_v33 = vpop.permute.xlu2 %3628  ;;  %3604 = vrot.lane.b32.xlu2 %v6253_v56, %s4685_s29  ;;  %3476 = vrot.lane.b32.xlu1 %v6247_v9, %s4684_s20 }
 0x38d   : > { %3638 = vrot.lane.b32.xlu0 %v6283_v32, %s4685_s29  ;;  %v6315_v62 = vpop.f32.mrf.mxu1 }
 0x393   : > { %v6295_v20 = vpop.f32.mrf.mxu2  ;;  %4189 = vmatmul.msk.bf16.gmra.mxu2 %vm1655_vm11, %v3256_v54 }
 0x394   : > { %v3469_v3 = vpop.permute.xlu2 %3468  ;;  %3512 = vrot.lane.b32.xlu1 %v6283_v32, %s4684_s20  ;;  %3640 = vrot.lane.b32.xlu2 %v6295_v20, %s4685_s29 }
 0x395   : > { %3478 = vrot.lane.b32.xlu0 %v6253_v56, %s4684_s20  ;;  %v3563_v49 = vadd.f32 %v3469_v3, %v6171_v11  ;;  %v6332_v11 = vpop.f32.mrf.mxu1 }
 0x399   : > { %v3467_v29 = vpop.permute.xlu1 %3466 }
 0x39a   : > { %v3562_v8 = vadd.f32 %v3467_v29, %v6155_v45 }
 0x39b   : > { %v6313_v55 = vpop.f32.mrf.mxu2 }
 0x39c   : > { %v3505_v47 = vpop.permute.xlu2 %3504  ;;  %3606 = vrot.lane.b32.xlu1 %v6259_v36, %s4685_s29  ;;  %3480 = vrot.lane.b32.xlu2 %v6259_v36, %s4684_s20 }
 0x39d   : > { %3514 = vrot.lane.b32.xlu0 %v6295_v20, %s4684_s20  ;;  %v6347_v50 = vpop.f32.mrf.mxu1 }
 0x3a3   : > { %v6326_v21 = vpop.f32.mrf.mxu2 }
 0x3a4   : > { %v3503_v63 = vpop.permute.xlu0 %3502  ;;  %v3599_v23 = vpop.permute.xlu2 %3598  ;;  %3516 = vrot.lane.b32.xlu2 %v6313_v55, %s4684_s20  ;;  %3642 = vrot.lane.b32.xlu1 %v6313_v55, %s4685_s29 }
 0x3a5   : > { %v6322_v6 = vadd.f32 %v3599_v23, %v3563_v49  ;;  %3608 = vrot.lane.b32.xlu0 %v6275_v37, %s4685_s29  ;;  %v6355_v31 = vpop.f32.mrf.mxu1 }
 0x3ab   : > { %v6387_v18 = vpop.f32.mrf.mxu2 }
 0x3ac   : > { %3610 = vrot.lane.b32.xlu2 %v6293_v38, %s4685_s29  ;;  %3482 = vrot.lane.b32.xlu1 %v6275_v37, %s4684_s20  ;;  %v3471_v27 = vpop.permute.xlu0 %3470  ;;  %v3635_v41 = vpop.permute.xlu2 %3634 }
 0x3ad   : > { %v6334_v12 = vpop.permute.xlu1 %3630  ;;  %3644 = vrot.lane.b32.xlu0 %v6326_v21, %s4685_s29  ;;  %v3564_v53 = vadd.f32 %v3471_v27, %v6177_v35  ;;  %v6366_v25 = vpop.f32.mrf.mxu1 }
 0x3b4   : > { %3486 = vrot.lane.b32.xlu2 %v6305_v39, %s4684_s20  ;;  %3518 = vrot.lane.b32.xlu1 %v6326_v21, %s4684_s20  ;;  %v6381_v61 = vpop.permute.xlu2 %3474 }
 0x3b5   : > { %v3597_v19 = vpop.permute.xlu1 %3596  ;;  %3484 = vrot.lane.b32.xlu0 %v6293_v38, %s4684_s20 }
 0x3b6   : > { %v6345_v42 = vadd.f32 %v3597_v19, %v3562_v8  ;;  %v3633_v13 = vpop.permute.xlu0 %3632  ;;  %v3837_v8 = vld [vmem:[%s6857_s5 + $0x8] sm:$0xff] }
 0x3b7   : > { %3856 = vmatpush.msrb.mxu2 %v3837_v8 }
 0x3bc   : > { %3616 = vrot.lane.b32.xlu2 %v6332_v11, %s4685_s29  ;;  %3612 = vrot.lane.b32.xlu1 %v6305_v39, %s4685_s29 }
 0x3bd   : > { %v3507_v45 = vpop.permute.xlu1 %3506  ;;  %3614 = vrot.lane.b32.xlu0 %v6315_v62, %s4685_s29 }
 0x3be   : > { %v3473_v46 = vpop.permute.xlu0 %3472  ;;  %v6395_v22 = vpop.f32.mrf.mxu2  ;;  %v3582_v2 = vadd.f32 %v3507_v45, %v6185_v30 }
 0x3bf   : > { %v3565_v35 = vadd.f32 %v3473_v46, %v6183_v15 }
 0x3c4   : > { %3492 = vrot.lane.b32.xlu2 %v6347_v50, %s4684_s20  ;;  %3488 = vrot.lane.b32.xlu1 %v6315_v62, %s4684_s20 }
 0x3c5   : > { %v3601_v58 = vpop.permute.xlu1 %3600  ;;  %3490 = vrot.lane.b32.xlu0 %v6332_v11, %s4684_s20 }
 0x3c6   : > { %v6364_v24 = vadd.f32 %v3601_v58, %v3564_v53  ;;  %v3509_v48 = vpop.permute.xlu0 %3508  ;;  %v6406_v57 = vpop.f32.mrf.mxu2 }
 0x3cc   : > { %3622 = vrot.lane.b32.xlu2 %v6366_v25, %s4685_s29  ;;  %3618 = vrot.lane.b32.xlu1 %v6347_v50, %s4685_s29 }
 0x3cd   : > { %3620 = vrot.lane.b32.xlu0 %v6355_v31, %s4685_s29 }
 0x3ce   : > { %v3603_v28 = vpop.permute.xlu0 %3602 }
 0x3cf   : > { %v6375_v52 = vadd.f32 %v3603_v28, %v3565_v35 }
 0x3d4   : > { %3494 = vrot.lane.b32.xlu1 %v6355_v31, %s4684_s20 }
 0x3d5   : > { %3496 = vrot.lane.b32.xlu0 %v6366_v25, %s4684_s20 }
 0x3d7   : > { %v3389_v7 = vpop.f32.mrf.mxu1 }
 0x3d8   : > { %v3580_v40 = vadd.f32 %v3503_v63, %v3389_v7  ;;  %3498 = vrot.lane.b32.xlu2 %v3389_v7, %s4684_s20 }
 0x3da   : > { %v6385_v15 = vadd.f32 %v3633_v13, %v3580_v40 }
 0x3dc   : > { %3624 = vrot.lane.b32.xlu1 %v3389_v7, %s4685_s29 }
 0x3de   : > { %v3511_v16 = vpop.permute.xlu2 %3510 }
 0x3df   : > { %v3391_v43 = vpop.f32.mrf.mxu1  ;;  %v3584_v17 = vadd.f32 %v3511_v16, %v6215_v51  ;;  %v3583_v51 = vadd.f32 %v3509_v48, %v6201_v59 }
 0x3e0   : > { %v3581_v34 = vadd.f32 %v3505_v47, %v3391_v43  ;;  %3626 = vrot.lane.b32.xlu0 %v3391_v43, %s4685_s29  ;;  %3646 = vrot.lane.b32.xlu2 %v6387_v18, %s4685_s29 }
 0x3e2   : > { %v6393_v0 = vadd.f32 %v3635_v41, %v3581_v34 }
 0x3e4   : > { %3500 = vrot.lane.b32.xlu1 %v3391_v43, %s4684_s20 }
 0x3e6   : > { %v3605_v1 = vpop.permute.xlu2 %3604 }
 0x3e8   : > { %3520 = vrot.lane.b32.xlu0 %v6387_v18, %s4684_s20  ;;  %3522 = vrot.lane.b32.xlu2 %v6395_v22, %s4684_s20 }
 0x3ec   : > { %3648 = vrot.lane.b32.xlu1 %v6395_v22, %s4685_s29 }
 0x3ee   : > { %v3641_v10 = vpop.permute.xlu2 %3640 }
 0x3ef   : > { %v6404_v14 = vadd.f32 %v3641_v10, %v3584_v17 }
 0x3f0   : > { %3650 = vrot.lane.b32.xlu0 %v6406_v57, %s4685_s29 }
 0x3f4   : > { %3524 = vrot.lane.b32.xlu1 %v6406_v57, %s4684_s20 }
 0x3f6   : > { %v3637_v3 = vpop.permute.xlu1 %3636  ;;  %v3481_v13 = vpop.permute.xlu2 %3480 }
 0x3f7   : > { %v6413_v54 = vadd.f32 %v3637_v3, %v3582_v2  ;;  %v6440_v3 = vld [vmem:[%s6856_s4] ss:$0 sm:$0xff] }
 0x3fe   : > { %v3477_v47 = vpop.permute.xlu1 %3476  ;;  %v6428_v41 = vpop.permute.xlu2 %3516 }
 0x3ff   : > { %v3639_v49 = vpop.permute.xlu0 %3638 }
 0x400   : > { %v6416_v63 = vadd.f32 %v3639_v49, %v3583_v51  ;;  %v3566_v51 = vadd.f32 %v6381_v61, %v6199_v44 }
 0x402   : > { %v3696_v8 = vadd.f32 %v3605_v1, %v3566_v51 }
 0x406   : > { %v3513_v23 = vpop.permute.xlu1 %3512  ;;  %v3424_v27 = vpop.f32.mrf.mxu2 }
 0x407   : > { %v3479_v29 = vpop.permute.xlu0 %3478  ;;  %3526 = vrot.lane.b32.xlu0 %v3424_v27, %s4684_s20  ;;  %3652 = vrot.lane.b32.xlu2 %v3424_v27, %s4685_s29  ;;  %v3585_v45 = vadd.f32 %v3513_v23, %v6229_v26  ;;  %v3611_v43 = vpop.permute.xlu2 %3610  ;;  %v6450_v23 = vadd.f32 %v6440_v3, %v6322_v6  ;;  %v6454_v27 = vadd.f32 %v6440_v3, %v6364_v24 }
 0x408   : > { %v3568_v44 = vadd.f32 %v3479_v29, %v6227_v5 }
 0x409   : > { %v3762_v24 = vsel %vm1196_vm8, %v6454_v27, 0.0 }
 0x40e   : > { %v3607_v30 = vpop.permute.xlu1 %3606  ;;  %v3426_v59 = vpop.f32.mrf.mxu2 }
 0x40f   : > { %v3515_v19 = vpop.permute.xlu0 %3514  ;;  %3528 = vrot.lane.b32.xlu2 %v3426_v59, %s4684_s20  ;;  %3654 = vrot.lane.b32.xlu1 %v3426_v59, %s4685_s29  ;;  %v3487_v10 = vpop.permute.xlu2 %3486  ;;  %s4581_s20 = sshra.s32 %s4025_s1, 4  ;;  %s4582_s20 = int_to_ptr.hbm [resolvable:$true] %s4581_s20 }
 0x410   : > { %v3586_v35 = vadd.f32 %v3515_v19, %v6269_v4  ;;  %v6444_v4 = vadd.f32 %v6440_v3, %v6345_v42  ;;  %v3567_v19 = vadd.f32 %v3477_v47, %v6219_v60  ;;  %v6461_v42 = vadd.f32 %v6440_v3, %v6375_v52  ;;  %p4588_p11 = scmp.lt.s32.totalorder %s4582_s20, %s6861_s9 }
 0x411   : > { %v6469_v60 = vadd.f32 %v6440_v3, %v3696_v8 }
 0x412   : > { %v3759_v59 = vsel %vm1196_vm8, %v6444_v4, 0.0  ;;  %v3697_v61 = vadd.f32 %v3607_v30, %v3567_v19  ;;  %v3764_v52 = vsel %vm1196_vm8, %v6461_v42, 0.0 }
 0x413   : > { %v3766_v30 = vsel %vm1196_vm8, %v6469_v60, 0.0 }
 0x416   : > { %v3643_v46 = vpop.permute.xlu1 %3642  ;;  %v3429_v48 = vpop.f32.mrf.mxu2 }
 0x417   : > { %v3609_v53 = vpop.permute.xlu0 %3608  ;;  %v6426_v58 = vadd.f32 %v3643_v46, %v3585_v45  ;;  %3656 = vrot.lane.b32.xlu0 %v3429_v48, %s4685_s29  ;;  %v3617_v45 = vpop.permute.xlu2 %3616  ;;  %v3760_v46 = vsel %vm1196_vm8, %v6450_v23, 0.0  ;;  %v6474_v48 = vadd.f32 %v6440_v3, %v3697_v61 }
 0x418   : > { %v3698_v1 = vadd.f32 %v3609_v53, %v3568_v44  ;;  %v3761_v47 = vadd.f32 %v3760_v46, %v3759_v59 }
 0x419   : > { %v3768_v8 = vsel %vm1196_vm8, %v6474_v48, 0.0 }
 0x41a   : > { %v3763_v5 = vadd.f32 %v3762_v24, %v3761_v47  ;;  %v3572_v47 = vadd.f32 %v3487_v10, %v6275_v37 }
 0x41c   : > { %v3765_v53 = vadd.f32 %v3764_v52, %v3763_v5 }
 0x41e   : > { %v3483_v28 = vpop.permute.xlu1 %3482  ;;  %v3431_v16 = vpop.f32.mrf.mxu2  ;;  %v3767_v59 = vadd.f32 %v3766_v30, %v3765_v53 }
 0x41f   : > { %v3645_v7 = vpop.permute.xlu0 %3644  ;;  %3658 = vrot.lane.b32.xlu1 %v3431_v16, %s4685_s29  ;;  %v3570_v16 = vadd.f32 %v3483_v28, %v6253_v56  ;;  %v3493_v46 = vpop.permute.xlu2 %3492  ;;  %s4583_s29 = scalar_lea.hbm %s4582_s20, 256 }
 0x420   : > { %v6432_v40 = vadd.f32 %v3645_v7, %v3586_v35  ;;  %v3569_v35 = vadd.f32 %v3481_v13, %v6247_v9  ;;  %v6480_v7 = vadd.f32 %v6440_v3, %v3698_v1  ;;  %v3769_v61 = vadd.f32 %v3768_v8, %v3767_v59  ;;  %p4584_p1 = scmp.ne.s32.totalorder %s4582_s20, %s4583_s29  ;;  %p4589_p2 = scmp.lt.s32.totalorder %s4587_s17, %s4583_s29 }
 0x422   : > { %v3699_v51 = vadd.f32 %v3611_v43, %v3569_v35  ;;  %v3770_v44 = vsel %vm1196_vm8, %v6480_v7, 0.0  ;;  %v3702_v35 = vadd.f32 %v3617_v45, %v3572_v47  ;;  %p4585_p4 = pnand %p4584_p1, %p4805_p3  ;;  %p4590_p9 = por %p4589_p2, %p4588_p11 }
 0x423   : > { %v3771_v28 = vadd.f32 %v3770_v44, %v3769_v61 }
 0x424   : > { %v6488_v9 = vadd.f32 %v6440_v3, %v3699_v51  ;;  %p4586_p8 = pneg %p4585_p4 }
 0x426   : > { %v6435_v26 = vpop.permute.xlu1 %3518  ;;  %p4591_p10 = pnand %p4590_p9, %p4586_p8 }
 0x427   : > { %v3485_v34 = vpop.permute.xlu0 %3484  ;;  %v3623_v53 = vpop.permute.xlu2 %3622 }
 0x428   : > { %v3571_v13 = vadd.f32 %v3485_v34, %v6259_v36 }
 0x42e   : > { %v3613_v17 = vpop.permute.xlu1 %3612 }
 0x42f   : > { %v3615_v2 = vpop.permute.xlu0 %3614  ;;  %v3700_v19 = vadd.f32 %v3613_v17, %v3570_v16  ;;  %v3772_v17 = vsel %vm1196_vm8, %v6488_v9, 0.0 }
 0x430   : > { %v3701_v1 = vadd.f32 %v3615_v2, %v3571_v13  ;;  %v3773_v30 = vadd.f32 %v3772_v17, %v3771_v28  ;;  %v6504_v2 = vadd.f32 %v6440_v3, %v3702_v35 }
 0x431   : > { %v6492_v56 = vadd.f32 %v6440_v3, %v3700_v19  ;;  %v3575_v19 = vadd.f32 %v3493_v46, %v6315_v62 }
 0x432   : > { %v6501_v36 = vadd.f32 %v6440_v3, %v3701_v1  ;;  %v3499_v1 = vpop.permute.xlu2 %3498 }
 0x433   : > { %v3774_v52 = vsel %vm1196_vm8, %v6492_v56, 0.0 }
 0x434   : > { %v3775_v16 = vadd.f32 %v3774_v52, %v3773_v30  ;;  %v3776_v37 = vsel %vm1196_vm8, %v6501_v36, 0.0 }
 0x436   : > { %v3489_v49 = vpop.permute.xlu1 %3488 }
 0x437   : > { %v3491_v6 = vpop.permute.xlu0 %3490  ;;  %v3573_v5 = vadd.f32 %v3489_v49, %v6293_v38  ;;  %v3777_v38 = vadd.f32 %v3776_v37, %v3775_v16 }
 0x438   : > { %v3574_v10 = vadd.f32 %v3491_v6, %v6305_v39  ;;  %v3836_v39 = vld [vmem:[%s6857_s5] sm:$0xff]  ;;  %v3705_v6 = vadd.f32 %v3623_v53, %v3575_v19 }
 0x439   : > { %3857 = vmatpush.msrb.mxu2 %v3836_v39 }
 0x43a   : > { %v6526_v47 = vadd.f32 %v6440_v3, %v3705_v6  ;;  %v6570_v6 = vadd.f32 %v6440_v3, %v6413_v54 }
 0x43c   : > { %v3784_v35 = vsel %vm1196_vm8, %v6526_v47, 0.0 }
 0x43e   : > { %v3619_v29 = vpop.permute.xlu1 %3618 }
 0x43f   : > { %v3621_v24 = vpop.permute.xlu0 %3620  ;;  %v3703_v34 = vadd.f32 %v3619_v29, %v3573_v5  ;;  %v3778_v29 = vsel %vm1196_vm8, %v6504_v2, 0.0 }
 0x440   : > { %v3704_v45 = vadd.f32 %v3621_v24, %v3574_v10  ;;  %v3779_v61 = vadd.f32 %v3778_v29, %v3777_v38 }
 0x441   : > { %v6510_v8 = vadd.f32 %v6440_v3, %v3703_v34 }
 0x442   : > { %v6522_v13 = vadd.f32 %v6440_v3, %v3704_v45 }
 0x443   : > { %v3780_v59 = vsel %vm1196_vm8, %v6510_v8, 0.0 }
 0x444   : > { %v3781_v62 = vadd.f32 %v3780_v59, %v3779_v61 }
 0x446   : > { %v3495_v43 = vpop.permute.xlu1 %3494 }
 0x447   : > { %v3497_v51 = vpop.permute.xlu0 %3496  ;;  %v3576_v44 = vadd.f32 %v3495_v43, %v6332_v11  ;;  %v3578_v11 = vadd.f32 %v3499_v1, %v6355_v31  ;;  %v3782_v43 = vsel %vm1196_vm8, %v6522_v13, 0.0  ;;  %v6576_v1 = vadd.f32 %v6440_v3, %v6416_v63 }
 0x448   : > { %v3577_v24 = vadd.f32 %v3497_v51, %v6347_v50  ;;  %v3783_v5 = vadd.f32 %v3782_v43, %v3781_v62  ;;  %v3647_v62 = vpop.permute.xlu2 %3646 }
 0x449   : > { %v3708_v34 = vadd.f32 %v6285_v33, %v3578_v11  ;;  %v3800_v54 = vsel %vm1196_vm8, %v6576_v1, 0.0 }
 0x44a   : > { %v3785_v53 = vadd.f32 %v3784_v35, %v3783_v5  ;;  %v6588_v5 = vadd.f32 %v6440_v3, %v6426_v58  ;;  %v3587_v35 = vadd.f32 %v6428_v41, %v6283_v32 }
 0x44b   : > { %v6546_v10 = vadd.f32 %v6440_v3, %v3708_v34 }
 0x44d   : > { %v3790_v45 = vsel %vm1196_vm8, %v6546_v10, 0.0 }
 0x44e   : > { %v3625_v49 = vpop.permute.xlu1 %3624 }
 0x44f   : > { %v3706_v28 = vadd.f32 %v3625_v49, %v3576_v44 }
 0x450   : > { %v3523_v34 = vpop.permute.xlu2 %3522 }
 0x451   : > { %v6532_v52 = vadd.f32 %v6440_v3, %v3706_v28  ;;  %v3798_v28 = vsel %vm1196_vm8, %v6570_v6, 0.0 }
 0x452   : > { %v3627_v46 = vpop.permute.xlu0 %3626 }
 0x453   : > { %v3707_v17 = vadd.f32 %v3627_v46, %v3577_v24  ;;  %v3786_v16 = vsel %vm1196_vm8, %v6532_v52, 0.0 }
 0x454   : > { %v3787_v37 = vadd.f32 %v3786_v16, %v3785_v53  ;;  %v6596_v16 = vadd.f32 %v6440_v3, %v6432_v40  ;;  %v3588_v53 = vadd.f32 %v6435_v26, %v6295_v20 }
 0x455   : > { %v6535_v50 = vadd.f32 %v6440_v3, %v3707_v17  ;;  %v6580_v17 = vadd.f32 %v6440_v3, %v6404_v14  ;;  %v3804_v14 = vsel %vm1196_vm8, %v6588_v5, 0.0 }
 0x456   : > { %v3501_v30 = vpop.permute.xlu1 %3500 }
 0x457   : > { %v3579_v31 = vadd.f32 %v3501_v30, %v6366_v25  ;;  %v3788_v51 = vsel %vm1196_vm8, %v6535_v50, 0.0  ;;  %v6556_v25 = vadd.f32 %v6440_v3, %v6385_v15  ;;  %v3802_v43 = vsel %vm1196_vm8, %v6580_v17, 0.0 }
 0x458   : > { %v3789_v49 = vadd.f32 %v3788_v51, %v3787_v37 }
 0x459   : > { %v3709_v38 = vadd.f32 %v6334_v12, %v3579_v31  ;;  %v3794_v44 = vsel %vm1196_vm8, %v6556_v25, 0.0  ;;  %v6564_v12 = vadd.f32 %v6440_v3, %v6393_v0  ;;  %v3717_v31 = vadd.f32 %v3647_v62, %v3587_v35 }
 0x45a   : > { %v3791_v29 = vadd.f32 %v3790_v45, %v3789_v49  ;;  %v3521_v24 = vpop.permute.xlu0 %3520 }
 0x45b   : > { %v6552_v33 = vadd.f32 %v6440_v3, %v3709_v38  ;;  %v3796_v39 = vsel %vm1196_vm8, %v6564_v12, 0.0  ;;  %v3806_v38 = vsel %vm1196_vm8, %v6596_v16, 0.0  ;;  %v6603_v32 = vadd.f32 %v6440_v3, %v3717_v31 }
 0x45c   : > { %v3589_v45 = vadd.f32 %v3521_v24, %v6313_v55  ;;  %v3863_v55 = vld [vmem:[%s6859_s7] sm:$0xf] }
 0x45d   : > { %v3792_v19 = vsel %vm1196_vm8, %v6552_v33, 0.0  ;;  %v3808_v20 = vsel %vm1196_vm8, %v6603_v32, 0.0  ;;  %4191 = vmatpush.msk.msrb.mxu3 %vm3869_vm12, %v3863_v55 }
 0x45e   : > { %v3793_v59 = vadd.f32 %v3792_v19, %v3791_v29  ;;  %v3649_v46 = vpop.permute.xlu1 %3648 }
 0x45f   : > { %v3718_v37 = vadd.f32 %v3649_v46, %v3588_v53  ;;  %v4686_v46 = vmov 256.0  }
 0x460   : > { %v3795_v61 = vadd.f32 %v3794_v44, %v3793_v59  ;;  %v3590_v44 = vadd.f32 %v3523_v34, %v6326_v21  ;;  %4294 = vrcp.f32 %v4686_v46 }
 0x461   : > { %v6607_v40 = vadd.f32 %v6440_v3, %v3718_v37  ;;  %v3653_v29 = vpop.permute.xlu2 %3652 }
 0x462   : > { %v3797_v15 = vadd.f32 %v3796_v39, %v3795_v61  ;;  %v3651_v30 = vpop.permute.xlu0 %3650 }
 0x463   : > { %v3719_v26 = vadd.f32 %v3651_v30, %v3589_v45  ;;  %v3810_v39 = vsel %vm1196_vm8, %v6607_v40, 0.0 }
 0x464   : > { %v3799_v0 = vadd.f32 %v3798_v28, %v3797_v15  ;;  %v3720_v15 = vadd.f32 %v3653_v29, %v3590_v44 }
 0x465   : > { %v6619_v24 = vadd.f32 %v6440_v3, %v3719_v26 }
 0x466   : > { %v3801_v11 = vadd.f32 %v3800_v54, %v3799_v0  ;;  %v3525_v58 = vpop.permute.xlu1 %3524  ;;  %v6623_v54 = vadd.f32 %v6440_v3, %v3720_v15  ;;  %v4295_v35 = vpop.eup %4294 }
 0x467   : > { %v3591_v61 = vadd.f32 %v3525_v58, %v6387_v18  ;;  %vm3833_vm13 = vweird.f32 %v4295_v35 }
 0x468   : > { %v3803_v63 = vadd.f32 %v3802_v43, %v3801_v11  ;;  %v3812_v11 = vsel %vm1196_vm8, %v6619_v24, 0.0  ;;  %v3814_v34 = vsel %vm1196_vm8, %v6623_v54, 0.0 }
 0x469   : > { %v3529_v30 = vpop.permute.xlu2 %3528 }
 0x46a   : > { %v3805_v51 = vadd.f32 %v3804_v14, %v3803_v63  ;;  %v3593_v14 = vadd.f32 %v3529_v30, %v6406_v57 }
 0x46c   : > { %v3807_v41 = vadd.f32 %v3806_v38, %v3805_v51  ;;  %v3829_v38 = vmul.f32 256.0, %v4295_v35 }
 0x46e   : > { %v3809_v19 = vadd.f32 %v3808_v20, %v3807_v41  ;;  %v3830_v20 = vsub.f32 1.0, %v3829_v38 }
 0x470   : > { %v3811_v0 = vadd.f32 %v3810_v39, %v3809_v19  ;;  %v3831_v19 = vmul.f32 %v4295_v35, %v3830_v20 }
 0x472   : > { %v3813_v63 = vadd.f32 %v3812_v11, %v3811_v0 }
 0x474   : > { %v3815_v53 = vadd.f32 %v3814_v34, %v3813_v63 }
 0x479   : > { %v3527_v49 = vpop.permute.xlu0 %3526 }
 0x47a   : > { %v3592_v28 = vadd.f32 %v3527_v49, %v6395_v22 }
 0x481   : > { %v3655_v59 = vpop.permute.xlu1 %3654 }
 0x482   : > { %v3721_v62 = vadd.f32 %v3655_v59, %v3591_v61  ;;  %v3832_v61 = vadd.f32 %v4295_v35, %v3831_v19 }
 0x484   : > { %v6628_v43 = vadd.f32 %v6440_v3, %v3721_v62  ;;  %v3834_v15 = vsel %vm3833_vm13, %v4295_v35, %v3832_v61 }
 0x486   : > { %v3816_v31 = vsel %vm1196_vm8, %v6628_v43, 0.0 }
 0x487   : > { %v3817_v41 = vadd.f32 %v3816_v31, %v3815_v53 }
 0x489   : > { %v3657_v21 = vpop.permute.xlu0 %3656 }
 0x48a   : > { %v3722_v18 = vadd.f32 %v3657_v21, %v3592_v28 }
 0x48c   : > { %v6631_v22 = vadd.f32 %v6440_v3, %v3722_v18  ;;  %v3864_v18 = vld [vmem:[%s6860_s8] sm:$0x1] }
 0x48e   : > { %v3818_v58 = vsel %vm1196_vm8, %v6631_v22, 0.0 }
 0x48f   : > { %v3819_v45 = vadd.f32 %v3818_v58, %v3817_v41 }
 0x491   : > { %v3659_v51 = vpop.permute.xlu1 %3658 }
 0x492   : > { %v3723_v37 = vadd.f32 %v3659_v51, %v3593_v14 }
 0x494   : > { %v6641_v49 = vadd.f32 %v6440_v3, %v3723_v37  ;;  %v3838_v3 = vld [vmem:[%s6858_s6] sm:$0x1] }
 0x496   : > { %v3820_v29 = vsel %vm1196_vm8, %v6641_v49, 0.0 }
 0x497   : > { %v3821_v57 = vadd.f32 %v3820_v29, %v3819_v45 }
 0x499   : > { %v3822_v26 = vrot.slane %v3821_v57, 4 }
 0x49b   : > { %v3823_v59 = vadd.f32 %v3822_v26, %v3821_v57 }
 0x49d   : > { %v3824_v44 = vrot.slane %v3823_v59, 2 }
 0x49f   : > { %v3825_v39 = vadd.f32 %v3824_v44, %v3823_v59 }
 0x4a1   : > { %v3826_v55 = vrot.slane %v3825_v39, 1 }
 0x4a3   : > { %v3827_v28 = vadd.f32 %v3826_v55, %v3825_v39  ;;  %v4301_v39 = vld [vmem:[%s4841_s23] sm:$0xff]  ;;  %v4302_v55 = vld [vmem:[%s4841_s23 + $0x8] sm:$0xff] }
 0x4a5   : > { %v3835_v62 = vmul.f32 %v3834_v15, %v3827_v28 }
 0x4a7   : > { %4190 = vmatmul.msk.f32.vlgmr.msrb.gmra.mxu2 %vm1196_vm8, %v3835_v62  ;;  %v4304_v62 = vld [vmem:[%s4841_s23 + $0x18] sm:$0xff] }
 0x52a   : > { %v3859_v0 = vpop.f32.mrf.mxu2 }
 0x52b   : > { %v3860_v21 = vadd.f32 %v3859_v0, %v3838_v3  ;;  %v4305_v3 = vld [vmem:[%s4841_s23 + $0x20] sm:$0xff] }
 0x52d   : > { %v3862_v46 = vmax.f32 %v3860_v21, 0.0 }
 0x52f   : > { %4192 = vmatmul.msk.f32.vlgmr.msrb.gmra.mxu3 %vm3865_vm14, %v3862_v46  ;;  %v4307_v46 = vld [vmem:[%s4841_s23 + $0x30] sm:$0xff] }
 0x5b2   : > { %v3890_v11 = vpop.f32.mrf.mxu3 }
 0x5b3   : > { %v3891_v63 = vadd.f32 %v3890_v11, %v3864_v18 }
 0x5b5   : > { %v4193_v30 = vmul.f32 -1.442695, %v3891_v63  ;;  %v4308_v63 = vld [vmem:[%s4841_s23 + $0x38] sm:$0xff] }
 0x5b7   : > { %4296 = vpow2.f32 %v4193_v30 }
 0x5bd   : > { %v4297_v35 = vpop.eup %4296 }
 0x5be   : > { %v3896_v34 = vadd.f32 1.0, %v4297_v35  ;;  %v4309_v35 = vld [vmem:[%s4841_s23 + $0x40] sm:$0xff] }
 0x5c0   : > { %4298 = vrcp.f32 %v3896_v34  ;;  %v3908_v51 = vand.u32 2147483648, %v3896_v34  ;;  %v3906_v37 = vand.u32 2147483647, %v3896_v34  ;;  %vm3902_vm0 = vweird.f32 %v3896_v34 }
 0x5c2   : > { %v3909_v41 = vor.u32 1.1754944e-38, %v3908_v51  ;;  %vm3907_vm2 = vcmp.eq.f32.partialorder %v3906_v37, 8.507059e+37 }
 0x5c6   : > { %v4299_v14 = vpop.eup %4298 }
 0x5c7   : > { %v3898_v31 = vmul.f32 %v4299_v14, %v3896_v34  ;;  %vm3903_vm15 = vweird.f32 %v4299_v14 }
 0x5c8   : > { %vm3904_vm1 = vmor %vm3902_vm0, %vm3903_vm15 }
 0x5c9   : > { %v3899_v53 = vsub.f32 1.0, %v3898_v31 }
 0x5cb   : > { %v3900_v58 = vmul.f32 %v4299_v14, %v3899_v53  ;;  %v4311_v53 = vld [vmem:[%s4841_s23 + $0x50] sm:$0xff] }
 0x5cd   : > { %v3901_v38 = vadd.f32 %v4299_v14, %v3900_v58  ;;  %v4312_v58 = vld [vmem:[%s4841_s23 + $0x58] sm:$0xff] }
 0x5cf   : > { %v3905_v45 = vsel %vm3904_vm1, %v4299_v14, %v3901_v38  ;;  %v4310_v14 = vld [vmem:[%s4841_s23 + $0x48] sm:$0xff]  ;;  %v4313_v38 = vld [vmem:[%s4841_s23 + $0x60] sm:$0xff] }
 0x5d0   : > { %v3910_v29 = vsel %vm3907_vm2, %v3909_v41, %v3905_v45  ;;  %v4314_v45 = vld [vmem:[%s4841_s23 + $0x68] sm:$0xff] }
 0x5d1   : > { %v6652_v20 = vperm.slane %v3910_v29, 0 }
 0x5d3   : > { %v3913_v57 = vmul.f32 %v6652_v20, %v6444_v4  ;;  %v3914_v26 = vmul.f32 %v6652_v20, %v6450_v23  ;;  %v3915_v19 = vmul.f32 %v6652_v20, %v6454_v27  ;;  %v3916_v59 = vmul.f32 %v6652_v20, %v6461_v42  ;;  %v4303_v27 = vld [vmem:[%s4841_s23 + $0x10] sm:$0xff] }
 0x5d4   : > { %v3917_v44 = vmul.f32 %v6652_v20, %v6469_v60  ;;  %v3918_v61 = vmul.f32 %v6652_v20, %v6474_v48  ;;  %v3919_v4 = vmul.f32 %v6652_v20, %v6480_v7  ;;  %v3920_v42 = vmul.f32 %v6652_v20, %v6488_v9  ;;  %v4306_v9 = vld [vmem:[%s4841_s23 + $0x28] sm:$0xff] }
 0x5d5   : > { %v3945_v23 = vadd.f32 %v4301_v39, %v3913_v57  ;;  %v3946_v15 = vadd.f32 %v4302_v55, %v3914_v26  ;;  %v3947_v28 = vadd.f32 %v4303_v27, %v3915_v19  ;;  %v3948_v60 = vadd.f32 %v4304_v62, %v3916_v59  ;;  %v4315_v57 = vld [vmem:[%s4841_s23 + $0x70] sm:$0xff]  ;;  %v4316_v19 = vld [vmem:[%s4841_s23 + $0x78] sm:$0xff] }
 0x5d6   : > { %v3921_v48 = vmul.f32 %v6652_v20, %v6492_v56  ;;  %v3949_v0 = vadd.f32 %v4305_v3, %v3917_v44  ;;  %v3922_v7 = vmul.f32 %v6652_v20, %v6501_v36  ;;  %v3950_v21 = vadd.f32 %v4306_v9, %v3918_v61  ;;  %v4317_v44 = vld [vmem:[%s4841_s23 + $0x80] sm:$0xff] }
 0x5d7   : > { %3977 = vst.msk [vmem:[%s6679_s27] sm:$0xff] %vm1196_vm8, %v3945_v23  ;;  %v3923_v56 = vmul.f32 %v6652_v20, %v6504_v2  ;;  %v3951_v18 = vadd.f32 %v4307_v46, %v3919_v4  ;;  %v3924_v11 = vmul.f32 %v6652_v20, %v6510_v8  ;;  %v3952_v36 = vadd.f32 %v4308_v63, %v3920_v42  ;;  %v4318_v4 = vld [vmem:[%s4841_s23 + $0x88] sm:$0xff]  ;;  %v4319_v23 = vld [vmem:[%s4841_s23 + $0x90] sm:$0xff] }
 0x5d8   : > { %3978 = vst.msk [vmem:[%s6679_s27 + $0x8] sm:$0xff] %vm1196_vm8, %v3946_v15  ;;  %v3925_v30 = vmul.f32 %v6652_v20, %v6522_v13  ;;  %v3953_v2 = vadd.f32 %v4309_v35, %v3921_v48  ;;  %v3926_v34 = vmul.f32 %v6652_v20, %v6526_v47  ;;  %v3954_v8 = vadd.f32 %v4310_v14, %v3922_v7  ;;  %v4320_v15 = vld [vmem:[%s4841_s23 + $0x98] sm:$0xff]  ;;  %v4327_v46 = vld [vmem:[%s4841_s23 + $0xd0] sm:$0xff] }
 0x5d9   : > { %3979 = vst.msk [vmem:[%s6679_s27 + $0x10] sm:$0xff] %vm1196_vm8, %v3947_v28  ;;  %v3927_v31 = vmul.f32 %v6652_v20, %v6532_v52  ;;  %v3955_v13 = vadd.f32 %v4311_v53, %v3923_v56  ;;  %v3928_v51 = vmul.f32 %v6652_v20, %v6535_v50  ;;  %v3956_v47 = vadd.f32 %v4312_v58, %v3924_v11  ;;  %v4328_v11 = vld [vmem:[%s4841_s23 + $0xd8] sm:$0xff] }
 0x5da   : > { %3980 = vst.msk [vmem:[%s6679_s27 + $0x18] sm:$0xff] %vm1196_vm8, %v3948_v60  ;;  %v3929_v37 = vmul.f32 %v6652_v20, %v6546_v10  ;;  %v3957_v52 = vadd.f32 %v4313_v38, %v3925_v30  ;;  %v3930_v41 = vmul.f32 %v6652_v20, %v6552_v33  ;;  %v3958_v50 = vadd.f32 %v4314_v45, %v3926_v34  ;;  %v4330_v30 = vld [vmem:[%s4841_s23 + $0xe8] sm:$0xff] }
 0x5db   : > { %3981 = vst.msk [vmem:[%s6679_s27 + $0x20] sm:$0xff] %vm1196_vm8, %v3949_v0  ;;  %v3931_v29 = vmul.f32 %v6652_v20, %v6556_v25  ;;  %v3959_v10 = vadd.f32 %v4315_v57, %v3927_v31  ;;  %v3932_v26 = vmul.f32 %v6652_v20, %v6564_v12  ;;  %v3960_v33 = vadd.f32 %v4316_v19, %v3928_v51 }
 0x5dc   : > { %3982 = vst.msk [vmem:[%s6679_s27 + $0x28] sm:$0xff] %vm1196_vm8, %v3950_v21  ;;  %v3933_v59 = vmul.f32 %v6652_v20, %v6570_v6  ;;  %v3961_v25 = vadd.f32 %v4317_v44, %v3929_v37  ;;  %v3934_v61 = vmul.f32 %v6652_v20, %v6576_v1  ;;  %v3962_v12 = vadd.f32 %v4318_v4, %v3930_v41  ;;  %v4326_v21 = vld [vmem:[%s4841_s23 + $0xc8] sm:$0xff] }
 0x5dd   : > { %3983 = vst.msk [vmem:[%s6679_s27 + $0x30] sm:$0xff] %vm1196_vm8, %v3951_v18  ;;  %v3935_v39 = vmul.f32 %v6652_v20, %v6580_v17  ;;  %v3963_v6 = vadd.f32 %v4319_v23, %v3931_v29  ;;  %v3936_v55 = vmul.f32 %v6652_v20, %v6588_v5  ;;  %v3964_v1 = vadd.f32 %v4320_v15, %v3932_v26  ;;  %v4321_v17 = vld [vmem:[%s4841_s23 + $0xa0] sm:$0xff]  ;;  %v4322_v5 = vld [vmem:[%s4841_s23 + $0xa8] sm:$0xff] }
 0x5de   : > { %3984 = vst.msk [vmem:[%s6679_s27 + $0x38] sm:$0xff] %vm1196_vm8, %v3952_v36  ;;  %v3937_v27 = vmul.f32 %v6652_v20, %v6596_v16  ;;  %v3965_v28 = vadd.f32 %v4321_v17, %v3933_v59  ;;  %v3938_v42 = vmul.f32 %v6652_v20, %v6603_v32  ;;  %v3966_v62 = vadd.f32 %v4322_v5, %v3934_v61  ;;  %v4323_v16 = vld [vmem:[%s4841_s23 + $0xb0] sm:$0xff]  ;;  %v4324_v32 = vld [vmem:[%s4841_s23 + $0xb8] sm:$0xff] }
 0x5df   : > { %3985 = vst.msk [vmem:[%s6679_s27 + $0x40] sm:$0xff] %vm1196_vm8, %v3953_v2  ;;  %v3939_v60 = vmul.f32 %v6652_v20, %v6607_v40  ;;  %v3967_v48 = vadd.f32 %v4323_v16, %v3935_v39  ;;  %v3940_v3 = vmul.f32 %v6652_v20, %v6619_v24  ;;  %v3968_v0 = vadd.f32 %v4324_v32, %v3936_v55  ;;  %v4325_v40 = vld [vmem:[%s4841_s23 + $0xc0] sm:$0xff]  ;;  %v4332_v2 = vld [vmem:[%s4841_s23 + $0xf8] sm:$0xff] }
 0x5e0   : > { %3986 = vst.msk [vmem:[%s6679_s27 + $0x48] sm:$0xff] %vm1196_vm8, %v3954_v8  ;;  %v3941_v7 = vmul.f32 %v6652_v20, %v6623_v54  ;;  %v3969_v9 = vadd.f32 %v4325_v40, %v3937_v27  ;;  %v3942_v24 = vmul.f32 %v6652_v20, %v6628_v43  ;;  %v3970_v56 = vadd.f32 %v4326_v21, %v3938_v42 }
 0x5e1   : > { %3987 = vst.msk [vmem:[%s6679_s27 + $0x50] sm:$0xff] %vm1196_vm8, %v3955_v13  ;;  %v3943_v54 = vmul.f32 %v6652_v20, %v6631_v22  ;;  %v3971_v18 = vadd.f32 %v4327_v46, %v3939_v60  ;;  %v3944_v43 = vmul.f32 %v6652_v20, %v6641_v49  ;;  %v3972_v63 = vadd.f32 %v4328_v11, %v3940_v3  ;;  %v4329_v22 = vld [vmem:[%s4841_s23 + $0xe0] sm:$0xff]  ;;  %v4331_v49 = vld [vmem:[%s4841_s23 + $0xf0] sm:$0xff] }
 0x5e2   : > { %3988 = vst.msk [vmem:[%s6679_s27 + $0x58] sm:$0xff] %vm1196_vm8, %v3956_v47  ;;  %v3973_v36 = vadd.f32 %v4329_v22, %v3941_v7  ;;  %v3974_v35 = vadd.f32 %v4330_v30, %v3942_v24 }
 0x5e3   : > { %3989 = vst.msk [vmem:[%s6679_s27 + $0x60] sm:$0xff] %vm1196_vm8, %v3957_v52  ;;  %v3975_v20 = vadd.f32 %v4331_v49, %v3943_v54  ;;  %v3976_v34 = vadd.f32 %v4332_v2, %v3944_v43 }
 0x5e4   : > { %3990 = vst.msk [vmem:[%s6679_s27 + $0x68] sm:$0xff] %vm1196_vm8, %v3958_v50 }
 0x5e5   : > { %3991 = vst.msk [vmem:[%s6679_s27 + $0x70] sm:$0xff] %vm1196_vm8, %v3959_v10 }
 0x5e6   : > { %3992 = vst.msk [vmem:[%s6679_s27 + $0x78] sm:$0xff] %vm1196_vm8, %v3960_v33 }
 0x5e7   : > { %3993 = vst.msk [vmem:[%s6679_s27 + $0x80] sm:$0xff] %vm1196_vm8, %v3961_v25 }
 0x5e8   : > { %3994 = vst.msk [vmem:[%s6679_s27 + $0x88] sm:$0xff] %vm1196_vm8, %v3962_v12 }
 0x5e9   : > { %3995 = vst.msk [vmem:[%s6679_s27 + $0x90] sm:$0xff] %vm1196_vm8, %v3963_v6 }
 0x5ea   : > { %3996 = vst.msk [vmem:[%s6679_s27 + $0x98] sm:$0xff] %vm1196_vm8, %v3964_v1 }
 0x5eb   : > { %3997 = vst.msk [vmem:[%s6679_s27 + $0xa0] sm:$0xff] %vm1196_vm8, %v3965_v28 }
 0x5ec   : > { %3998 = vst.msk [vmem:[%s6679_s27 + $0xa8] sm:$0xff] %vm1196_vm8, %v3966_v62 }
 0x5ed   : > { %3999 = vst.msk [vmem:[%s6679_s27 + $0xb0] sm:$0xff] %vm1196_vm8, %v3967_v48 }
 0x5ee   : > { %4000 = vst.msk [vmem:[%s6679_s27 + $0xb8] sm:$0xff] %vm1196_vm8, %v3968_v0 }
 0x5ef   : > { %4001 = vst.msk [vmem:[%s6679_s27 + $0xc0] sm:$0xff] %vm1196_vm8, %v3969_v9 }
 0x5f0   : > { %4002 = vst.msk [vmem:[%s6679_s27 + $0xc8] sm:$0xff] %vm1196_vm8, %v3970_v56 }
 0x5f1   : > { %4003 = vst.msk [vmem:[%s6679_s27 + $0xd0] sm:$0xff] %vm1196_vm8, %v3971_v18 }
 0x5f2   : > { %4004 = vst.msk [vmem:[%s6679_s27 + $0xd8] sm:$0xff] %vm1196_vm8, %v3972_v63 }
 0x5f3   : > { %4005 = vst.msk [vmem:[%s6679_s27 + $0xe0] sm:$0xff] %vm1196_vm8, %v3973_v36 }
 0x5f4   : > { %4006 = vst.msk [vmem:[%s6679_s27 + $0xe8] sm:$0xff] %vm1196_vm8, %v3974_v35 }
 0x5f5   : > { %4007 = vst.msk [vmem:[%s6679_s27 + $0xf0] sm:$0xff] %vm1196_vm8, %v3975_v20 }
 0x5f6   : > { %4008 = vst.msk [vmem:[%s6679_s27 + $0xf8] sm:$0xff] %vm1196_vm8, %v3976_v34 }
 0x5f7   : > { %4594 = shalt.err (!%p4591_p10)
}
 0x5f8   : > { %s4687_s24 = smov 128   ;;  %s4688_s27 = smov 8  }
 0x5f9   : > { %4223 = dma.vmem_to_hbm [thread:$0]  (%p4805_p3), %s4023_s19, 4096, %s4025_s1, %s4010_s15, %s4687_s24, %s4687_s24, %s4688_s27  }
 0x5fa PF: > { %s4039_s3 = sand.u32 1, %s4661_s30   ;;  %p6890_p12 = scmp.ge.s32.totalorder %s4673_s12, 2 }
 0x5fb   : > { %s4040_s13 = scalar_lea.sflag [#allocation5], %s4039_s3 }
 0x5fc   : > { %p4237_p13 = pnand %p6890_p12, %p4774_p6 }
 0x5fe   : > { %p4238_p0 = pneg %p4237_p13 }
 0x600   : > { %4620 = dma.done.wait (%p4238_p0), %s4040_s13, 4096  }
 0x601   : > { %4622 = vsyncadd (%p4238_p0), %s4040_s13, 4294963200  ;;  %s6891_s22 = sld [smem:[#allocation13_spill]]  ;;  %p23_p5 = scmp.ge.s32.totalorder %s4795_s14, 4  }
 0x602   : > { %s6892_s30 = smov %s4665_s10  ;;  %s6893_s10 = smov %s4669_s11 }
 0x603   : > { %s6895_s12 = smov %s4795_s14  ;;  %25 = sbr.rel (!%p23_p5) target bundleno = 9 (0x9), region = 111 }
 0x607   : > { %s6894_s11 = smov %s6891_s22 }
 0x608   :  { %4046 = vsyncpa [#allocation4], 1 }
 0x609   :  { %4048 = vsyncpa [#allocation4 + $0x1], 1 }
 0x60a   :  { %4049 = vsyncpa [#allocation7], 1 }
 0x60b   :  { %4050 = vsyncpa [#allocation5], 1 }
 0x60c   :  { %4052 = vsyncpa [#allocation5 + $0x1], 1 }

</bundles_post_ra>
